<compile_context>
chip_gen: v7x
topology: tpu7x:2x2x1
jax: 0.10.0
libtpu: 0.0.40
codegen_flags: <defaults>
</compile_context>

<pallas_src>
import functools

import jax
import jax.numpy as jnp
from jax.experimental import pallas as pl
from jax.experimental.pallas import tpu as pltpu


_VMEM = pl.BlockSpec(memory_space=pltpu.MemorySpace.VMEM)


def _relu(x):
    return jnp.maximum(x, 0.0)


def _dot(a, b):
    return jnp.dot(a, b, preferred_element_type=jnp.float32)


def _round_up(x, m):
    return ((x + m - 1) // m) * m


# ----------------------------------------------------------------------------
# Single fused kernel: preprocessing + LSTM encoder/decoder + classifier
# ----------------------------------------------------------------------------
def _orange_kernel(
        newx_ref, m_ref, dm_ref, mask_ref,
        g_w1x_ref, g_w1m_ref, g_b1_ref, g_w2_ref, g_b2_ref, g_w3_ref, g_b3_ref,
        mri_w_ref, mri_b_ref, demo_w_ref, demo_b_ref,
        f0_wx_ref, f0_wd_ref, f0_b_ref, f1_w_ref, f1_b_ref, f2_w_ref, f2_b_ref,
        wih_lat_ref, wih_fo_ref, whh_ref, lstm_b_ref,
        ffm_w_ref, ffm_b_ref, ffl_wl_ref, ffl_wf_ref, ffl_bl_ref, ffl_bf_ref,
        c0_w_ref, c0_b_ref, c1_w_ref, c1_b_ref, c2_w_ref, c2_b_ref,
        gs_ref, hat_ref, lat_out_ref, rec_lat_ref, rec_fo_ref, cls_ref,
        *, lat, seq_num, pred_length, mid, bp):
    # ---------------- fused pre-processing over the (S*Bp, feat) slab --------
    newx = newx_ref[...]
    m = m_ref[...]
    dm = dm_ref[...]

    # TODO(synk): Generator class body was elided in the reference; standard
    # GAIN generator G([X, M]) is used.  Split-weight form avoids an
    # unaligned in-kernel lane concat of [X, M].
    g1 = _relu(_dot(newx, g_w1x_ref[...]) + _dot(m, g_w1m_ref[...]) + g_b1_ref[...])
    g2 = _relu(_dot(g1, g_w2_ref[...]) + g_b2_ref[...])
    gs = jax.nn.sigmoid(_dot(g2, g_w3_ref[...]) + g_b3_ref[...])

    hat = newx * m + gs * (1.0 - m)

    mai = _relu(_dot(hat, mri_w_ref[...]) + mri_b_ref[...]) + hat
    dmo = _relu(_dot(dm, demo_w_ref[...]) + demo_b_ref[...]) + dm

    # TODO(synk): Fusion/encoder-input construction was elided in the
    # reference; reconstructed as the 3-layer Fusion MLP on concat(MAI, Demo),
    # split-weight form (no lane concat).
    h0 = _relu(_dot(mai, f0_wx_ref[...]) + _dot(dmo, f0_wd_ref[...]) + f0_b_ref[...])
    h1 = _relu(_dot(h0, f1_w_ref[...]) + f1_b_ref[...])
    latent = _dot(h1, f2_w_ref[...]) + f2_b_ref[...]          # (S*Bp, lat)

    gs_ref[...] = gs
    hat_ref[...] = hat
    lat_out_ref[...] = latent

    # ---------------- LSTM gate constants (hoisted, computed once) -----------
    # sigmoid(x) = 0.5*tanh(0.5*x) + 0.5 -> one EUP tanh pass over all 4 gates:
    #   i/f/o lanes: a = 0.5, c = 0.5      g lanes: a = 1.0, c = 0.0
    lane_id = jax.lax.broadcasted_iota(jnp.int32, (1, 4 * lat), 1)
    is_g = jnp.logical_and(lane_id >= 2 * lat, lane_id < 3 * lat)
    gate_a = jnp.where(is_g, 1.0, 0.5).astype(jnp.float32)
    gate_c = jnp.where(is_g, 0.0, 0.5).astype(jnp.float32)

    def lstm_step(x_lat, x_fo, h, c):
        # Gate pre-activation: 4*lat = 128 lanes (lane-exact vreg width).
        gates = (_dot(x_lat, wih_lat_ref[...]) + _dot(x_fo, wih_fo_ref[...])
                 + _dot(h, whh_ref[...]) + lstm_b_ref[...])
        act = gate_a * jnp.tanh(gate_a * gates) + gate_c       # single EUP pass
        i_g = act[:, 0 * lat:1 * lat]
        f_g = act[:, 1 * lat:2 * lat]
        g_g = act[:, 2 * lat:3 * lat]
        o_g = act[:, 3 * lat:4 * lat]
        c_new = f_g * c + i_g * g_g
        h_new = o_g * jnp.tanh(c_new)
        return h_new, c_new

    def ff_block(y):
        for l in range(mid):
            y = _relu(_dot(y, ffm_w_ref[l]) + ffm_b_ref[l])
        out_lat = _dot(y, ffl_wl_ref[...]) + ffl_bl_ref[...]
        out_fo = _dot(y, ffl_wf_ref[...]) + ffl_bf_ref[...]
        return out_lat, out_fo

    h = jnp.zeros((bp, lat), jnp.float32)
    c = jnp.zeros((bp, lat), jnp.float32)

    # ---------------- encoder (fully unrolled in-kernel; seq_num is tiny) ----
    inp_lat = latent[0:bp]
    inp_fo = dmo[0:bp]
    h, c = lstm_step(inp_lat, inp_fo, h, c)
    d_lat, d_fo = ff_block(h)
    s_lat = d_lat + inp_lat
    s_fo = d_fo + inp_fo
    rec_lat_ref[0] = s_lat
    rec_fo_ref[0] = s_fo

    for i in range(1, seq_num):
        # TODO(synk): HardCalculateLayer body was not given; interpreted as
        # "use the observed input where the visit exists, else the prediction".
        mk = mask_ref[i]                                       # (bp, 1)
        inp_lat = mk * latent[i * bp:(i + 1) * bp] + (1.0 - mk) * s_lat
        inp_fo = mk * dmo[i * bp:(i + 1) * bp] + (1.0 - mk) * s_fo
        h, c = lstm_step(inp_lat, inp_fo, h, c)
        d_lat, d_fo = ff_block(h)
        s_lat = d_lat + inp_lat
        s_fo = d_fo + inp_fo
        if i != seq_num - 1:
            rec_lat_ref[i] = s_lat
            rec_fo_ref[i] = s_fo

    # ---------------- decoder (autoregressive, unrolled) ---------------------
    for t in range(pred_length):
        h, c = lstm_step(s_lat, s_fo, h, c)
        d_lat, d_fo = ff_block(h)
        s_lat = d_lat + s_lat
        s_fo = d_fo + s_fo
        rec_lat_ref[seq_num - 1 + t] = s_lat
        rec_fo_ref[seq_num - 1 + t] = s_fo

    # ---------------- classifier head (last decoder output[:, :lat]) ---------
    y = jax.nn.sigmoid(_dot(s_lat, c0_w_ref[...]) + c0_b_ref[...])
    y = jax.nn.sigmoid(_dot(y, c1_w_ref[...]) + c1_b_ref[...])
    cls_ref[...] = _dot(y, c2_w_ref[...]) + c2_b_ref[...]


# ----------------------------------------------------------------------------
# Parameter init (deterministic, shapes follow the nn.Module __init__)
# ----------------------------------------------------------------------------
def init_params(key, cfg):
    Dim, Fo, lat, hid, lab = (cfg["Dim"], cfg["features_out"], cfg["latDim"],
                              cfg["hidden"], cfg["labels"])
    H1, H2, mid = cfg["H_Dim1"], cfg["H_Dim2"], cfg["mid_layer_num"]

    names_shapes = [
        # GAIN-style Generator: [X, M] -> H1 -> H2 -> Dim
        ("g_w1", (2 * Dim, H1)), ("g_b1", (H1,)),
        ("g_w2", (H1, H2)), ("g_b2", (H2,)),
        ("g_w3", (H2, Dim)), ("g_b3", (Dim,)),
        # MRI / Demo residual linears
        ("mri_w", (Dim, Dim)), ("mri_b", (Dim,)),
        ("demo_w", (Fo, Fo)), ("demo_b", (Fo,)),
        # Fusion MLP
        ("fusion0_w", (Dim + Fo, lat)), ("fusion0_b", (lat,)),
        ("fusion1_w", (lat, lat)), ("fusion1_b", (lat,)),
        ("fusion2_w", (lat, lat)), ("fusion2_b", (lat,)),
        # LSTM (weights stored pre-transposed: (in, 4H) / (H, 4H)); b = b_ih + b_hh
        ("lstm_wih", (lat + Fo, 4 * lat)),
        ("lstm_whh", (lat, 4 * lat)),
        ("lstm_b", (4 * lat,)),
        # Fforward last layer (view_num == 2): lat -> lat + Fo
        ("ff_last_w", (lat, lat + Fo)), ("ff_last_b", (lat + Fo,)),
        # Classifier
        ("cls0_w", (lat, hid)), ("cls0_b", (hid,)),
        ("cls1_w", (hid, hid)), ("cls1_b", (hid,)),
        ("cls2_w", (hid, lab)), ("cls2_b", (lab,)),
    ]
    for l in range(mid):
        names_shapes.append((f"ff{l}_w", (lat, lat)))
        names_shapes.append((f"ff{l}_b", (lat,)))

    keys = jax.random.split(key, len(names_shapes))
    params = {}
    for (name, shape), k in zip(names_shapes, keys):
        params[name] = 0.1 * jax.random.normal(k, shape, jnp.float32)
    return params


def prepare_params(params, cfg):
    """One-time layout bake: splits / row-biases / stacks done OUTSIDE the
    jitted forward so the per-call HLO is just padding + one pallas_call."""
    Dim, lat, mid = cfg["Dim"], cfg["latDim"], cfg["mid_layer_num"]
    row = lambda b: b.reshape(1, -1)
    return dict(
        g_w1x=params["g_w1"][:Dim], g_w1m=params["g_w1"][Dim:], g_b1=row(params["g_b1"]),
        g_w2=params["g_w2"], g_b2=row(params["g_b2"]),
        g_w3=params["g_w3"], g_b3=row(params["g_b3"]),
        mri_w=params["mri_w"], mri_b=row(params["mri_b"]),
        demo_w=params["demo_w"], demo_b=row(params["demo_b"]),
        f0_wx=params["fusion0_w"][:Dim], f0_wd=params["fusion0_w"][Dim:],
        f0_b=row(params["fusion0_b"]),
        f1_w=params["fusion1_w"], f1_b=row(params["fusion1_b"]),
        f2_w=params["fusion2_w"], f2_b=row(params["fusion2_b"]),
        wih_lat=params["lstm_wih"][:lat], wih_fo=params["lstm_wih"][lat:],
        whh=params["lstm_whh"], lstm_b=row(params["lstm_b"]),
        ffm_w=jnp.stack([params[f"ff{l}_w"] for l in range(mid)]),
        ffm_b=jnp.stack([params[f"ff{l}_b"].reshape(1, lat) for l in range(mid)]),
        ffl_wl=params["ff_last_w"][:, :lat], ffl_wf=params["ff_last_w"][:, lat:],
        ffl_bl=row(params["ff_last_b"][:lat]), ffl_bf=row(params["ff_last_b"][lat:]),
        c0_w=params["cls0_w"], c0_b=row(params["cls0_b"]),
        c1_w=params["cls1_w"], c1_b=row(params["cls1_b"]),
        c2_w=params["cls2_w"], c2_b=row(params["cls2_b"]),
    )


# ----------------------------------------------------------------------------
# Orange forward pass (thin JAX glue around ONE fused Pallas kernel)
# ----------------------------------------------------------------------------
def orange_forward(p, cfg, X_score, X_missing_mask, New_X, M, X_demo):
    del X_score  # not used in the visible forward path
    B, S, Dim = New_X.shape
    Fo = X_demo.shape[2]
    lat = cfg["latDim"]
    lab = cfg["labels"]
    mid = cfg["mid_layer_num"]
    P = cfg["pred_length"]

    Bp = _round_up(B, 8)          # sublane-pad the batch
    T = S - 1 + P                 # merged encoder+decoder output length

    # Time-major, batch-sublane-padded slabs: inside the kernel, encoder step i
    # reads the contiguous 8-aligned row block [i*Bp, (i+1)*Bp).
    def to_tm(x):  # (B, S, f) -> (S*Bp, f)
        xt = jnp.transpose(x, (1, 0, 2))
        xt = jnp.pad(xt, ((0, 0), (0, Bp - B), (0, 0)))
        return xt.reshape(S * Bp, x.shape[2])

    newx_tm = to_tm(New_X)
    m_tm = to_tm(M)
    demo_tm = to_tm(X_demo)
    mask_tm = jnp.pad(X_missing_mask.T, ((0, 0), (0, Bp - B)))[..., None]  # (S,Bp,1)

    kernel = functools.partial(_orange_kernel, lat=lat, seq_num=S,
                               pred_length=P, mid=mid, bp=Bp)

    gs_tm, hat_tm, lat_tm, rec_lat, rec_fo, cls_p = pl.pallas_call(
        kernel,
        out_shape=(jax.ShapeDtypeStruct((S * Bp, Dim), jnp.float32),
                   jax.ShapeDtypeStruct((S * Bp, Dim), jnp.float32),
                   jax.ShapeDtypeStruct((S * Bp, lat), jnp.float32),
                   jax.ShapeDtypeStruct((T, Bp, lat), jnp.float32),
                   jax.ShapeDtypeStruct((T, Bp, Fo), jnp.float32),
                   jax.ShapeDtypeStruct((Bp, lab), jnp.float32)),
        in_specs=[_VMEM] * 38,
        out_specs=(_VMEM,) * 6,
    )(
        newx_tm, m_tm, demo_tm, mask_tm,
        p["g_w1x"], p["g_w1m"], p["g_b1"], p["g_w2"], p["g_b2"], p["g_w3"], p["g_b3"],
        p["mri_w"], p["mri_b"], p["demo_w"], p["demo_b"],
        p["f0_wx"], p["f0_wd"], p["f0_b"], p["f1_w"], p["f1_b"], p["f2_w"], p["f2_b"],
        p["wih_lat"], p["wih_fo"], p["whh"], p["lstm_b"],
        p["ffm_w"], p["ffm_b"], p["ffl_wl"], p["ffl_wf"], p["ffl_bl"], p["ffl_bf"],
        p["c0_w"], p["c0_b"], p["c1_w"], p["c1_b"], p["c2_w"], p["c2_b"],
    )

    def from_tm(x2d):  # (S*Bp, f) -> (B, S, f)
        f = x2d.shape[1]
        return x2d.reshape(S, Bp, f)[:, :B].transpose(1, 0, 2)

    G_sample = from_tm(gs_tm)
    Hat_New_X = from_tm(hat_tm)
    latent_temp = from_tm(lat_tm)

    encoder_outputs = jnp.concatenate(
        [rec_lat[:S - 1, :B], rec_fo[:S - 1, :B]], axis=2)           # (S-1, B, lat+Fo)
    decoder_outputs_out = list(
        jnp.split(rec_fo[S - 1:, :B], Fo, axis=2))                   # Fo x (P, B, 1)
    class_out = cls_p[:B]                                            # (B, labels)

    return (G_sample, Hat_New_X, latent_temp, encoder_outputs,
            decoder_outputs_out, class_out)


# ----------------------------------------------------------------------------
# Driver
# ----------------------------------------------------------------------------
if __name__ == "__main__":
    cfg = dict(features_in=16, features_out=4, Dim=16, latDim=32, hidden=32,
               labels=2, seq_num=6, pred_length=3, mid_layer_num=2,
               view_num=2, H_Dim1=32, H_Dim2=32)
    B, S, Dim, Fo = 2, cfg["seq_num"], cfg["Dim"], cfg["features_out"]

    root = jax.random.PRNGKey(0)
    k_p, k1, k2, k3, k4, k5 = jax.random.split(root, 6)
    params = init_params(k_p, cfg)
    prepped = prepare_params(params, cfg)   # one-time weight-layout bake

    X_score = jax.random.normal(k1, (B, S, Fo), jnp.float32)
    X_missing_mask = jax.random.bernoulli(k2, 0.8, (B, S)).astype(jnp.float32)
    New_X = jax.random.normal(k3, (B, S, Dim), jnp.float32)
    M = jax.random.bernoulli(k4, 0.7, (B, S, Dim)).astype(jnp.float32)
    X_demo = jax.random.normal(k5, (B, S, Fo), jnp.float32)

    fwd = jax.jit(lambda p, xs, xm, nx, mm, xd: orange_forward(p, cfg, xs, xm, nx, mm, xd))
    outs = fwd(prepped, X_score, X_missing_mask, New_X, M, X_demo)
    (G_sample, Hat_New_X, latent_temp, encoder_outputs,
     decoder_outputs_out, class_out) = outs

    jax.block_until_ready(outs)

    assert G_sample.shape == (B, S, Dim)
    assert Hat_New_X.shape == (B, S, Dim)
    assert latent_temp.shape == (B, S, cfg["latDim"])
    assert encoder_outputs.shape == (S - 1, B, cfg["latDim"] + Fo)
    assert len(decoder_outputs_out) == Fo
    assert decoder_outputs_out[0].shape == (cfg["pred_length"], B, 1)
    assert class_out.shape == (B, cfg["labels"])

    print("KERNEL_OK")
</pallas_src>

<mosaic_0001>
module attributes {stable_mosaic.version = 11 : i64} {
  func.func @_orange_kernel(%arg0: memref<48x16xf32, #tpu.memory_space<vmem>>, %arg1: memref<48x16xf32, #tpu.memory_space<vmem>>, %arg2: memref<48x4xf32, #tpu.memory_space<vmem>>, %arg3: memref<6x8x1xf32, #tpu.memory_space<vmem>>, %arg4: memref<16x32xf32, #tpu.memory_space<vmem>>, %arg5: memref<16x32xf32, #tpu.memory_space<vmem>>, %arg6: memref<1x32xf32, #tpu.memory_space<vmem>>, %arg7: memref<32x32xf32, #tpu.memory_space<vmem>>, %arg8: memref<1x32xf32, #tpu.memory_space<vmem>>, %arg9: memref<32x16xf32, #tpu.memory_space<vmem>>, %arg10: memref<1x16xf32, #tpu.memory_space<vmem>>, %arg11: memref<16x16xf32, #tpu.memory_space<vmem>>, %arg12: memref<1x16xf32, #tpu.memory_space<vmem>>, %arg13: memref<4x4xf32, #tpu.memory_space<vmem>>, %arg14: memref<1x4xf32, #tpu.memory_space<vmem>>, %arg15: memref<16x32xf32, #tpu.memory_space<vmem>>, %arg16: memref<4x32xf32, #tpu.memory_space<vmem>>, %arg17: memref<1x32xf32, #tpu.memory_space<vmem>>, %arg18: memref<32x32xf32, #tpu.memory_space<vmem>>, %arg19: memref<1x32xf32, #tpu.memory_space<vmem>>, %arg20: memref<32x32xf32, #tpu.memory_space<vmem>>, %arg21: memref<1x32xf32, #tpu.memory_space<vmem>>, %arg22: memref<32x128xf32, #tpu.memory_space<vmem>>, %arg23: memref<4x128xf32, #tpu.memory_space<vmem>>, %arg24: memref<32x128xf32, #tpu.memory_space<vmem>>, %arg25: memref<1x128xf32, #tpu.memory_space<vmem>>, %arg26: memref<2x32x32xf32, #tpu.memory_space<vmem>>, %arg27: memref<2x1x32xf32, #tpu.memory_space<vmem>>, %arg28: memref<32x32xf32, #tpu.memory_space<vmem>>, %arg29: memref<32x4xf32, #tpu.memory_space<vmem>>, %arg30: memref<1x32xf32, #tpu.memory_space<vmem>>, %arg31: memref<1x4xf32, #tpu.memory_space<vmem>>, %arg32: memref<32x32xf32, #tpu.memory_space<vmem>>, %arg33: memref<1x32xf32, #tpu.memory_space<vmem>>, %arg34: memref<32x32xf32, #tpu.memory_space<vmem>>, %arg35: memref<1x32xf32, #tpu.memory_space<vmem>>, %arg36: memref<32x2xf32, #tpu.memory_space<vmem>>, %arg37: memref<1x2xf32, #tpu.memory_space<vmem>>, %arg38: memref<48x16xf32, #tpu.memory_space<vmem>>, %arg39: memref<48x16xf32, #tpu.memory_space<vmem>>, %arg40: memref<48x32xf32, #tpu.memory_space<vmem>>, %arg41: memref<8x8x32xf32, #tpu.memory_space<vmem>>, %arg42: memref<8x8x4xf32, #tpu.memory_space<vmem>>, %arg43: memref<8x2xf32, #tpu.memory_space<vmem>>) attributes {dimension_semantics = [], scalar_prefetch = 0 : i64, scratch_operands = 0 : i64, tpu.core_type = #tpu.core_type<tc>} {
    %c0 = arith.constant 0 : index
    %c0_0 = arith.constant 0 : index
    %0 = vector.load %arg0[%c0, %c0_0] : memref<48x16xf32, #tpu.memory_space<vmem>>, vector<48x16xf32>
    %c0_1 = arith.constant 0 : index
    %c0_2 = arith.constant 0 : index
    %1 = vector.load %arg1[%c0_1, %c0_2] : memref<48x16xf32, #tpu.memory_space<vmem>>, vector<48x16xf32>
    %c0_3 = arith.constant 0 : index
    %c0_4 = arith.constant 0 : index
    %2 = vector.load %arg2[%c0_3, %c0_4] : memref<48x4xf32, #tpu.memory_space<vmem>>, vector<48x4xf32>
    %c0_5 = arith.constant 0 : index
    %c0_6 = arith.constant 0 : index
    %3 = vector.load %arg4[%c0_5, %c0_6] : memref<16x32xf32, #tpu.memory_space<vmem>>, vector<16x32xf32>
    %cst = arith.constant dense<0.000000e+00> : vector<48x32xf32>
    %4 = tpu.matmul %0, %3, %cst {dimension_numbers = #tpu.dot_dimension_numbers<[1], [0], [0], [1], [0, 0, 1, 1], [], []>} : vector<48x16xf32>, vector<16x32xf32>, vector<48x32xf32> -> vector<48x32xf32>
    %c0_7 = arith.constant 0 : index
    %c0_8 = arith.constant 0 : index
    %5 = vector.load %arg5[%c0_7, %c0_8] : memref<16x32xf32, #tpu.memory_space<vmem>>, vector<16x32xf32>
    %cst_9 = arith.constant dense<0.000000e+00> : vector<48x32xf32>
    %6 = tpu.matmul %1, %5, %cst_9 {dimension_numbers = #tpu.dot_dimension_numbers<[1], [0], [0], [1], [0, 0, 1, 1], [], []>} : vector<48x16xf32>, vector<16x32xf32>, vector<48x32xf32> -> vector<48x32xf32>
    %7 = arith.addf %4, %6 : vector<48x32xf32>
    %c0_10 = arith.constant 0 : index
    %c0_11 = arith.constant 0 : index
    %8 = vector.load %arg6[%c0_10, %c0_11] : memref<1x32xf32, #tpu.memory_space<vmem>>, vector<1x32xf32>
    %9 = vector.broadcast %8 : vector<1x32xf32> to vector<48x32xf32>
    %10 = arith.addf %7, %9 : vector<48x32xf32>
    %cst_12 = arith.constant 0.000000e+00 : f32
    %11 = vector.broadcast %cst_12 : f32 to vector<48x32xf32>
    %12 = arith.maximumf %10, %11 : vector<48x32xf32>
    %c0_13 = arith.constant 0 : index
    %c0_14 = arith.constant 0 : index
    %13 = vector.load %arg7[%c0_13, %c0_14] : memref<32x32xf32, #tpu.memory_space<vmem>>, vector<32x32xf32>
    %cst_15 = arith.constant dense<0.000000e+00> : vector<48x32xf32>
    %14 = tpu.matmul %12, %13, %cst_15 {dimension_numbers = #tpu.dot_dimension_numbers<[1], [0], [0], [1], [0, 0, 1, 1], [], []>} : vector<48x32xf32>, vector<32x32xf32>, vector<48x32xf32> -> vector<48x32xf32>
    %c0_16 = arith.constant 0 : index
    %c0_17 = arith.constant 0 : index
    %15 = vector.load %arg8[%c0_16, %c0_17] : memref<1x32xf32, #tpu.memory_space<vmem>>, vector<1x32xf32>
    %16 = vector.broadcast %15 : vector<1x32xf32> to vector<48x32xf32>
    %17 = arith.addf %14, %16 : vector<48x32xf32>
    %cst_18 = arith.constant 0.000000e+00 : f32
    %18 = vector.broadcast %cst_18 : f32 to vector<48x32xf32>
    %19 = arith.maximumf %17, %18 : vector<48x32xf32>
    %c0_19 = arith.constant 0 : index
    %c0_20 = arith.constant 0 : index
    %20 = vector.load %arg9[%c0_19, %c0_20] : memref<32x16xf32, #tpu.memory_space<vmem>>, vector<32x16xf32>
    %cst_21 = arith.constant dense<0.000000e+00> : vector<48x16xf32>
    %21 = tpu.matmul %19, %20, %cst_21 {dimension_numbers = #tpu.dot_dimension_numbers<[1], [0], [0], [1], [0, 0, 1, 1], [], []>} : vector<48x32xf32>, vector<32x16xf32>, vector<48x16xf32> -> vector<48x16xf32>
    %c0_22 = arith.constant 0 : index
    %c0_23 = arith.constant 0 : index
    %22 = vector.load %arg10[%c0_22, %c0_23] : memref<1x16xf32, #tpu.memory_space<vmem>>, vector<1x16xf32>
    %23 = vector.broadcast %22 : vector<1x16xf32> to vector<48x16xf32>
    %24 = arith.addf %21, %23 : vector<48x16xf32>
    %25 = arith.negf %24 : vector<48x16xf32>
    %26 = math.exp %25 : vector<48x16xf32>
    %cst_24 = arith.constant 1.000000e+00 : f32
    %27 = vector.broadcast %cst_24 : f32 to vector<48x16xf32>
    %28 = arith.addf %27, %26 : vector<48x16xf32>
    %29 = arith.divf %27, %28 : vector<48x16xf32>
    %30 = arith.mulf %0, %1 : vector<48x16xf32>
    %cst_25 = arith.constant 1.000000e+00 : f32
    %31 = vector.broadcast %cst_25 : f32 to vector<48x16xf32>
    %32 = arith.subf %31, %1 : vector<48x16xf32>
    %33 = arith.mulf %29, %32 : vector<48x16xf32>
    %34 = arith.addf %30, %33 : vector<48x16xf32>
    %c0_26 = arith.constant 0 : index
    %c0_27 = arith.constant 0 : index
    %35 = vector.load %arg11[%c0_26, %c0_27] : memref<16x16xf32, #tpu.memory_space<vmem>>, vector<16x16xf32>
    %cst_28 = arith.constant dense<0.000000e+00> : vector<48x16xf32>
    %36 = tpu.matmul %34, %35, %cst_28 {dimension_numbers = #tpu.dot_dimension_numbers<[1], [0], [0], [1], [0, 0, 1, 1], [], []>} : vector<48x16xf32>, vector<16x16xf32>, vector<48x16xf32> -> vector<48x16xf32>
    %c0_29 = arith.constant 0 : index
    %c0_30 = arith.constant 0 : index
    %37 = vector.load %arg12[%c0_29, %c0_30] : memref<1x16xf32, #tpu.memory_space<vmem>>, vector<1x16xf32>
    %38 = vector.broadcast %37 : vector<1x16xf32> to vector<48x16xf32>
    %39 = arith.addf %36, %38 : vector<48x16xf32>
    %cst_31 = arith.constant 0.000000e+00 : f32
    %40 = vector.broadcast %cst_31 : f32 to vector<48x16xf32>
    %41 = arith.maximumf %39, %40 : vector<48x16xf32>
    %42 = arith.addf %41, %34 : vector<48x16xf32>
    %c0_32 = arith.constant 0 : index
    %c0_33 = arith.constant 0 : index
    %43 = vector.load %arg13[%c0_32, %c0_33] : memref<4x4xf32, #tpu.memory_space<vmem>>, vector<4x4xf32>
    %cst_34 = arith.constant dense<0.000000e+00> : vector<48x4xf32>
    %44 = tpu.matmul %2, %43, %cst_34 {dimension_numbers = #tpu.dot_dimension_numbers<[1], [0], [0], [1], [0, 0, 1, 1], [], []>} : vector<48x4xf32>, vector<4x4xf32>, vector<48x4xf32> -> vector<48x4xf32>
    %c0_35 = arith.constant 0 : index
    %c0_36 = arith.constant 0 : index
    %45 = vector.load %arg14[%c0_35, %c0_36] : memref<1x4xf32, #tpu.memory_space<vmem>>, vector<1x4xf32>
    %46 = vector.broadcast %45 : vector<1x4xf32> to vector<48x4xf32>
    %47 = arith.addf %44, %46 : vector<48x4xf32>
    %cst_37 = arith.constant 0.000000e+00 : f32
    %48 = vector.broadcast %cst_37 : f32 to vector<48x4xf32>
    %49 = arith.maximumf %47, %48 : vector<48x4xf32>
    %50 = arith.addf %49, %2 : vector<48x4xf32>
    %c0_38 = arith.constant 0 : index
    %c0_39 = arith.constant 0 : index
    %51 = vector.load %arg15[%c0_38, %c0_39] : memref<16x32xf32, #tpu.memory_space<vmem>>, vector<16x32xf32>
    %cst_40 = arith.constant dense<0.000000e+00> : vector<48x32xf32>
    %52 = tpu.matmul %42, %51, %cst_40 {dimension_numbers = #tpu.dot_dimension_numbers<[1], [0], [0], [1], [0, 0, 1, 1], [], []>} : vector<48x16xf32>, vector<16x32xf32>, vector<48x32xf32> -> vector<48x32xf32>
    %c0_41 = arith.constant 0 : index
    %c0_42 = arith.constant 0 : index
    %53 = vector.load %arg16[%c0_41, %c0_42] : memref<4x32xf32, #tpu.memory_space<vmem>>, vector<4x32xf32>
    %cst_43 = arith.constant dense<0.000000e+00> : vector<48x32xf32>
    %54 = tpu.matmul %50, %53, %cst_43 {dimension_numbers = #tpu.dot_dimension_numbers<[1], [0], [0], [1], [0, 0, 1, 1], [], []>} : vector<48x4xf32>, vector<4x32xf32>, vector<48x32xf32> -> vector<48x32xf32>
    %55 = arith.addf %52, %54 : vector<48x32xf32>
    %c0_44 = arith.constant 0 : index
    %c0_45 = arith.constant 0 : index
    %56 = vector.load %arg17[%c0_44, %c0_45] : memref<1x32xf32, #tpu.memory_space<vmem>>, vector<1x32xf32>
    %57 = vector.broadcast %56 : vector<1x32xf32> to vector<48x32xf32>
    %58 = arith.addf %55, %57 : vector<48x32xf32>
    %cst_46 = arith.constant 0.000000e+00 : f32
    %59 = vector.broadcast %cst_46 : f32 to vector<48x32xf32>
    %60 = arith.maximumf %58, %59 : vector<48x32xf32>
    %c0_47 = arith.constant 0 : index
    %c0_48 = arith.constant 0 : index
    %61 = vector.load %arg18[%c0_47, %c0_48] : memref<32x32xf32, #tpu.memory_space<vmem>>, vector<32x32xf32>
    %cst_49 = arith.constant dense<0.000000e+00> : vector<48x32xf32>
    %62 = tpu.matmul %60, %61, %cst_49 {dimension_numbers = #tpu.dot_dimension_numbers<[1], [0], [0], [1], [0, 0, 1, 1], [], []>} : vector<48x32xf32>, vector<32x32xf32>, vector<48x32xf32> -> vector<48x32xf32>
    %c0_50 = arith.constant 0 : index
    %c0_51 = arith.constant 0 : index
    %63 = vector.load %arg19[%c0_50, %c0_51] : memref<1x32xf32, #tpu.memory_space<vmem>>, vector<1x32xf32>
    %64 = vector.broadcast %63 : vector<1x32xf32> to vector<48x32xf32>
    %65 = arith.addf %62, %64 : vector<48x32xf32>
    %cst_52 = arith.constant 0.000000e+00 : f32
    %66 = vector.broadcast %cst_52 : f32 to vector<48x32xf32>
    %67 = arith.maximumf %65, %66 : vector<48x32xf32>
    %c0_53 = arith.constant 0 : index
    %c0_54 = arith.constant 0 : index
    %68 = vector.load %arg20[%c0_53, %c0_54] : memref<32x32xf32, #tpu.memory_space<vmem>>, vector<32x32xf32>
    %cst_55 = arith.constant dense<0.000000e+00> : vector<48x32xf32>
    %69 = tpu.matmul %67, %68, %cst_55 {dimension_numbers = #tpu.dot_dimension_numbers<[1], [0], [0], [1], [0, 0, 1, 1], [], []>} : vector<48x32xf32>, vector<32x32xf32>, vector<48x32xf32> -> vector<48x32xf32>
    %c0_56 = arith.constant 0 : index
    %c0_57 = arith.constant 0 : index
    %70 = vector.load %arg21[%c0_56, %c0_57] : memref<1x32xf32, #tpu.memory_space<vmem>>, vector<1x32xf32>
    %71 = vector.broadcast %70 : vector<1x32xf32> to vector<48x32xf32>
    %72 = arith.addf %69, %71 : vector<48x32xf32>
    %c0_58 = arith.constant 0 : index
    %c0_59 = arith.constant 0 : index
    %73 = vector.load %arg38[%c0_58, %c0_59] : memref<48x16xf32, #tpu.memory_space<vmem>>, vector<48x16xf32>
    tpu.vector_store %arg38[%c0_58, %c0_59], %29 {strides = array<i32>} : memref<48x16xf32, #tpu.memory_space<vmem>>, vector<48x16xf32>,
    %c0_60 = arith.constant 0 : index
    %c0_61 = arith.constant 0 : index
    %74 = vector.load %arg39[%c0_60, %c0_61] : memref<48x16xf32, #tpu.memory_space<vmem>>, vector<48x16xf32>
    tpu.vector_store %arg39[%c0_60, %c0_61], %34 {strides = array<i32>} : memref<48x16xf32, #tpu.memory_space<vmem>>, vector<48x16xf32>,
    %c0_62 = arith.constant 0 : index
    %c0_63 = arith.constant 0 : index
    %75 = vector.load %arg40[%c0_62, %c0_63] : memref<48x32xf32, #tpu.memory_space<vmem>>, vector<48x32xf32>
    tpu.vector_store %arg40[%c0_62, %c0_63], %72 {strides = array<i32>} : memref<48x32xf32, #tpu.memory_space<vmem>>, vector<48x32xf32>,
    %76 = tpu.iota {dimensions = array<i32: 1>} : vector<1x128xi32>
    %c64_i32 = arith.constant 64 : i32
    %77 = vector.broadcast %c64_i32 : i32 to vector<1x128xi32>
    %78 = arith.cmpi sge, %76, %77 : vector<1x128xi32>
    %c96_i32 = arith.constant 96 : i32
    %79 = vector.broadcast %c96_i32 : i32 to vector<1x128xi32>
    %80 = arith.cmpi slt, %76, %79 : vector<1x128xi32>
    %81 = arith.andi %78, %80 : vector<1x128xi1>
    %cst_64 = arith.constant 1.000000e+00 : f32
    %cst_65 = arith.constant 5.000000e-01 : f32
    %82 = vector.broadcast %cst_64 : f32 to vector<1x128xf32>
    %83 = vector.broadcast %cst_65 : f32 to vector<1x128xf32>
    %84 = arith.select %81, %82, %83 : vector<1x128xi1>, vector<1x128xf32>
    %cst_66 = arith.constant 0.000000e+00 : f32
    %cst_67 = arith.constant 5.000000e-01 : f32
    %85 = vector.broadcast %cst_66 : f32 to vector<1x128xf32>
    %86 = vector.broadcast %cst_67 : f32 to vector<1x128xf32>
    %87 = arith.select %81, %85, %86 : vector<1x128xi1>, vector<1x128xf32>
    %cst_68 = arith.constant 0.000000e+00 : f32
    %88 = vector.broadcast %cst_68 : f32 to vector<8x32xf32>
    %cst_69 = arith.constant 0.000000e+00 : f32
    %89 = vector.broadcast %cst_69 : f32 to vector<8x32xf32>
    %90 = vector.extract_strided_slice %72 {offsets = [0, 0], sizes = [8, 32], strides = [1, 1]} : vector<48x32xf32> to vector<8x32xf32>
    %91 = vector.extract_strided_slice %50 {offsets = [0, 0], sizes = [8, 4], strides = [1, 1]} : vector<48x4xf32> to vector<8x4xf32>
    %c0_70 = arith.constant 0 : index
    %c0_71 = arith.constant 0 : index
    %92 = vector.load %arg22[%c0_70, %c0_71] : memref<32x128xf32, #tpu.memory_space<vmem>>, vector<32x128xf32>
    %cst_72 = arith.constant dense<0.000000e+00> : vector<8x128xf32>
    %93 = tpu.matmul %90, %92, %cst_72 {dimension_numbers = #tpu.dot_dimension_numbers<[1], [0], [0], [1], [0, 0, 1, 1], [], []>} : vector<8x32xf32>, vector<32x128xf32>, vector<8x128xf32> -> vector<8x128xf32>
    %c0_73 = arith.constant 0 : index
    %c0_74 = arith.constant 0 : index
    %94 = vector.load %arg23[%c0_73, %c0_74] : memref<4x128xf32, #tpu.memory_space<vmem>>, vector<4x128xf32>
    %cst_75 = arith.constant dense<0.000000e+00> : vector<8x128xf32>
    %95 = tpu.matmul %91, %94, %cst_75 {dimension_numbers = #tpu.dot_dimension_numbers<[1], [0], [0], [1], [0, 0, 1, 1], [], []>} : vector<8x4xf32>, vector<4x128xf32>, vector<8x128xf32> -> vector<8x128xf32>
    %96 = arith.addf %93, %95 : vector<8x128xf32>
    %c0_76 = arith.constant 0 : index
    %c0_77 = arith.constant 0 : index
    %97 = vector.load %arg24[%c0_76, %c0_77] : memref<32x128xf32, #tpu.memory_space<vmem>>, vector<32x128xf32>
    %cst_78 = arith.constant dense<0.000000e+00> : vector<8x128xf32>
    %98 = tpu.matmul %88, %97, %cst_78 {dimension_numbers = #tpu.dot_dimension_numbers<[1], [0], [0], [1], [0, 0, 1, 1], [], []>} : vector<8x32xf32>, vector<32x128xf32>, vector<8x128xf32> -> vector<8x128xf32>
    %99 = arith.addf %96, %98 : vector<8x128xf32>
    %c0_79 = arith.constant 0 : index
    %c0_80 = arith.constant 0 : index
    %100 = vector.load %arg25[%c0_79, %c0_80] : memref<1x128xf32, #tpu.memory_space<vmem>>, vector<1x128xf32>
    %101 = vector.broadcast %100 : vector<1x128xf32> to vector<8x128xf32>
    %102 = arith.addf %99, %101 : vector<8x128xf32>
    %103 = vector.broadcast %84 : vector<1x128xf32> to vector<8x128xf32>
    %104 = arith.mulf %103, %102 : vector<8x128xf32>
    %105 = math.tanh %104 : vector<8x128xf32>
    %106 = vector.broadcast %84 : vector<1x128xf32> to vector<8x128xf32>
    %107 = arith.mulf %106, %105 : vector<8x128xf32>
    %108 = vector.broadcast %87 : vector<1x128xf32> to vector<8x128xf32>
    %109 = arith.addf %107, %108 : vector<8x128xf32>
    %110 = vector.extract_strided_slice %109 {offsets = [0, 0], sizes = [8, 32], strides = [1, 1]} : vector<8x128xf32> to vector<8x32xf32>
    %111 = vector.extract_strided_slice %109 {offsets = [0, 32], sizes = [8, 32], strides = [1, 1]} : vector<8x128xf32> to vector<8x32xf32>
    %112 = vector.extract_strided_slice %109 {offsets = [0, 64], sizes = [8, 32], strides = [1, 1]} : vector<8x128xf32> to vector<8x32xf32>
    %113 = vector.extract_strided_slice %109 {offsets = [0, 96], sizes = [8, 32], strides = [1, 1]} : vector<8x128xf32> to vector<8x32xf32>
    %114 = arith.mulf %111, %89 : vector<8x32xf32>
    %115 = arith.mulf %110, %112 : vector<8x32xf32>
    %116 = arith.addf %114, %115 : vector<8x32xf32>
    %117 = math.tanh %116 : vector<8x32xf32>
    %118 = arith.mulf %113, %117 : vector<8x32xf32>
    %c0_81 = arith.constant 0 : index
    %c0_82 = arith.constant 0 : index
    %c0_83 = arith.constant 0 : index
    %119 = vector.load %arg26[%c0_81, %c0_82, %c0_83] : memref<2x32x32xf32, #tpu.memory_space<vmem>>, vector<1x32x32xf32>
    %120 = vector.shape_cast %119 : vector<1x32x32xf32> to vector<32x32xf32>
    %cst_84 = arith.constant dense<0.000000e+00> : vector<8x32xf32>
    %121 = tpu.matmul %118, %120, %cst_84 {dimension_numbers = #tpu.dot_dimension_numbers<[1], [0], [0], [1], [0, 0, 1, 1], [], []>} : vector<8x32xf32>, vector<32x32xf32>, vector<8x32xf32> -> vector<8x32xf32>
    %c0_85 = arith.constant 0 : index
    %c0_86 = arith.constant 0 : index
    %c0_87 = arith.constant 0 : index
    %122 = vector.load %arg27[%c0_85, %c0_86, %c0_87] : memref<2x1x32xf32, #tpu.memory_space<vmem>>, vector<1x1x32xf32>
    %123 = vector.shape_cast %122 : vector<1x1x32xf32> to vector<1x32xf32>
    %124 = vector.broadcast %123 : vector<1x32xf32> to vector<8x32xf32>
    %125 = arith.addf %121, %124 : vector<8x32xf32>
    %cst_88 = arith.constant 0.000000e+00 : f32
    %126 = vector.broadcast %cst_88 : f32 to vector<8x32xf32>
    %127 = arith.maximumf %125, %126 : vector<8x32xf32>
    %c1 = arith.constant 1 : index
    %c0_89 = arith.constant 0 : index
    %c0_90 = arith.constant 0 : index
    %128 = vector.load %arg26[%c1, %c0_89, %c0_90] : memref<2x32x32xf32, #tpu.memory_space<vmem>>, vector<1x32x32xf32>
    %129 = vector.shape_cast %128 : vector<1x32x32xf32> to vector<32x32xf32>
    %cst_91 = arith.constant dense<0.000000e+00> : vector<8x32xf32>
    %130 = tpu.matmul %127, %129, %cst_91 {dimension_numbers = #tpu.dot_dimension_numbers<[1], [0], [0], [1], [0, 0, 1, 1], [], []>} : vector<8x32xf32>, vector<32x32xf32>, vector<8x32xf32> -> vector<8x32xf32>
    %c1_92 = arith.constant 1 : index
    %c0_93 = arith.constant 0 : index
    %c0_94 = arith.constant 0 : index
    %131 = vector.load %arg27[%c1_92, %c0_93, %c0_94] : memref<2x1x32xf32, #tpu.memory_space<vmem>>, vector<1x1x32xf32>
    %132 = vector.shape_cast %131 : vector<1x1x32xf32> to vector<1x32xf32>
    %133 = vector.broadcast %132 : vector<1x32xf32> to vector<8x32xf32>
    %134 = arith.addf %130, %133 : vector<8x32xf32>
    %cst_95 = arith.constant 0.000000e+00 : f32
    %135 = vector.broadcast %cst_95 : f32 to vector<8x32xf32>
    %136 = arith.maximumf %134, %135 : vector<8x32xf32>
    %c0_96 = arith.constant 0 : index
    %c0_97 = arith.constant 0 : index
    %137 = vector.load %arg28[%c0_96, %c0_97] : memref<32x32xf32, #tpu.memory_space<vmem>>, vector<32x32xf32>
    %cst_98 = arith.constant dense<0.000000e+00> : vector<8x32xf32>
    %138 = tpu.matmul %136, %137, %cst_98 {dimension_numbers = #tpu.dot_dimension_numbers<[1], [0], [0], [1], [0, 0, 1, 1], [], []>} : vector<8x32xf32>, vector<32x32xf32>, vector<8x32xf32> -> vector<8x32xf32>
    %c0_99 = arith.constant 0 : index
    %c0_100 = arith.constant 0 : index
    %139 = vector.load %arg30[%c0_99, %c0_100] : memref<1x32xf32, #tpu.memory_space<vmem>>, vector<1x32xf32>
    %140 = vector.broadcast %139 : vector<1x32xf32> to vector<8x32xf32>
    %141 = arith.addf %138, %140 : vector<8x32xf32>
    %c0_101 = arith.constant 0 : index
    %c0_102 = arith.constant 0 : index
    %142 = vector.load %arg29[%c0_101, %c0_102] : memref<32x4xf32, #tpu.memory_space<vmem>>, vector<32x4xf32>
    %cst_103 = arith.constant dense<0.000000e+00> : vector<8x4xf32>
    %143 = tpu.matmul %136, %142, %cst_103 {dimension_numbers = #tpu.dot_dimension_numbers<[1], [0], [0], [1], [0, 0, 1, 1], [], []>} : vector<8x32xf32>, vector<32x4xf32>, vector<8x4xf32> -> vector<8x4xf32>
    %c0_104 = arith.constant 0 : index
    %c0_105 = arith.constant 0 : index
    %144 = vector.load %arg31[%c0_104, %c0_105] : memref<1x4xf32, #tpu.memory_space<vmem>>, vector<1x4xf32>
    %145 = vector.broadcast %144 : vector<1x4xf32> to vector<8x4xf32>
    %146 = arith.addf %143, %145 : vector<8x4xf32>
    %147 = arith.addf %141, %90 : vector<8x32xf32>
    %148 = arith.addf %146, %91 : vector<8x4xf32>
    %c0_106 = arith.constant 0 : index
    %c0_107 = arith.constant 0 : index
    %c0_108 = arith.constant 0 : index
    %149 = vector.load %arg41[%c0_106, %c0_107, %c0_108] : memref<8x8x32xf32, #tpu.memory_space<vmem>>, vector<1x8x32xf32>
    %150 = vector.shape_cast %149 : vector<1x8x32xf32> to vector<8x32xf32>
    %151 = vector.shape_cast %147 : vector<8x32xf32> to vector<1x8x32xf32>
    tpu.vector_store %arg41[%c0_106, %c0_107, %c0_108], %151 {strides = array<i32>} : memref<8x8x32xf32, #tpu.memory_space<vmem>>, vector<1x8x32xf32>,
    %c0_109 = arith.constant 0 : index
    %c0_110 = arith.constant 0 : index
    %c0_111 = arith.constant 0 : index
    %152 = vector.load %arg42[%c0_109, %c0_110, %c0_111] : memref<8x8x4xf32, #tpu.memory_space<vmem>>, vector<1x8x4xf32>
    %153 = vector.shape_cast %152 : vector<1x8x4xf32> to vector<8x4xf32>
    %154 = vector.shape_cast %148 : vector<8x4xf32> to vector<1x8x4xf32>
    tpu.vector_store %arg42[%c0_109, %c0_110, %c0_111], %154 {strides = array<i32>} : memref<8x8x4xf32, #tpu.memory_space<vmem>>, vector<1x8x4xf32>,
    %c1_112 = arith.constant 1 : index
    %c0_113 = arith.constant 0 : index
    %c0_114 = arith.constant 0 : index
    %155 = vector.load %arg3[%c1_112, %c0_113, %c0_114] : memref<6x8x1xf32, #tpu.memory_space<vmem>>, vector<1x8x1xf32>
    %156 = vector.shape_cast %155 : vector<1x8x1xf32> to vector<8x1xf32>
    %157 = vector.extract_strided_slice %72 {offsets = [8, 0], sizes = [8, 32], strides = [1, 1]} : vector<48x32xf32> to vector<8x32xf32>
    %158 = vector.broadcast %156 : vector<8x1xf32> to vector<8x32xf32>
    %159 = arith.mulf %158, %157 : vector<8x32xf32>
    %cst_115 = arith.constant 1.000000e+00 : f32
    %160 = vector.broadcast %cst_115 : f32 to vector<8x1xf32>
    %161 = arith.subf %160, %156 : vector<8x1xf32>
    %162 = vector.broadcast %161 : vector<8x1xf32> to vector<8x32xf32>
    %163 = arith.mulf %162, %147 : vector<8x32xf32>
    %164 = arith.addf %159, %163 : vector<8x32xf32>
    %165 = vector.extract_strided_slice %50 {offsets = [8, 0], sizes = [8, 4], strides = [1, 1]} : vector<48x4xf32> to vector<8x4xf32>
    %166 = vector.broadcast %156 : vector<8x1xf32> to vector<8x4xf32>
    %167 = arith.mulf %166, %165 : vector<8x4xf32>
    %cst_116 = arith.constant 1.000000e+00 : f32
    %168 = vector.broadcast %cst_116 : f32 to vector<8x1xf32>
    %169 = arith.subf %168, %156 : vector<8x1xf32>
    %170 = vector.broadcast %169 : vector<8x1xf32> to vector<8x4xf32>
    %171 = arith.mulf %170, %148 : vector<8x4xf32>
    %172 = arith.addf %167, %171 : vector<8x4xf32>
    %c0_117 = arith.constant 0 : index
    %c0_118 = arith.constant 0 : index
    %173 = vector.load %arg22[%c0_117, %c0_118] : memref<32x128xf32, #tpu.memory_space<vmem>>, vector<32x128xf32>
    %cst_119 = arith.constant dense<0.000000e+00> : vector<8x128xf32>
    %174 = tpu.matmul %164, %173, %cst_119 {dimension_numbers = #tpu.dot_dimension_numbers<[1], [0], [0], [1], [0, 0, 1, 1], [], []>} : vector<8x32xf32>, vector<32x128xf32>, vector<8x128xf32> -> vector<8x128xf32>
    %c0_120 = arith.constant 0 : index
    %c0_121 = arith.constant 0 : index
    %175 = vector.load %arg23[%c0_120, %c0_121] : memref<4x128xf32, #tpu.memory_space<vmem>>, vector<4x128xf32>
    %cst_122 = arith.constant dense<0.000000e+00> : vector<8x128xf32>
    %176 = tpu.matmul %172, %175, %cst_122 {dimension_numbers = #tpu.dot_dimension_numbers<[1], [0], [0], [1], [0, 0, 1, 1], [], []>} : vector<8x4xf32>, vector<4x128xf32>, vector<8x128xf32> -> vector<8x128xf32>
    %177 = arith.addf %174, %176 : vector<8x128xf32>
    %c0_123 = arith.constant 0 : index
    %c0_124 = arith.constant 0 : index
    %178 = vector.load %arg24[%c0_123, %c0_124] : memref<32x128xf32, #tpu.memory_space<vmem>>, vector<32x128xf32>
    %cst_125 = arith.constant dense<0.000000e+00> : vector<8x128xf32>
    %179 = tpu.matmul %118, %178, %cst_125 {dimension_numbers = #tpu.dot_dimension_numbers<[1], [0], [0], [1], [0, 0, 1, 1], [], []>} : vector<8x32xf32>, vector<32x128xf32>, vector<8x128xf32> -> vector<8x128xf32>
    %180 = arith.addf %177, %179 : vector<8x128xf32>
    %c0_126 = arith.constant 0 : index
    %c0_127 = arith.constant 0 : index
    %181 = vector.load %arg25[%c0_126, %c0_127] : memref<1x128xf32, #tpu.memory_space<vmem>>, vector<1x128xf32>
    %182 = vector.broadcast %181 : vector<1x128xf32> to vector<8x128xf32>
    %183 = arith.addf %180, %182 : vector<8x128xf32>
    %184 = vector.broadcast %84 : vector<1x128xf32> to vector<8x128xf32>
    %185 = arith.mulf %184, %183 : vector<8x128xf32>
    %186 = math.tanh %185 : vector<8x128xf32>
    %187 = vector.broadcast %84 : vector<1x128xf32> to vector<8x128xf32>
    %188 = arith.mulf %187, %186 : vector<8x128xf32>
    %189 = vector.broadcast %87 : vector<1x128xf32> to vector<8x128xf32>
    %190 = arith.addf %188, %189 : vector<8x128xf32>
    %191 = vector.extract_strided_slice %190 {offsets = [0, 0], sizes = [8, 32], strides = [1, 1]} : vector<8x128xf32> to vector<8x32xf32>
    %192 = vector.extract_strided_slice %190 {offsets = [0, 32], sizes = [8, 32], strides = [1, 1]} : vector<8x128xf32> to vector<8x32xf32>
    %193 = vector.extract_strided_slice %190 {offsets = [0, 64], sizes = [8, 32], strides = [1, 1]} : vector<8x128xf32> to vector<8x32xf32>
    %194 = vector.extract_strided_slice %190 {offsets = [0, 96], sizes = [8, 32], strides = [1, 1]} : vector<8x128xf32> to vector<8x32xf32>
    %195 = arith.mulf %192, %116 : vector<8x32xf32>
    %196 = arith.mulf %191, %193 : vector<8x32xf32>
    %197 = arith.addf %195, %196 : vector<8x32xf32>
    %198 = math.tanh %197 : vector<8x32xf32>
    %199 = arith.mulf %194, %198 : vector<8x32xf32>
    %c0_128 = arith.constant 0 : index
    %c0_129 = arith.constant 0 : index
    %c0_130 = arith.constant 0 : index
    %200 = vector.load %arg26[%c0_128, %c0_129, %c0_130] : memref<2x32x32xf32, #tpu.memory_space<vmem>>, vector<1x32x32xf32>
    %201 = vector.shape_cast %200 : vector<1x32x32xf32> to vector<32x32xf32>
    %cst_131 = arith.constant dense<0.000000e+00> : vector<8x32xf32>
    %202 = tpu.matmul %199, %201, %cst_131 {dimension_numbers = #tpu.dot_dimension_numbers<[1], [0], [0], [1], [0, 0, 1, 1], [], []>} : vector<8x32xf32>, vector<32x32xf32>, vector<8x32xf32> -> vector<8x32xf32>
    %c0_132 = arith.constant 0 : index
    %c0_133 = arith.constant 0 : index
    %c0_134 = arith.constant 0 : index
    %203 = vector.load %arg27[%c0_132, %c0_133, %c0_134] : memref<2x1x32xf32, #tpu.memory_space<vmem>>, vector<1x1x32xf32>
    %204 = vector.shape_cast %203 : vector<1x1x32xf32> to vector<1x32xf32>
    %205 = vector.broadcast %204 : vector<1x32xf32> to vector<8x32xf32>
    %206 = arith.addf %202, %205 : vector<8x32xf32>
    %cst_135 = arith.constant 0.000000e+00 : f32
    %207 = vector.broadcast %cst_135 : f32 to vector<8x32xf32>
    %208 = arith.maximumf %206, %207 : vector<8x32xf32>
    %c1_136 = arith.constant 1 : index
    %c0_137 = arith.constant 0 : index
    %c0_138 = arith.constant 0 : index
    %209 = vector.load %arg26[%c1_136, %c0_137, %c0_138] : memref<2x32x32xf32, #tpu.memory_space<vmem>>, vector<1x32x32xf32>
    %210 = vector.shape_cast %209 : vector<1x32x32xf32> to vector<32x32xf32>
    %cst_139 = arith.constant dense<0.000000e+00> : vector<8x32xf32>
    %211 = tpu.matmul %208, %210, %cst_139 {dimension_numbers = #tpu.dot_dimension_numbers<[1], [0], [0], [1], [0, 0, 1, 1], [], []>} : vector<8x32xf32>, vector<32x32xf32>, vector<8x32xf32> -> vector<8x32xf32>
    %c1_140 = arith.constant 1 : index
    %c0_141 = arith.constant 0 : index
    %c0_142 = arith.constant 0 : index
    %212 = vector.load %arg27[%c1_140, %c0_141, %c0_142] : memref<2x1x32xf32, #tpu.memory_space<vmem>>, vector<1x1x32xf32>
    %213 = vector.shape_cast %212 : vector<1x1x32xf32> to vector<1x32xf32>
    %214 = vector.broadcast %213 : vector<1x32xf32> to vector<8x32xf32>
    %215 = arith.addf %211, %214 : vector<8x32xf32>
    %cst_143 = arith.constant 0.000000e+00 : f32
    %216 = vector.broadcast %cst_143 : f32 to vector<8x32xf32>
    %217 = arith.maximumf %215, %216 : vector<8x32xf32>
    %c0_144 = arith.constant 0 : index
    %c0_145 = arith.constant 0 : index
    %218 = vector.load %arg28[%c0_144, %c0_145] : memref<32x32xf32, #tpu.memory_space<vmem>>, vector<32x32xf32>
    %cst_146 = arith.constant dense<0.000000e+00> : vector<8x32xf32>
    %219 = tpu.matmul %217, %218, %cst_146 {dimension_numbers = #tpu.dot_dimension_numbers<[1], [0], [0], [1], [0, 0, 1, 1], [], []>} : vector<8x32xf32>, vector<32x32xf32>, vector<8x32xf32> -> vector<8x32xf32>
    %c0_147 = arith.constant 0 : index
    %c0_148 = arith.constant 0 : index
    %220 = vector.load %arg30[%c0_147, %c0_148] : memref<1x32xf32, #tpu.memory_space<vmem>>, vector<1x32xf32>
    %221 = vector.broadcast %220 : vector<1x32xf32> to vector<8x32xf32>
    %222 = arith.addf %219, %221 : vector<8x32xf32>
    %c0_149 = arith.constant 0 : index
    %c0_150 = arith.constant 0 : index
    %223 = vector.load %arg29[%c0_149, %c0_150] : memref<32x4xf32, #tpu.memory_space<vmem>>, vector<32x4xf32>
    %cst_151 = arith.constant dense<0.000000e+00> : vector<8x4xf32>
    %224 = tpu.matmul %217, %223, %cst_151 {dimension_numbers = #tpu.dot_dimension_numbers<[1], [0], [0], [1], [0, 0, 1, 1], [], []>} : vector<8x32xf32>, vector<32x4xf32>, vector<8x4xf32> -> vector<8x4xf32>
    %c0_152 = arith.constant 0 : index
    %c0_153 = arith.constant 0 : index
    %225 = vector.load %arg31[%c0_152, %c0_153] : memref<1x4xf32, #tpu.memory_space<vmem>>, vector<1x4xf32>
    %226 = vector.broadcast %225 : vector<1x4xf32> to vector<8x4xf32>
    %227 = arith.addf %224, %226 : vector<8x4xf32>
    %228 = arith.addf %222, %164 : vector<8x32xf32>
    %229 = arith.addf %227, %172 : vector<8x4xf32>
    %c1_154 = arith.constant 1 : index
    %c0_155 = arith.constant 0 : index
    %c0_156 = arith.constant 0 : index
    %230 = vector.load %arg41[%c1_154, %c0_155, %c0_156] : memref<8x8x32xf32, #tpu.memory_space<vmem>>, vector<1x8x32xf32>
    %231 = vector.shape_cast %230 : vector<1x8x32xf32> to vector<8x32xf32>
    %232 = vector.shape_cast %228 : vector<8x32xf32> to vector<1x8x32xf32>
    tpu.vector_store %arg41[%c1_154, %c0_155, %c0_156], %232 {strides = array<i32>} : memref<8x8x32xf32, #tpu.memory_space<vmem>>, vector<1x8x32xf32>,
    %c1_157 = arith.constant 1 : index
    %c0_158 = arith.constant 0 : index
    %c0_159 = arith.constant 0 : index
    %233 = vector.load %arg42[%c1_157, %c0_158, %c0_159] : memref<8x8x4xf32, #tpu.memory_space<vmem>>, vector<1x8x4xf32>
    %234 = vector.shape_cast %233 : vector<1x8x4xf32> to vector<8x4xf32>
    %235 = vector.shape_cast %229 : vector<8x4xf32> to vector<1x8x4xf32>
    tpu.vector_store %arg42[%c1_157, %c0_158, %c0_159], %235 {strides = array<i32>} : memref<8x8x4xf32, #tpu.memory_space<vmem>>, vector<1x8x4xf32>,
    %c2 = arith.constant 2 : index
    %c0_160 = arith.constant 0 : index
    %c0_161 = arith.constant 0 : index
    %236 = vector.load %arg3[%c2, %c0_160, %c0_161] : memref<6x8x1xf32, #tpu.memory_space<vmem>>, vector<1x8x1xf32>
    %237 = vector.shape_cast %236 : vector<1x8x1xf32> to vector<8x1xf32>
    %238 = vector.extract_strided_slice %72 {offsets = [16, 0], sizes = [8, 32], strides = [1, 1]} : vector<48x32xf32> to vector<8x32xf32>
    %239 = vector.broadcast %237 : vector<8x1xf32> to vector<8x32xf32>
    %240 = arith.mulf %239, %238 : vector<8x32xf32>
    %cst_162 = arith.constant 1.000000e+00 : f32
    %241 = vector.broadcast %cst_162 : f32 to vector<8x1xf32>
    %242 = arith.subf %241, %237 : vector<8x1xf32>
    %243 = vector.broadcast %242 : vector<8x1xf32> to vector<8x32xf32>
    %244 = arith.mulf %243, %228 : vector<8x32xf32>
    %245 = arith.addf %240, %244 : vector<8x32xf32>
    %246 = vector.extract_strided_slice %50 {offsets = [16, 0], sizes = [8, 4], strides = [1, 1]} : vector<48x4xf32> to vector<8x4xf32>
    %247 = vector.broadcast %237 : vector<8x1xf32> to vector<8x4xf32>
    %248 = arith.mulf %247, %246 : vector<8x4xf32>
    %cst_163 = arith.constant 1.000000e+00 : f32
    %249 = vector.broadcast %cst_163 : f32 to vector<8x1xf32>
    %250 = arith.subf %249, %237 : vector<8x1xf32>
    %251 = vector.broadcast %250 : vector<8x1xf32> to vector<8x4xf32>
    %252 = arith.mulf %251, %229 : vector<8x4xf32>
    %253 = arith.addf %248, %252 : vector<8x4xf32>
    %c0_164 = arith.constant 0 : index
    %c0_165 = arith.constant 0 : index
    %254 = vector.load %arg22[%c0_164, %c0_165] : memref<32x128xf32, #tpu.memory_space<vmem>>, vector<32x128xf32>
    %cst_166 = arith.constant dense<0.000000e+00> : vector<8x128xf32>
    %255 = tpu.matmul %245, %254, %cst_166 {dimension_numbers = #tpu.dot_dimension_numbers<[1], [0], [0], [1], [0, 0, 1, 1], [], []>} : vector<8x32xf32>, vector<32x128xf32>, vector<8x128xf32> -> vector<8x128xf32>
    %c0_167 = arith.constant 0 : index
    %c0_168 = arith.constant 0 : index
    %256 = vector.load %arg23[%c0_167, %c0_168] : memref<4x128xf32, #tpu.memory_space<vmem>>, vector<4x128xf32>
    %cst_169 = arith.constant dense<0.000000e+00> : vector<8x128xf32>
    %257 = tpu.matmul %253, %256, %cst_169 {dimension_numbers = #tpu.dot_dimension_numbers<[1], [0], [0], [1], [0, 0, 1, 1], [], []>} : vector<8x4xf32>, vector<4x128xf32>, vector<8x128xf32> -> vector<8x128xf32>
    %258 = arith.addf %255, %257 : vector<8x128xf32>
    %c0_170 = arith.constant 0 : index
    %c0_171 = arith.constant 0 : index
    %259 = vector.load %arg24[%c0_170, %c0_171] : memref<32x128xf32, #tpu.memory_space<vmem>>, vector<32x128xf32>
    %cst_172 = arith.constant dense<0.000000e+00> : vector<8x128xf32>
    %260 = tpu.matmul %199, %259, %cst_172 {dimension_numbers = #tpu.dot_dimension_numbers<[1], [0], [0], [1], [0, 0, 1, 1], [], []>} : vector<8x32xf32>, vector<32x128xf32>, vector<8x128xf32> -> vector<8x128xf32>
    %261 = arith.addf %258, %260 : vector<8x128xf32>
    %c0_173 = arith.constant 0 : index
    %c0_174 = arith.constant 0 : index
    %262 = vector.load %arg25[%c0_173, %c0_174] : memref<1x128xf32, #tpu.memory_space<vmem>>, vector<1x128xf32>
    %263 = vector.broadcast %262 : vector<1x128xf32> to vector<8x128xf32>
    %264 = arith.addf %261, %263 : vector<8x128xf32>
    %265 = vector.broadcast %84 : vector<1x128xf32> to vector<8x128xf32>
    %266 = arith.mulf %265, %264 : vector<8x128xf32>
    %267 = math.tanh %266 : vector<8x128xf32>
    %268 = vector.broadcast %84 : vector<1x128xf32> to vector<8x128xf32>
    %269 = arith.mulf %268, %267 : vector<8x128xf32>
    %270 = vector.broadcast %87 : vector<1x128xf32> to vector<8x128xf32>
    %271 = arith.addf %269, %270 : vector<8x128xf32>
    %272 = vector.extract_strided_slice %271 {offsets = [0, 0], sizes = [8, 32], strides = [1, 1]} : vector<8x128xf32> to vector<8x32xf32>
    %273 = vector.extract_strided_slice %271 {offsets = [0, 32], sizes = [8, 32], strides = [1, 1]} : vector<8x128xf32> to vector<8x32xf32>
    %274 = vector.extract_strided_slice %271 {offsets = [0, 64], sizes = [8, 32], strides = [1, 1]} : vector<8x128xf32> to vector<8x32xf32>
    %275 = vector.extract_strided_slice %271 {offsets = [0, 96], sizes = [8, 32], strides = [1, 1]} : vector<8x128xf32> to vector<8x32xf32>
    %276 = arith.mulf %273, %197 : vector<8x32xf32>
    %277 = arith.mulf %272, %274 : vector<8x32xf32>
    %278 = arith.addf %276, %277 : vector<8x32xf32>
    %279 = math.tanh %278 : vector<8x32xf32>
    %280 = arith.mulf %275, %279 : vector<8x32xf32>
    %c0_175 = arith.constant 0 : index
    %c0_176 = arith.constant 0 : index
    %c0_177 = arith.constant 0 : index
    %281 = vector.load %arg26[%c0_175, %c0_176, %c0_177] : memref<2x32x32xf32, #tpu.memory_space<vmem>>, vector<1x32x32xf32>
    %282 = vector.shape_cast %281 : vector<1x32x32xf32> to vector<32x32xf32>
    %cst_178 = arith.constant dense<0.000000e+00> : vector<8x32xf32>
    %283 = tpu.matmul %280, %282, %cst_178 {dimension_numbers = #tpu.dot_dimension_numbers<[1], [0], [0], [1], [0, 0, 1, 1], [], []>} : vector<8x32xf32>, vector<32x32xf32>, vector<8x32xf32> -> vector<8x32xf32>
    %c0_179 = arith.constant 0 : index
    %c0_180 = arith.constant 0 : index
    %c0_181 = arith.constant 0 : index
    %284 = vector.load %arg27[%c0_179, %c0_180, %c0_181] : memref<2x1x32xf32, #tpu.memory_space<vmem>>, vector<1x1x32xf32>
    %285 = vector.shape_cast %284 : vector<1x1x32xf32> to vector<1x32xf32>
    %286 = vector.broadcast %285 : vector<1x32xf32> to vector<8x32xf32>
    %287 = arith.addf %283, %286 : vector<8x32xf32>
    %cst_182 = arith.constant 0.000000e+00 : f32
    %288 = vector.broadcast %cst_182 : f32 to vector<8x32xf32>
    %289 = arith.maximumf %287, %288 : vector<8x32xf32>
    %c1_183 = arith.constant 1 : index
    %c0_184 = arith.constant 0 : index
    %c0_185 = arith.constant 0 : index
    %290 = vector.load %arg26[%c1_183, %c0_184, %c0_185] : memref<2x32x32xf32, #tpu.memory_space<vmem>>, vector<1x32x32xf32>
    %291 = vector.shape_cast %290 : vector<1x32x32xf32> to vector<32x32xf32>
    %cst_186 = arith.constant dense<0.000000e+00> : vector<8x32xf32>
    %292 = tpu.matmul %289, %291, %cst_186 {dimension_numbers = #tpu.dot_dimension_numbers<[1], [0], [0], [1], [0, 0, 1, 1], [], []>} : vector<8x32xf32>, vector<32x32xf32>, vector<8x32xf32> -> vector<8x32xf32>
    %c1_187 = arith.constant 1 : index
    %c0_188 = arith.constant 0 : index
    %c0_189 = arith.constant 0 : index
    %293 = vector.load %arg27[%c1_187, %c0_188, %c0_189] : memref<2x1x32xf32, #tpu.memory_space<vmem>>, vector<1x1x32xf32>
    %294 = vector.shape_cast %293 : vector<1x1x32xf32> to vector<1x32xf32>
    %295 = vector.broadcast %294 : vector<1x32xf32> to vector<8x32xf32>
    %296 = arith.addf %292, %295 : vector<8x32xf32>
    %cst_190 = arith.constant 0.000000e+00 : f32
    %297 = vector.broadcast %cst_190 : f32 to vector<8x32xf32>
    %298 = arith.maximumf %296, %297 : vector<8x32xf32>
    %c0_191 = arith.constant 0 : index
    %c0_192 = arith.constant 0 : index
    %299 = vector.load %arg28[%c0_191, %c0_192] : memref<32x32xf32, #tpu.memory_space<vmem>>, vector<32x32xf32>
    %cst_193 = arith.constant dense<0.000000e+00> : vector<8x32xf32>
    %300 = tpu.matmul %298, %299, %cst_193 {dimension_numbers = #tpu.dot_dimension_numbers<[1], [0], [0], [1], [0, 0, 1, 1], [], []>} : vector<8x32xf32>, vector<32x32xf32>, vector<8x32xf32> -> vector<8x32xf32>
    %c0_194 = arith.constant 0 : index
    %c0_195 = arith.constant 0 : index
    %301 = vector.load %arg30[%c0_194, %c0_195] : memref<1x32xf32, #tpu.memory_space<vmem>>, vector<1x32xf32>
    %302 = vector.broadcast %301 : vector<1x32xf32> to vector<8x32xf32>
    %303 = arith.addf %300, %302 : vector<8x32xf32>
    %c0_196 = arith.constant 0 : index
    %c0_197 = arith.constant 0 : index
    %304 = vector.load %arg29[%c0_196, %c0_197] : memref<32x4xf32, #tpu.memory_space<vmem>>, vector<32x4xf32>
    %cst_198 = arith.constant dense<0.000000e+00> : vector<8x4xf32>
    %305 = tpu.matmul %298, %304, %cst_198 {dimension_numbers = #tpu.dot_dimension_numbers<[1], [0], [0], [1], [0, 0, 1, 1], [], []>} : vector<8x32xf32>, vector<32x4xf32>, vector<8x4xf32> -> vector<8x4xf32>
    %c0_199 = arith.constant 0 : index
    %c0_200 = arith.constant 0 : index
    %306 = vector.load %arg31[%c0_199, %c0_200] : memref<1x4xf32, #tpu.memory_space<vmem>>, vector<1x4xf32>
    %307 = vector.broadcast %306 : vector<1x4xf32> to vector<8x4xf32>
    %308 = arith.addf %305, %307 : vector<8x4xf32>
    %309 = arith.addf %303, %245 : vector<8x32xf32>
    %310 = arith.addf %308, %253 : vector<8x4xf32>
    %c2_201 = arith.constant 2 : index
    %c0_202 = arith.constant 0 : index
    %c0_203 = arith.constant 0 : index
    %311 = vector.load %arg41[%c2_201, %c0_202, %c0_203] : memref<8x8x32xf32, #tpu.memory_space<vmem>>, vector<1x8x32xf32>
    %312 = vector.shape_cast %311 : vector<1x8x32xf32> to vector<8x32xf32>
    %313 = vector.shape_cast %309 : vector<8x32xf32> to vector<1x8x32xf32>
    tpu.vector_store %arg41[%c2_201, %c0_202, %c0_203], %313 {strides = array<i32>} : memref<8x8x32xf32, #tpu.memory_space<vmem>>, vector<1x8x32xf32>,
    %c2_204 = arith.constant 2 : index
    %c0_205 = arith.constant 0 : index
    %c0_206 = arith.constant 0 : index
    %314 = vector.load %arg42[%c2_204, %c0_205, %c0_206] : memref<8x8x4xf32, #tpu.memory_space<vmem>>, vector<1x8x4xf32>
    %315 = vector.shape_cast %314 : vector<1x8x4xf32> to vector<8x4xf32>
    %316 = vector.shape_cast %310 : vector<8x4xf32> to vector<1x8x4xf32>
    tpu.vector_store %arg42[%c2_204, %c0_205, %c0_206], %316 {strides = array<i32>} : memref<8x8x4xf32, #tpu.memory_space<vmem>>, vector<1x8x4xf32>,
    %c3 = arith.constant 3 : index
    %c0_207 = arith.constant 0 : index
    %c0_208 = arith.constant 0 : index
    %317 = vector.load %arg3[%c3, %c0_207, %c0_208] : memref<6x8x1xf32, #tpu.memory_space<vmem>>, vector<1x8x1xf32>
    %318 = vector.shape_cast %317 : vector<1x8x1xf32> to vector<8x1xf32>
    %319 = vector.extract_strided_slice %72 {offsets = [24, 0], sizes = [8, 32], strides = [1, 1]} : vector<48x32xf32> to vector<8x32xf32>
    %320 = vector.broadcast %318 : vector<8x1xf32> to vector<8x32xf32>
    %321 = arith.mulf %320, %319 : vector<8x32xf32>
    %cst_209 = arith.constant 1.000000e+00 : f32
    %322 = vector.broadcast %cst_209 : f32 to vector<8x1xf32>
    %323 = arith.subf %322, %318 : vector<8x1xf32>
    %324 = vector.broadcast %323 : vector<8x1xf32> to vector<8x32xf32>
    %325 = arith.mulf %324, %309 : vector<8x32xf32>
    %326 = arith.addf %321, %325 : vector<8x32xf32>
    %327 = vector.extract_strided_slice %50 {offsets = [24, 0], sizes = [8, 4], strides = [1, 1]} : vector<48x4xf32> to vector<8x4xf32>
    %328 = vector.broadcast %318 : vector<8x1xf32> to vector<8x4xf32>
    %329 = arith.mulf %328, %327 : vector<8x4xf32>
    %cst_210 = arith.constant 1.000000e+00 : f32
    %330 = vector.broadcast %cst_210 : f32 to vector<8x1xf32>
    %331 = arith.subf %330, %318 : vector<8x1xf32>
    %332 = vector.broadcast %331 : vector<8x1xf32> to vector<8x4xf32>
    %333 = arith.mulf %332, %310 : vector<8x4xf32>
    %334 = arith.addf %329, %333 : vector<8x4xf32>
    %c0_211 = arith.constant 0 : index
    %c0_212 = arith.constant 0 : index
    %335 = vector.load %arg22[%c0_211, %c0_212] : memref<32x128xf32, #tpu.memory_space<vmem>>, vector<32x128xf32>
    %cst_213 = arith.constant dense<0.000000e+00> : vector<8x128xf32>
    %336 = tpu.matmul %326, %335, %cst_213 {dimension_numbers = #tpu.dot_dimension_numbers<[1], [0], [0], [1], [0, 0, 1, 1], [], []>} : vector<8x32xf32>, vector<32x128xf32>, vector<8x128xf32> -> vector<8x128xf32>
    %c0_214 = arith.constant 0 : index
    %c0_215 = arith.constant 0 : index
    %337 = vector.load %arg23[%c0_214, %c0_215] : memref<4x128xf32, #tpu.memory_space<vmem>>, vector<4x128xf32>
    %cst_216 = arith.constant dense<0.000000e+00> : vector<8x128xf32>
    %338 = tpu.matmul %334, %337, %cst_216 {dimension_numbers = #tpu.dot_dimension_numbers<[1], [0], [0], [1], [0, 0, 1, 1], [], []>} : vector<8x4xf32>, vector<4x128xf32>, vector<8x128xf32> -> vector<8x128xf32>
    %339 = arith.addf %336, %338 : vector<8x128xf32>
    %c0_217 = arith.constant 0 : index
    %c0_218 = arith.constant 0 : index
    %340 = vector.load %arg24[%c0_217, %c0_218] : memref<32x128xf32, #tpu.memory_space<vmem>>, vector<32x128xf32>
    %cst_219 = arith.constant dense<0.000000e+00> : vector<8x128xf32>
    %341 = tpu.matmul %280, %340, %cst_219 {dimension_numbers = #tpu.dot_dimension_numbers<[1], [0], [0], [1], [0, 0, 1, 1], [], []>} : vector<8x32xf32>, vector<32x128xf32>, vector<8x128xf32> -> vector<8x128xf32>
    %342 = arith.addf %339, %341 : vector<8x128xf32>
    %c0_220 = arith.constant 0 : index
    %c0_221 = arith.constant 0 : index
    %343 = vector.load %arg25[%c0_220, %c0_221] : memref<1x128xf32, #tpu.memory_space<vmem>>, vector<1x128xf32>
    %344 = vector.broadcast %343 : vector<1x128xf32> to vector<8x128xf32>
    %345 = arith.addf %342, %344 : vector<8x128xf32>
    %346 = vector.broadcast %84 : vector<1x128xf32> to vector<8x128xf32>
    %347 = arith.mulf %346, %345 : vector<8x128xf32>
    %348 = math.tanh %347 : vector<8x128xf32>
    %349 = vector.broadcast %84 : vector<1x128xf32> to vector<8x128xf32>
    %350 = arith.mulf %349, %348 : vector<8x128xf32>
    %351 = vector.broadcast %87 : vector<1x128xf32> to vector<8x128xf32>
    %352 = arith.addf %350, %351 : vector<8x128xf32>
    %353 = vector.extract_strided_slice %352 {offsets = [0, 0], sizes = [8, 32], strides = [1, 1]} : vector<8x128xf32> to vector<8x32xf32>
    %354 = vector.extract_strided_slice %352 {offsets = [0, 32], sizes = [8, 32], strides = [1, 1]} : vector<8x128xf32> to vector<8x32xf32>
    %355 = vector.extract_strided_slice %352 {offsets = [0, 64], sizes = [8, 32], strides = [1, 1]} : vector<8x128xf32> to vector<8x32xf32>
    %356 = vector.extract_strided_slice %352 {offsets = [0, 96], sizes = [8, 32], strides = [1, 1]} : vector<8x128xf32> to vector<8x32xf32>
    %357 = arith.mulf %354, %278 : vector<8x32xf32>
    %358 = arith.mulf %353, %355 : vector<8x32xf32>
    %359 = arith.addf %357, %358 : vector<8x32xf32>
    %360 = math.tanh %359 : vector<8x32xf32>
    %361 = arith.mulf %356, %360 : vector<8x32xf32>
    %c0_222 = arith.constant 0 : index
    %c0_223 = arith.constant 0 : index
    %c0_224 = arith.constant 0 : index
    %362 = vector.load %arg26[%c0_222, %c0_223, %c0_224] : memref<2x32x32xf32, #tpu.memory_space<vmem>>, vector<1x32x32xf32>
    %363 = vector.shape_cast %362 : vector<1x32x32xf32> to vector<32x32xf32>
    %cst_225 = arith.constant dense<0.000000e+00> : vector<8x32xf32>
    %364 = tpu.matmul %361, %363, %cst_225 {dimension_numbers = #tpu.dot_dimension_numbers<[1], [0], [0], [1], [0, 0, 1, 1], [], []>} : vector<8x32xf32>, vector<32x32xf32>, vector<8x32xf32> -> vector<8x32xf32>
    %c0_226 = arith.constant 0 : index
    %c0_227 = arith.constant 0 : index
    %c0_228 = arith.constant 0 : index
    %365 = vector.load %arg27[%c0_226, %c0_227, %c0_228] : memref<2x1x32xf32, #tpu.memory_space<vmem>>, vector<1x1x32xf32>
    %366 = vector.shape_cast %365 : vector<1x1x32xf32> to vector<1x32xf32>
    %367 = vector.broadcast %366 : vector<1x32xf32> to vector<8x32xf32>
    %368 = arith.addf %364, %367 : vector<8x32xf32>
    %cst_229 = arith.constant 0.000000e+00 : f32
    %369 = vector.broadcast %cst_229 : f32 to vector<8x32xf32>
    %370 = arith.maximumf %368, %369 : vector<8x32xf32>
    %c1_230 = arith.constant 1 : index
    %c0_231 = arith.constant 0 : index
    %c0_232 = arith.constant 0 : index
    %371 = vector.load %arg26[%c1_230, %c0_231, %c0_232] : memref<2x32x32xf32, #tpu.memory_space<vmem>>, vector<1x32x32xf32>
    %372 = vector.shape_cast %371 : vector<1x32x32xf32> to vector<32x32xf32>
    %cst_233 = arith.constant dense<0.000000e+00> : vector<8x32xf32>
    %373 = tpu.matmul %370, %372, %cst_233 {dimension_numbers = #tpu.dot_dimension_numbers<[1], [0], [0], [1], [0, 0, 1, 1], [], []>} : vector<8x32xf32>, vector<32x32xf32>, vector<8x32xf32> -> vector<8x32xf32>
    %c1_234 = arith.constant 1 : index
    %c0_235 = arith.constant 0 : index
    %c0_236 = arith.constant 0 : index
    %374 = vector.load %arg27[%c1_234, %c0_235, %c0_236] : memref<2x1x32xf32, #tpu.memory_space<vmem>>, vector<1x1x32xf32>
    %375 = vector.shape_cast %374 : vector<1x1x32xf32> to vector<1x32xf32>
    %376 = vector.broadcast %375 : vector<1x32xf32> to vector<8x32xf32>
    %377 = arith.addf %373, %376 : vector<8x32xf32>
    %cst_237 = arith.constant 0.000000e+00 : f32
    %378 = vector.broadcast %cst_237 : f32 to vector<8x32xf32>
    %379 = arith.maximumf %377, %378 : vector<8x32xf32>
    %c0_238 = arith.constant 0 : index
    %c0_239 = arith.constant 0 : index
    %380 = vector.load %arg28[%c0_238, %c0_239] : memref<32x32xf32, #tpu.memory_space<vmem>>, vector<32x32xf32>
    %cst_240 = arith.constant dense<0.000000e+00> : vector<8x32xf32>
    %381 = tpu.matmul %379, %380, %cst_240 {dimension_numbers = #tpu.dot_dimension_numbers<[1], [0], [0], [1], [0, 0, 1, 1], [], []>} : vector<8x32xf32>, vector<32x32xf32>, vector<8x32xf32> -> vector<8x32xf32>
    %c0_241 = arith.constant 0 : index
    %c0_242 = arith.constant 0 : index
    %382 = vector.load %arg30[%c0_241, %c0_242] : memref<1x32xf32, #tpu.memory_space<vmem>>, vector<1x32xf32>
    %383 = vector.broadcast %382 : vector<1x32xf32> to vector<8x32xf32>
    %384 = arith.addf %381, %383 : vector<8x32xf32>
    %c0_243 = arith.constant 0 : index
    %c0_244 = arith.constant 0 : index
    %385 = vector.load %arg29[%c0_243, %c0_244] : memref<32x4xf32, #tpu.memory_space<vmem>>, vector<32x4xf32>
    %cst_245 = arith.constant dense<0.000000e+00> : vector<8x4xf32>
    %386 = tpu.matmul %379, %385, %cst_245 {dimension_numbers = #tpu.dot_dimension_numbers<[1], [0], [0], [1], [0, 0, 1, 1], [], []>} : vector<8x32xf32>, vector<32x4xf32>, vector<8x4xf32> -> vector<8x4xf32>
    %c0_246 = arith.constant 0 : index
    %c0_247 = arith.constant 0 : index
    %387 = vector.load %arg31[%c0_246, %c0_247] : memref<1x4xf32, #tpu.memory_space<vmem>>, vector<1x4xf32>
    %388 = vector.broadcast %387 : vector<1x4xf32> to vector<8x4xf32>
    %389 = arith.addf %386, %388 : vector<8x4xf32>
    %390 = arith.addf %384, %326 : vector<8x32xf32>
    %391 = arith.addf %389, %334 : vector<8x4xf32>
    %c3_248 = arith.constant 3 : index
    %c0_249 = arith.constant 0 : index
    %c0_250 = arith.constant 0 : index
    %392 = vector.load %arg41[%c3_248, %c0_249, %c0_250] : memref<8x8x32xf32, #tpu.memory_space<vmem>>, vector<1x8x32xf32>
    %393 = vector.shape_cast %392 : vector<1x8x32xf32> to vector<8x32xf32>
    %394 = vector.shape_cast %390 : vector<8x32xf32> to vector<1x8x32xf32>
    tpu.vector_store %arg41[%c3_248, %c0_249, %c0_250], %394 {strides = array<i32>} : memref<8x8x32xf32, #tpu.memory_space<vmem>>, vector<1x8x32xf32>,
    %c3_251 = arith.constant 3 : index
    %c0_252 = arith.constant 0 : index
    %c0_253 = arith.constant 0 : index
    %395 = vector.load %arg42[%c3_251, %c0_252, %c0_253] : memref<8x8x4xf32, #tpu.memory_space<vmem>>, vector<1x8x4xf32>
    %396 = vector.shape_cast %395 : vector<1x8x4xf32> to vector<8x4xf32>
    %397 = vector.shape_cast %391 : vector<8x4xf32> to vector<1x8x4xf32>
    tpu.vector_store %arg42[%c3_251, %c0_252, %c0_253], %397 {strides = array<i32>} : memref<8x8x4xf32, #tpu.memory_space<vmem>>, vector<1x8x4xf32>,
    %c4 = arith.constant 4 : index
    %c0_254 = arith.constant 0 : index
    %c0_255 = arith.constant 0 : index
    %398 = vector.load %arg3[%c4, %c0_254, %c0_255] : memref<6x8x1xf32, #tpu.memory_space<vmem>>, vector<1x8x1xf32>
    %399 = vector.shape_cast %398 : vector<1x8x1xf32> to vector<8x1xf32>
    %400 = vector.extract_strided_slice %72 {offsets = [32, 0], sizes = [8, 32], strides = [1, 1]} : vector<48x32xf32> to vector<8x32xf32>
    %401 = vector.broadcast %399 : vector<8x1xf32> to vector<8x32xf32>
    %402 = arith.mulf %401, %400 : vector<8x32xf32>
    %cst_256 = arith.constant 1.000000e+00 : f32
    %403 = vector.broadcast %cst_256 : f32 to vector<8x1xf32>
    %404 = arith.subf %403, %399 : vector<8x1xf32>
    %405 = vector.broadcast %404 : vector<8x1xf32> to vector<8x32xf32>
    %406 = arith.mulf %405, %390 : vector<8x32xf32>
    %407 = arith.addf %402, %406 : vector<8x32xf32>
    %408 = vector.extract_strided_slice %50 {offsets = [32, 0], sizes = [8, 4], strides = [1, 1]} : vector<48x4xf32> to vector<8x4xf32>
    %409 = vector.broadcast %399 : vector<8x1xf32> to vector<8x4xf32>
    %410 = arith.mulf %409, %408 : vector<8x4xf32>
    %cst_257 = arith.constant 1.000000e+00 : f32
    %411 = vector.broadcast %cst_257 : f32 to vector<8x1xf32>
    %412 = arith.subf %411, %399 : vector<8x1xf32>
    %413 = vector.broadcast %412 : vector<8x1xf32> to vector<8x4xf32>
    %414 = arith.mulf %413, %391 : vector<8x4xf32>
    %415 = arith.addf %410, %414 : vector<8x4xf32>
    %c0_258 = arith.constant 0 : index
    %c0_259 = arith.constant 0 : index
    %416 = vector.load %arg22[%c0_258, %c0_259] : memref<32x128xf32, #tpu.memory_space<vmem>>, vector<32x128xf32>
    %cst_260 = arith.constant dense<0.000000e+00> : vector<8x128xf32>
    %417 = tpu.matmul %407, %416, %cst_260 {dimension_numbers = #tpu.dot_dimension_numbers<[1], [0], [0], [1], [0, 0, 1, 1], [], []>} : vector<8x32xf32>, vector<32x128xf32>, vector<8x128xf32> -> vector<8x128xf32>
    %c0_261 = arith.constant 0 : index
    %c0_262 = arith.constant 0 : index
    %418 = vector.load %arg23[%c0_261, %c0_262] : memref<4x128xf32, #tpu.memory_space<vmem>>, vector<4x128xf32>
    %cst_263 = arith.constant dense<0.000000e+00> : vector<8x128xf32>
    %419 = tpu.matmul %415, %418, %cst_263 {dimension_numbers = #tpu.dot_dimension_numbers<[1], [0], [0], [1], [0, 0, 1, 1], [], []>} : vector<8x4xf32>, vector<4x128xf32>, vector<8x128xf32> -> vector<8x128xf32>
    %420 = arith.addf %417, %419 : vector<8x128xf32>
    %c0_264 = arith.constant 0 : index
    %c0_265 = arith.constant 0 : index
    %421 = vector.load %arg24[%c0_264, %c0_265] : memref<32x128xf32, #tpu.memory_space<vmem>>, vector<32x128xf32>
    %cst_266 = arith.constant dense<0.000000e+00> : vector<8x128xf32>
    %422 = tpu.matmul %361, %421, %cst_266 {dimension_numbers = #tpu.dot_dimension_numbers<[1], [0], [0], [1], [0, 0, 1, 1], [], []>} : vector<8x32xf32>, vector<32x128xf32>, vector<8x128xf32> -> vector<8x128xf32>
    %423 = arith.addf %420, %422 : vector<8x128xf32>
    %c0_267 = arith.constant 0 : index
    %c0_268 = arith.constant 0 : index
    %424 = vector.load %arg25[%c0_267, %c0_268] : memref<1x128xf32, #tpu.memory_space<vmem>>, vector<1x128xf32>
    %425 = vector.broadcast %424 : vector<1x128xf32> to vector<8x128xf32>
    %426 = arith.addf %423, %425 : vector<8x128xf32>
    %427 = vector.broadcast %84 : vector<1x128xf32> to vector<8x128xf32>
    %428 = arith.mulf %427, %426 : vector<8x128xf32>
    %429 = math.tanh %428 : vector<8x128xf32>
    %430 = vector.broadcast %84 : vector<1x128xf32> to vector<8x128xf32>
    %431 = arith.mulf %430, %429 : vector<8x128xf32>
    %432 = vector.broadcast %87 : vector<1x128xf32> to vector<8x128xf32>
    %433 = arith.addf %431, %432 : vector<8x128xf32>
    %434 = vector.extract_strided_slice %433 {offsets = [0, 0], sizes = [8, 32], strides = [1, 1]} : vector<8x128xf32> to vector<8x32xf32>
    %435 = vector.extract_strided_slice %433 {offsets = [0, 32], sizes = [8, 32], strides = [1, 1]} : vector<8x128xf32> to vector<8x32xf32>
    %436 = vector.extract_strided_slice %433 {offsets = [0, 64], sizes = [8, 32], strides = [1, 1]} : vector<8x128xf32> to vector<8x32xf32>
    %437 = vector.extract_strided_slice %433 {offsets = [0, 96], sizes = [8, 32], strides = [1, 1]} : vector<8x128xf32> to vector<8x32xf32>
    %438 = arith.mulf %435, %359 : vector<8x32xf32>
    %439 = arith.mulf %434, %436 : vector<8x32xf32>
    %440 = arith.addf %438, %439 : vector<8x32xf32>
    %441 = math.tanh %440 : vector<8x32xf32>
    %442 = arith.mulf %437, %441 : vector<8x32xf32>
    %c0_269 = arith.constant 0 : index
    %c0_270 = arith.constant 0 : index
    %c0_271 = arith.constant 0 : index
    %443 = vector.load %arg26[%c0_269, %c0_270, %c0_271] : memref<2x32x32xf32, #tpu.memory_space<vmem>>, vector<1x32x32xf32>
    %444 = vector.shape_cast %443 : vector<1x32x32xf32> to vector<32x32xf32>
    %cst_272 = arith.constant dense<0.000000e+00> : vector<8x32xf32>
    %445 = tpu.matmul %442, %444, %cst_272 {dimension_numbers = #tpu.dot_dimension_numbers<[1], [0], [0], [1], [0, 0, 1, 1], [], []>} : vector<8x32xf32>, vector<32x32xf32>, vector<8x32xf32> -> vector<8x32xf32>
    %c0_273 = arith.constant 0 : index
    %c0_274 = arith.constant 0 : index
    %c0_275 = arith.constant 0 : index
    %446 = vector.load %arg27[%c0_273, %c0_274, %c0_275] : memref<2x1x32xf32, #tpu.memory_space<vmem>>, vector<1x1x32xf32>
    %447 = vector.shape_cast %446 : vector<1x1x32xf32> to vector<1x32xf32>
    %448 = vector.broadcast %447 : vector<1x32xf32> to vector<8x32xf32>
    %449 = arith.addf %445, %448 : vector<8x32xf32>
    %cst_276 = arith.constant 0.000000e+00 : f32
    %450 = vector.broadcast %cst_276 : f32 to vector<8x32xf32>
    %451 = arith.maximumf %449, %450 : vector<8x32xf32>
    %c1_277 = arith.constant 1 : index
    %c0_278 = arith.constant 0 : index
    %c0_279 = arith.constant 0 : index
    %452 = vector.load %arg26[%c1_277, %c0_278, %c0_279] : memref<2x32x32xf32, #tpu.memory_space<vmem>>, vector<1x32x32xf32>
    %453 = vector.shape_cast %452 : vector<1x32x32xf32> to vector<32x32xf32>
    %cst_280 = arith.constant dense<0.000000e+00> : vector<8x32xf32>
    %454 = tpu.matmul %451, %453, %cst_280 {dimension_numbers = #tpu.dot_dimension_numbers<[1], [0], [0], [1], [0, 0, 1, 1], [], []>} : vector<8x32xf32>, vector<32x32xf32>, vector<8x32xf32> -> vector<8x32xf32>
    %c1_281 = arith.constant 1 : index
    %c0_282 = arith.constant 0 : index
    %c0_283 = arith.constant 0 : index
    %455 = vector.load %arg27[%c1_281, %c0_282, %c0_283] : memref<2x1x32xf32, #tpu.memory_space<vmem>>, vector<1x1x32xf32>
    %456 = vector.shape_cast %455 : vector<1x1x32xf32> to vector<1x32xf32>
    %457 = vector.broadcast %456 : vector<1x32xf32> to vector<8x32xf32>
    %458 = arith.addf %454, %457 : vector<8x32xf32>
    %cst_284 = arith.constant 0.000000e+00 : f32
    %459 = vector.broadcast %cst_284 : f32 to vector<8x32xf32>
    %460 = arith.maximumf %458, %459 : vector<8x32xf32>
    %c0_285 = arith.constant 0 : index
    %c0_286 = arith.constant 0 : index
    %461 = vector.load %arg28[%c0_285, %c0_286] : memref<32x32xf32, #tpu.memory_space<vmem>>, vector<32x32xf32>
    %cst_287 = arith.constant dense<0.000000e+00> : vector<8x32xf32>
    %462 = tpu.matmul %460, %461, %cst_287 {dimension_numbers = #tpu.dot_dimension_numbers<[1], [0], [0], [1], [0, 0, 1, 1], [], []>} : vector<8x32xf32>, vector<32x32xf32>, vector<8x32xf32> -> vector<8x32xf32>
    %c0_288 = arith.constant 0 : index
    %c0_289 = arith.constant 0 : index
    %463 = vector.load %arg30[%c0_288, %c0_289] : memref<1x32xf32, #tpu.memory_space<vmem>>, vector<1x32xf32>
    %464 = vector.broadcast %463 : vector<1x32xf32> to vector<8x32xf32>
    %465 = arith.addf %462, %464 : vector<8x32xf32>
    %c0_290 = arith.constant 0 : index
    %c0_291 = arith.constant 0 : index
    %466 = vector.load %arg29[%c0_290, %c0_291] : memref<32x4xf32, #tpu.memory_space<vmem>>, vector<32x4xf32>
    %cst_292 = arith.constant dense<0.000000e+00> : vector<8x4xf32>
    %467 = tpu.matmul %460, %466, %cst_292 {dimension_numbers = #tpu.dot_dimension_numbers<[1], [0], [0], [1], [0, 0, 1, 1], [], []>} : vector<8x32xf32>, vector<32x4xf32>, vector<8x4xf32> -> vector<8x4xf32>
    %c0_293 = arith.constant 0 : index
    %c0_294 = arith.constant 0 : index
    %468 = vector.load %arg31[%c0_293, %c0_294] : memref<1x4xf32, #tpu.memory_space<vmem>>, vector<1x4xf32>
    %469 = vector.broadcast %468 : vector<1x4xf32> to vector<8x4xf32>
    %470 = arith.addf %467, %469 : vector<8x4xf32>
    %471 = arith.addf %465, %407 : vector<8x32xf32>
    %472 = arith.addf %470, %415 : vector<8x4xf32>
    %c4_295 = arith.constant 4 : index
    %c0_296 = arith.constant 0 : index
    %c0_297 = arith.constant 0 : index
    %473 = vector.load %arg41[%c4_295, %c0_296, %c0_297] : memref<8x8x32xf32, #tpu.memory_space<vmem>>, vector<1x8x32xf32>
    %474 = vector.shape_cast %473 : vector<1x8x32xf32> to vector<8x32xf32>
    %475 = vector.shape_cast %471 : vector<8x32xf32> to vector<1x8x32xf32>
    tpu.vector_store %arg41[%c4_295, %c0_296, %c0_297], %475 {strides = array<i32>} : memref<8x8x32xf32, #tpu.memory_space<vmem>>, vector<1x8x32xf32>,
    %c4_298 = arith.constant 4 : index
    %c0_299 = arith.constant 0 : index
    %c0_300 = arith.constant 0 : index
    %476 = vector.load %arg42[%c4_298, %c0_299, %c0_300] : memref<8x8x4xf32, #tpu.memory_space<vmem>>, vector<1x8x4xf32>
    %477 = vector.shape_cast %476 : vector<1x8x4xf32> to vector<8x4xf32>
    %478 = vector.shape_cast %472 : vector<8x4xf32> to vector<1x8x4xf32>
    tpu.vector_store %arg42[%c4_298, %c0_299, %c0_300], %478 {strides = array<i32>} : memref<8x8x4xf32, #tpu.memory_space<vmem>>, vector<1x8x4xf32>,
    %c5 = arith.constant 5 : index
    %c0_301 = arith.constant 0 : index
    %c0_302 = arith.constant 0 : index
    %479 = vector.load %arg3[%c5, %c0_301, %c0_302] : memref<6x8x1xf32, #tpu.memory_space<vmem>>, vector<1x8x1xf32>
    %480 = vector.shape_cast %479 : vector<1x8x1xf32> to vector<8x1xf32>
    %481 = vector.extract_strided_slice %72 {offsets = [40, 0], sizes = [8, 32], strides = [1, 1]} : vector<48x32xf32> to vector<8x32xf32>
    %482 = vector.broadcast %480 : vector<8x1xf32> to vector<8x32xf32>
    %483 = arith.mulf %482, %481 : vector<8x32xf32>
    %cst_303 = arith.constant 1.000000e+00 : f32
    %484 = vector.broadcast %cst_303 : f32 to vector<8x1xf32>
    %485 = arith.subf %484, %480 : vector<8x1xf32>
    %486 = vector.broadcast %485 : vector<8x1xf32> to vector<8x32xf32>
    %487 = arith.mulf %486, %471 : vector<8x32xf32>
    %488 = arith.addf %483, %487 : vector<8x32xf32>
    %489 = vector.extract_strided_slice %50 {offsets = [40, 0], sizes = [8, 4], strides = [1, 1]} : vector<48x4xf32> to vector<8x4xf32>
    %490 = vector.broadcast %480 : vector<8x1xf32> to vector<8x4xf32>
    %491 = arith.mulf %490, %489 : vector<8x4xf32>
    %cst_304 = arith.constant 1.000000e+00 : f32
    %492 = vector.broadcast %cst_304 : f32 to vector<8x1xf32>
    %493 = arith.subf %492, %480 : vector<8x1xf32>
    %494 = vector.broadcast %493 : vector<8x1xf32> to vector<8x4xf32>
    %495 = arith.mulf %494, %472 : vector<8x4xf32>
    %496 = arith.addf %491, %495 : vector<8x4xf32>
    %c0_305 = arith.constant 0 : index
    %c0_306 = arith.constant 0 : index
    %497 = vector.load %arg22[%c0_305, %c0_306] : memref<32x128xf32, #tpu.memory_space<vmem>>, vector<32x128xf32>
    %cst_307 = arith.constant dense<0.000000e+00> : vector<8x128xf32>
    %498 = tpu.matmul %488, %497, %cst_307 {dimension_numbers = #tpu.dot_dimension_numbers<[1], [0], [0], [1], [0, 0, 1, 1], [], []>} : vector<8x32xf32>, vector<32x128xf32>, vector<8x128xf32> -> vector<8x128xf32>
    %c0_308 = arith.constant 0 : index
    %c0_309 = arith.constant 0 : index
    %499 = vector.load %arg23[%c0_308, %c0_309] : memref<4x128xf32, #tpu.memory_space<vmem>>, vector<4x128xf32>
    %cst_310 = arith.constant dense<0.000000e+00> : vector<8x128xf32>
    %500 = tpu.matmul %496, %499, %cst_310 {dimension_numbers = #tpu.dot_dimension_numbers<[1], [0], [0], [1], [0, 0, 1, 1], [], []>} : vector<8x4xf32>, vector<4x128xf32>, vector<8x128xf32> -> vector<8x128xf32>
    %501 = arith.addf %498, %500 : vector<8x128xf32>
    %c0_311 = arith.constant 0 : index
    %c0_312 = arith.constant 0 : index
    %502 = vector.load %arg24[%c0_311, %c0_312] : memref<32x128xf32, #tpu.memory_space<vmem>>, vector<32x128xf32>
    %cst_313 = arith.constant dense<0.000000e+00> : vector<8x128xf32>
    %503 = tpu.matmul %442, %502, %cst_313 {dimension_numbers = #tpu.dot_dimension_numbers<[1], [0], [0], [1], [0, 0, 1, 1], [], []>} : vector<8x32xf32>, vector<32x128xf32>, vector<8x128xf32> -> vector<8x128xf32>
    %504 = arith.addf %501, %503 : vector<8x128xf32>
    %c0_314 = arith.constant 0 : index
    %c0_315 = arith.constant 0 : index
    %505 = vector.load %arg25[%c0_314, %c0_315] : memref<1x128xf32, #tpu.memory_space<vmem>>, vector<1x128xf32>
    %506 = vector.broadcast %505 : vector<1x128xf32> to vector<8x128xf32>
    %507 = arith.addf %504, %506 : vector<8x128xf32>
    %508 = vector.broadcast %84 : vector<1x128xf32> to vector<8x128xf32>
    %509 = arith.mulf %508, %507 : vector<8x128xf32>
    %510 = math.tanh %509 : vector<8x128xf32>
    %511 = vector.broadcast %84 : vector<1x128xf32> to vector<8x128xf32>
    %512 = arith.mulf %511, %510 : vector<8x128xf32>
    %513 = vector.broadcast %87 : vector<1x128xf32> to vector<8x128xf32>
    %514 = arith.addf %512, %513 : vector<8x128xf32>
    %515 = vector.extract_strided_slice %514 {offsets = [0, 0], sizes = [8, 32], strides = [1, 1]} : vector<8x128xf32> to vector<8x32xf32>
    %516 = vector.extract_strided_slice %514 {offsets = [0, 32], sizes = [8, 32], strides = [1, 1]} : vector<8x128xf32> to vector<8x32xf32>
    %517 = vector.extract_strided_slice %514 {offsets = [0, 64], sizes = [8, 32], strides = [1, 1]} : vector<8x128xf32> to vector<8x32xf32>
    %518 = vector.extract_strided_slice %514 {offsets = [0, 96], sizes = [8, 32], strides = [1, 1]} : vector<8x128xf32> to vector<8x32xf32>
    %519 = arith.mulf %516, %440 : vector<8x32xf32>
    %520 = arith.mulf %515, %517 : vector<8x32xf32>
    %521 = arith.addf %519, %520 : vector<8x32xf32>
    %522 = math.tanh %521 : vector<8x32xf32>
    %523 = arith.mulf %518, %522 : vector<8x32xf32>
    %c0_316 = arith.constant 0 : index
    %c0_317 = arith.constant 0 : index
    %c0_318 = arith.constant 0 : index
    %524 = vector.load %arg26[%c0_316, %c0_317, %c0_318] : memref<2x32x32xf32, #tpu.memory_space<vmem>>, vector<1x32x32xf32>
    %525 = vector.shape_cast %524 : vector<1x32x32xf32> to vector<32x32xf32>
    %cst_319 = arith.constant dense<0.000000e+00> : vector<8x32xf32>
    %526 = tpu.matmul %523, %525, %cst_319 {dimension_numbers = #tpu.dot_dimension_numbers<[1], [0], [0], [1], [0, 0, 1, 1], [], []>} : vector<8x32xf32>, vector<32x32xf32>, vector<8x32xf32> -> vector<8x32xf32>
    %c0_320 = arith.constant 0 : index
    %c0_321 = arith.constant 0 : index
    %c0_322 = arith.constant 0 : index
    %527 = vector.load %arg27[%c0_320, %c0_321, %c0_322] : memref<2x1x32xf32, #tpu.memory_space<vmem>>, vector<1x1x32xf32>
    %528 = vector.shape_cast %527 : vector<1x1x32xf32> to vector<1x32xf32>
    %529 = vector.broadcast %528 : vector<1x32xf32> to vector<8x32xf32>
    %530 = arith.addf %526, %529 : vector<8x32xf32>
    %cst_323 = arith.constant 0.000000e+00 : f32
    %531 = vector.broadcast %cst_323 : f32 to vector<8x32xf32>
    %532 = arith.maximumf %530, %531 : vector<8x32xf32>
    %c1_324 = arith.constant 1 : index
    %c0_325 = arith.constant 0 : index
    %c0_326 = arith.constant 0 : index
    %533 = vector.load %arg26[%c1_324, %c0_325, %c0_326] : memref<2x32x32xf32, #tpu.memory_space<vmem>>, vector<1x32x32xf32>
    %534 = vector.shape_cast %533 : vector<1x32x32xf32> to vector<32x32xf32>
    %cst_327 = arith.constant dense<0.000000e+00> : vector<8x32xf32>
    %535 = tpu.matmul %532, %534, %cst_327 {dimension_numbers = #tpu.dot_dimension_numbers<[1], [0], [0], [1], [0, 0, 1, 1], [], []>} : vector<8x32xf32>, vector<32x32xf32>, vector<8x32xf32> -> vector<8x32xf32>
    %c1_328 = arith.constant 1 : index
    %c0_329 = arith.constant 0 : index
    %c0_330 = arith.constant 0 : index
    %536 = vector.load %arg27[%c1_328, %c0_329, %c0_330] : memref<2x1x32xf32, #tpu.memory_space<vmem>>, vector<1x1x32xf32>
    %537 = vector.shape_cast %536 : vector<1x1x32xf32> to vector<1x32xf32>
    %538 = vector.broadcast %537 : vector<1x32xf32> to vector<8x32xf32>
    %539 = arith.addf %535, %538 : vector<8x32xf32>
    %cst_331 = arith.constant 0.000000e+00 : f32
    %540 = vector.broadcast %cst_331 : f32 to vector<8x32xf32>
    %541 = arith.maximumf %539, %540 : vector<8x32xf32>
    %c0_332 = arith.constant 0 : index
    %c0_333 = arith.constant 0 : index
    %542 = vector.load %arg28[%c0_332, %c0_333] : memref<32x32xf32, #tpu.memory_space<vmem>>, vector<32x32xf32>
    %cst_334 = arith.constant dense<0.000000e+00> : vector<8x32xf32>
    %543 = tpu.matmul %541, %542, %cst_334 {dimension_numbers = #tpu.dot_dimension_numbers<[1], [0], [0], [1], [0, 0, 1, 1], [], []>} : vector<8x32xf32>, vector<32x32xf32>, vector<8x32xf32> -> vector<8x32xf32>
    %c0_335 = arith.constant 0 : index
    %c0_336 = arith.constant 0 : index
    %544 = vector.load %arg30[%c0_335, %c0_336] : memref<1x32xf32, #tpu.memory_space<vmem>>, vector<1x32xf32>
    %545 = vector.broadcast %544 : vector<1x32xf32> to vector<8x32xf32>
    %546 = arith.addf %543, %545 : vector<8x32xf32>
    %c0_337 = arith.constant 0 : index
    %c0_338 = arith.constant 0 : index
    %547 = vector.load %arg29[%c0_337, %c0_338] : memref<32x4xf32, #tpu.memory_space<vmem>>, vector<32x4xf32>
    %cst_339 = arith.constant dense<0.000000e+00> : vector<8x4xf32>
    %548 = tpu.matmul %541, %547, %cst_339 {dimension_numbers = #tpu.dot_dimension_numbers<[1], [0], [0], [1], [0, 0, 1, 1], [], []>} : vector<8x32xf32>, vector<32x4xf32>, vector<8x4xf32> -> vector<8x4xf32>
    %c0_340 = arith.constant 0 : index
    %c0_341 = arith.constant 0 : index
    %549 = vector.load %arg31[%c0_340, %c0_341] : memref<1x4xf32, #tpu.memory_space<vmem>>, vector<1x4xf32>
    %550 = vector.broadcast %549 : vector<1x4xf32> to vector<8x4xf32>
    %551 = arith.addf %548, %550 : vector<8x4xf32>
    %552 = arith.addf %546, %488 : vector<8x32xf32>
    %553 = arith.addf %551, %496 : vector<8x4xf32>
    %c0_342 = arith.constant 0 : index
    %c0_343 = arith.constant 0 : index
    %554 = vector.load %arg22[%c0_342, %c0_343] : memref<32x128xf32, #tpu.memory_space<vmem>>, vector<32x128xf32>
    %cst_344 = arith.constant dense<0.000000e+00> : vector<8x128xf32>
    %555 = tpu.matmul %552, %554, %cst_344 {dimension_numbers = #tpu.dot_dimension_numbers<[1], [0], [0], [1], [0, 0, 1, 1], [], []>} : vector<8x32xf32>, vector<32x128xf32>, vector<8x128xf32> -> vector<8x128xf32>
    %c0_345 = arith.constant 0 : index
    %c0_346 = arith.constant 0 : index
    %556 = vector.load %arg23[%c0_345, %c0_346] : memref<4x128xf32, #tpu.memory_space<vmem>>, vector<4x128xf32>
    %cst_347 = arith.constant dense<0.000000e+00> : vector<8x128xf32>
    %557 = tpu.matmul %553, %556, %cst_347 {dimension_numbers = #tpu.dot_dimension_numbers<[1], [0], [0], [1], [0, 0, 1, 1], [], []>} : vector<8x4xf32>, vector<4x128xf32>, vector<8x128xf32> -> vector<8x128xf32>
    %558 = arith.addf %555, %557 : vector<8x128xf32>
    %c0_348 = arith.constant 0 : index
    %c0_349 = arith.constant 0 : index
    %559 = vector.load %arg24[%c0_348, %c0_349] : memref<32x128xf32, #tpu.memory_space<vmem>>, vector<32x128xf32>
    %cst_350 = arith.constant dense<0.000000e+00> : vector<8x128xf32>
    %560 = tpu.matmul %523, %559, %cst_350 {dimension_numbers = #tpu.dot_dimension_numbers<[1], [0], [0], [1], [0, 0, 1, 1], [], []>} : vector<8x32xf32>, vector<32x128xf32>, vector<8x128xf32> -> vector<8x128xf32>
    %561 = arith.addf %558, %560 : vector<8x128xf32>
    %c0_351 = arith.constant 0 : index
    %c0_352 = arith.constant 0 : index
    %562 = vector.load %arg25[%c0_351, %c0_352] : memref<1x128xf32, #tpu.memory_space<vmem>>, vector<1x128xf32>
    %563 = vector.broadcast %562 : vector<1x128xf32> to vector<8x128xf32>
    %564 = arith.addf %561, %563 : vector<8x128xf32>
    %565 = vector.broadcast %84 : vector<1x128xf32> to vector<8x128xf32>
    %566 = arith.mulf %565, %564 : vector<8x128xf32>
    %567 = math.tanh %566 : vector<8x128xf32>
    %568 = vector.broadcast %84 : vector<1x128xf32> to vector<8x128xf32>
    %569 = arith.mulf %568, %567 : vector<8x128xf32>
    %570 = vector.broadcast %87 : vector<1x128xf32> to vector<8x128xf32>
    %571 = arith.addf %569, %570 : vector<8x128xf32>
    %572 = vector.extract_strided_slice %571 {offsets = [0, 0], sizes = [8, 32], strides = [1, 1]} : vector<8x128xf32> to vector<8x32xf32>
    %573 = vector.extract_strided_slice %571 {offsets = [0, 32], sizes = [8, 32], strides = [1, 1]} : vector<8x128xf32> to vector<8x32xf32>
    %574 = vector.extract_strided_slice %571 {offsets = [0, 64], sizes = [8, 32], strides = [1, 1]} : vector<8x128xf32> to vector<8x32xf32>
    %575 = vector.extract_strided_slice %571 {offsets = [0, 96], sizes = [8, 32], strides = [1, 1]} : vector<8x128xf32> to vector<8x32xf32>
    %576 = arith.mulf %573, %521 : vector<8x32xf32>
    %577 = arith.mulf %572, %574 : vector<8x32xf32>
    %578 = arith.addf %576, %577 : vector<8x32xf32>
    %579 = math.tanh %578 : vector<8x32xf32>
    %580 = arith.mulf %575, %579 : vector<8x32xf32>
    %c0_353 = arith.constant 0 : index
    %c0_354 = arith.constant 0 : index
    %c0_355 = arith.constant 0 : index
    %581 = vector.load %arg26[%c0_353, %c0_354, %c0_355] : memref<2x32x32xf32, #tpu.memory_space<vmem>>, vector<1x32x32xf32>
    %582 = vector.shape_cast %581 : vector<1x32x32xf32> to vector<32x32xf32>
    %cst_356 = arith.constant dense<0.000000e+00> : vector<8x32xf32>
    %583 = tpu.matmul %580, %582, %cst_356 {dimension_numbers = #tpu.dot_dimension_numbers<[1], [0], [0], [1], [0, 0, 1, 1], [], []>} : vector<8x32xf32>, vector<32x32xf32>, vector<8x32xf32> -> vector<8x32xf32>
    %c0_357 = arith.constant 0 : index
    %c0_358 = arith.constant 0 : index
    %c0_359 = arith.constant 0 : index
    %584 = vector.load %arg27[%c0_357, %c0_358, %c0_359] : memref<2x1x32xf32, #tpu.memory_space<vmem>>, vector<1x1x32xf32>
    %585 = vector.shape_cast %584 : vector<1x1x32xf32> to vector<1x32xf32>
    %586 = vector.broadcast %585 : vector<1x32xf32> to vector<8x32xf32>
    %587 = arith.addf %583, %586 : vector<8x32xf32>
    %cst_360 = arith.constant 0.000000e+00 : f32
    %588 = vector.broadcast %cst_360 : f32 to vector<8x32xf32>
    %589 = arith.maximumf %587, %588 : vector<8x32xf32>
    %c1_361 = arith.constant 1 : index
    %c0_362 = arith.constant 0 : index
    %c0_363 = arith.constant 0 : index
    %590 = vector.load %arg26[%c1_361, %c0_362, %c0_363] : memref<2x32x32xf32, #tpu.memory_space<vmem>>, vector<1x32x32xf32>
    %591 = vector.shape_cast %590 : vector<1x32x32xf32> to vector<32x32xf32>
    %cst_364 = arith.constant dense<0.000000e+00> : vector<8x32xf32>
    %592 = tpu.matmul %589, %591, %cst_364 {dimension_numbers = #tpu.dot_dimension_numbers<[1], [0], [0], [1], [0, 0, 1, 1], [], []>} : vector<8x32xf32>, vector<32x32xf32>, vector<8x32xf32> -> vector<8x32xf32>
    %c1_365 = arith.constant 1 : index
    %c0_366 = arith.constant 0 : index
    %c0_367 = arith.constant 0 : index
    %593 = vector.load %arg27[%c1_365, %c0_366, %c0_367] : memref<2x1x32xf32, #tpu.memory_space<vmem>>, vector<1x1x32xf32>
    %594 = vector.shape_cast %593 : vector<1x1x32xf32> to vector<1x32xf32>
    %595 = vector.broadcast %594 : vector<1x32xf32> to vector<8x32xf32>
    %596 = arith.addf %592, %595 : vector<8x32xf32>
    %cst_368 = arith.constant 0.000000e+00 : f32
    %597 = vector.broadcast %cst_368 : f32 to vector<8x32xf32>
    %598 = arith.maximumf %596, %597 : vector<8x32xf32>
    %c0_369 = arith.constant 0 : index
    %c0_370 = arith.constant 0 : index
    %599 = vector.load %arg28[%c0_369, %c0_370] : memref<32x32xf32, #tpu.memory_space<vmem>>, vector<32x32xf32>
    %cst_371 = arith.constant dense<0.000000e+00> : vector<8x32xf32>
    %600 = tpu.matmul %598, %599, %cst_371 {dimension_numbers = #tpu.dot_dimension_numbers<[1], [0], [0], [1], [0, 0, 1, 1], [], []>} : vector<8x32xf32>, vector<32x32xf32>, vector<8x32xf32> -> vector<8x32xf32>
    %c0_372 = arith.constant 0 : index
    %c0_373 = arith.constant 0 : index
    %601 = vector.load %arg30[%c0_372, %c0_373] : memref<1x32xf32, #tpu.memory_space<vmem>>, vector<1x32xf32>
    %602 = vector.broadcast %601 : vector<1x32xf32> to vector<8x32xf32>
    %603 = arith.addf %600, %602 : vector<8x32xf32>
    %c0_374 = arith.constant 0 : index
    %c0_375 = arith.constant 0 : index
    %604 = vector.load %arg29[%c0_374, %c0_375] : memref<32x4xf32, #tpu.memory_space<vmem>>, vector<32x4xf32>
    %cst_376 = arith.constant dense<0.000000e+00> : vector<8x4xf32>
    %605 = tpu.matmul %598, %604, %cst_376 {dimension_numbers = #tpu.dot_dimension_numbers<[1], [0], [0], [1], [0, 0, 1, 1], [], []>} : vector<8x32xf32>, vector<32x4xf32>, vector<8x4xf32> -> vector<8x4xf32>
    %c0_377 = arith.constant 0 : index
    %c0_378 = arith.constant 0 : index
    %606 = vector.load %arg31[%c0_377, %c0_378] : memref<1x4xf32, #tpu.memory_space<vmem>>, vector<1x4xf32>
    %607 = vector.broadcast %606 : vector<1x4xf32> to vector<8x4xf32>
    %608 = arith.addf %605, %607 : vector<8x4xf32>
    %609 = arith.addf %603, %552 : vector<8x32xf32>
    %610 = arith.addf %608, %553 : vector<8x4xf32>
    %c5_379 = arith.constant 5 : index
    %c0_380 = arith.constant 0 : index
    %c0_381 = arith.constant 0 : index
    %611 = vector.load %arg41[%c5_379, %c0_380, %c0_381] : memref<8x8x32xf32, #tpu.memory_space<vmem>>, vector<1x8x32xf32>
    %612 = vector.shape_cast %611 : vector<1x8x32xf32> to vector<8x32xf32>
    %613 = vector.shape_cast %609 : vector<8x32xf32> to vector<1x8x32xf32>
    tpu.vector_store %arg41[%c5_379, %c0_380, %c0_381], %613 {strides = array<i32>} : memref<8x8x32xf32, #tpu.memory_space<vmem>>, vector<1x8x32xf32>,
    %c5_382 = arith.constant 5 : index
    %c0_383 = arith.constant 0 : index
    %c0_384 = arith.constant 0 : index
    %614 = vector.load %arg42[%c5_382, %c0_383, %c0_384] : memref<8x8x4xf32, #tpu.memory_space<vmem>>, vector<1x8x4xf32>
    %615 = vector.shape_cast %614 : vector<1x8x4xf32> to vector<8x4xf32>
    %616 = vector.shape_cast %610 : vector<8x4xf32> to vector<1x8x4xf32>
    tpu.vector_store %arg42[%c5_382, %c0_383, %c0_384], %616 {strides = array<i32>} : memref<8x8x4xf32, #tpu.memory_space<vmem>>, vector<1x8x4xf32>,
    %c0_385 = arith.constant 0 : index
    %c0_386 = arith.constant 0 : index
    %617 = vector.load %arg22[%c0_385, %c0_386] : memref<32x128xf32, #tpu.memory_space<vmem>>, vector<32x128xf32>
    %cst_387 = arith.constant dense<0.000000e+00> : vector<8x128xf32>
    %618 = tpu.matmul %609, %617, %cst_387 {dimension_numbers = #tpu.dot_dimension_numbers<[1], [0], [0], [1], [0, 0, 1, 1], [], []>} : vector<8x32xf32>, vector<32x128xf32>, vector<8x128xf32> -> vector<8x128xf32>
    %c0_388 = arith.constant 0 : index
    %c0_389 = arith.constant 0 : index
    %619 = vector.load %arg23[%c0_388, %c0_389] : memref<4x128xf32, #tpu.memory_space<vmem>>, vector<4x128xf32>
    %cst_390 = arith.constant dense<0.000000e+00> : vector<8x128xf32>
    %620 = tpu.matmul %610, %619, %cst_390 {dimension_numbers = #tpu.dot_dimension_numbers<[1], [0], [0], [1], [0, 0, 1, 1], [], []>} : vector<8x4xf32>, vector<4x128xf32>, vector<8x128xf32> -> vector<8x128xf32>
    %621 = arith.addf %618, %620 : vector<8x128xf32>
    %c0_391 = arith.constant 0 : index
    %c0_392 = arith.constant 0 : index
    %622 = vector.load %arg24[%c0_391, %c0_392] : memref<32x128xf32, #tpu.memory_space<vmem>>, vector<32x128xf32>
    %cst_393 = arith.constant dense<0.000000e+00> : vector<8x128xf32>
    %623 = tpu.matmul %580, %622, %cst_393 {dimension_numbers = #tpu.dot_dimension_numbers<[1], [0], [0], [1], [0, 0, 1, 1], [], []>} : vector<8x32xf32>, vector<32x128xf32>, vector<8x128xf32> -> vector<8x128xf32>
    %624 = arith.addf %621, %623 : vector<8x128xf32>
    %c0_394 = arith.constant 0 : index
    %c0_395 = arith.constant 0 : index
    %625 = vector.load %arg25[%c0_394, %c0_395] : memref<1x128xf32, #tpu.memory_space<vmem>>, vector<1x128xf32>
    %626 = vector.broadcast %625 : vector<1x128xf32> to vector<8x128xf32>
    %627 = arith.addf %624, %626 : vector<8x128xf32>
    %628 = vector.broadcast %84 : vector<1x128xf32> to vector<8x128xf32>
    %629 = arith.mulf %628, %627 : vector<8x128xf32>
    %630 = math.tanh %629 : vector<8x128xf32>
    %631 = vector.broadcast %84 : vector<1x128xf32> to vector<8x128xf32>
    %632 = arith.mulf %631, %630 : vector<8x128xf32>
    %633 = vector.broadcast %87 : vector<1x128xf32> to vector<8x128xf32>
    %634 = arith.addf %632, %633 : vector<8x128xf32>
    %635 = vector.extract_strided_slice %634 {offsets = [0, 0], sizes = [8, 32], strides = [1, 1]} : vector<8x128xf32> to vector<8x32xf32>
    %636 = vector.extract_strided_slice %634 {offsets = [0, 32], sizes = [8, 32], strides = [1, 1]} : vector<8x128xf32> to vector<8x32xf32>
    %637 = vector.extract_strided_slice %634 {offsets = [0, 64], sizes = [8, 32], strides = [1, 1]} : vector<8x128xf32> to vector<8x32xf32>
    %638 = vector.extract_strided_slice %634 {offsets = [0, 96], sizes = [8, 32], strides = [1, 1]} : vector<8x128xf32> to vector<8x32xf32>
    %639 = arith.mulf %636, %578 : vector<8x32xf32>
    %640 = arith.mulf %635, %637 : vector<8x32xf32>
    %641 = arith.addf %639, %640 : vector<8x32xf32>
    %642 = math.tanh %641 : vector<8x32xf32>
    %643 = arith.mulf %638, %642 : vector<8x32xf32>
    %c0_396 = arith.constant 0 : index
    %c0_397 = arith.constant 0 : index
    %c0_398 = arith.constant 0 : index
    %644 = vector.load %arg26[%c0_396, %c0_397, %c0_398] : memref<2x32x32xf32, #tpu.memory_space<vmem>>, vector<1x32x32xf32>
    %645 = vector.shape_cast %644 : vector<1x32x32xf32> to vector<32x32xf32>
    %cst_399 = arith.constant dense<0.000000e+00> : vector<8x32xf32>
    %646 = tpu.matmul %643, %645, %cst_399 {dimension_numbers = #tpu.dot_dimension_numbers<[1], [0], [0], [1], [0, 0, 1, 1], [], []>} : vector<8x32xf32>, vector<32x32xf32>, vector<8x32xf32> -> vector<8x32xf32>
    %c0_400 = arith.constant 0 : index
    %c0_401 = arith.constant 0 : index
    %c0_402 = arith.constant 0 : index
    %647 = vector.load %arg27[%c0_400, %c0_401, %c0_402] : memref<2x1x32xf32, #tpu.memory_space<vmem>>, vector<1x1x32xf32>
    %648 = vector.shape_cast %647 : vector<1x1x32xf32> to vector<1x32xf32>
    %649 = vector.broadcast %648 : vector<1x32xf32> to vector<8x32xf32>
    %650 = arith.addf %646, %649 : vector<8x32xf32>
    %cst_403 = arith.constant 0.000000e+00 : f32
    %651 = vector.broadcast %cst_403 : f32 to vector<8x32xf32>
    %652 = arith.maximumf %650, %651 : vector<8x32xf32>
    %c1_404 = arith.constant 1 : index
    %c0_405 = arith.constant 0 : index
    %c0_406 = arith.constant 0 : index
    %653 = vector.load %arg26[%c1_404, %c0_405, %c0_406] : memref<2x32x32xf32, #tpu.memory_space<vmem>>, vector<1x32x32xf32>
    %654 = vector.shape_cast %653 : vector<1x32x32xf32> to vector<32x32xf32>
    %cst_407 = arith.constant dense<0.000000e+00> : vector<8x32xf32>
    %655 = tpu.matmul %652, %654, %cst_407 {dimension_numbers = #tpu.dot_dimension_numbers<[1], [0], [0], [1], [0, 0, 1, 1], [], []>} : vector<8x32xf32>, vector<32x32xf32>, vector<8x32xf32> -> vector<8x32xf32>
    %c1_408 = arith.constant 1 : index
    %c0_409 = arith.constant 0 : index
    %c0_410 = arith.constant 0 : index
    %656 = vector.load %arg27[%c1_408, %c0_409, %c0_410] : memref<2x1x32xf32, #tpu.memory_space<vmem>>, vector<1x1x32xf32>
    %657 = vector.shape_cast %656 : vector<1x1x32xf32> to vector<1x32xf32>
    %658 = vector.broadcast %657 : vector<1x32xf32> to vector<8x32xf32>
    %659 = arith.addf %655, %658 : vector<8x32xf32>
    %cst_411 = arith.constant 0.000000e+00 : f32
    %660 = vector.broadcast %cst_411 : f32 to vector<8x32xf32>
    %661 = arith.maximumf %659, %660 : vector<8x32xf32>
    %c0_412 = arith.constant 0 : index
    %c0_413 = arith.constant 0 : index
    %662 = vector.load %arg28[%c0_412, %c0_413] : memref<32x32xf32, #tpu.memory_space<vmem>>, vector<32x32xf32>
    %cst_414 = arith.constant dense<0.000000e+00> : vector<8x32xf32>
    %663 = tpu.matmul %661, %662, %cst_414 {dimension_numbers = #tpu.dot_dimension_numbers<[1], [0], [0], [1], [0, 0, 1, 1], [], []>} : vector<8x32xf32>, vector<32x32xf32>, vector<8x32xf32> -> vector<8x32xf32>
    %c0_415 = arith.constant 0 : index
    %c0_416 = arith.constant 0 : index
    %664 = vector.load %arg30[%c0_415, %c0_416] : memref<1x32xf32, #tpu.memory_space<vmem>>, vector<1x32xf32>
    %665 = vector.broadcast %664 : vector<1x32xf32> to vector<8x32xf32>
    %666 = arith.addf %663, %665 : vector<8x32xf32>
    %c0_417 = arith.constant 0 : index
    %c0_418 = arith.constant 0 : index
    %667 = vector.load %arg29[%c0_417, %c0_418] : memref<32x4xf32, #tpu.memory_space<vmem>>, vector<32x4xf32>
    %cst_419 = arith.constant dense<0.000000e+00> : vector<8x4xf32>
    %668 = tpu.matmul %661, %667, %cst_419 {dimension_numbers = #tpu.dot_dimension_numbers<[1], [0], [0], [1], [0, 0, 1, 1], [], []>} : vector<8x32xf32>, vector<32x4xf32>, vector<8x4xf32> -> vector<8x4xf32>
    %c0_420 = arith.constant 0 : index
    %c0_421 = arith.constant 0 : index
    %669 = vector.load %arg31[%c0_420, %c0_421] : memref<1x4xf32, #tpu.memory_space<vmem>>, vector<1x4xf32>
    %670 = vector.broadcast %669 : vector<1x4xf32> to vector<8x4xf32>
    %671 = arith.addf %668, %670 : vector<8x4xf32>
    %672 = arith.addf %666, %609 : vector<8x32xf32>
    %673 = arith.addf %671, %610 : vector<8x4xf32>
    %c6 = arith.constant 6 : index
    %c0_422 = arith.constant 0 : index
    %c0_423 = arith.constant 0 : index
    %674 = vector.load %arg41[%c6, %c0_422, %c0_423] : memref<8x8x32xf32, #tpu.memory_space<vmem>>, vector<1x8x32xf32>
    %675 = vector.shape_cast %674 : vector<1x8x32xf32> to vector<8x32xf32>
    %676 = vector.shape_cast %672 : vector<8x32xf32> to vector<1x8x32xf32>
    tpu.vector_store %arg41[%c6, %c0_422, %c0_423], %676 {strides = array<i32>} : memref<8x8x32xf32, #tpu.memory_space<vmem>>, vector<1x8x32xf32>,
    %c6_424 = arith.constant 6 : index
    %c0_425 = arith.constant 0 : index
    %c0_426 = arith.constant 0 : index
    %677 = vector.load %arg42[%c6_424, %c0_425, %c0_426] : memref<8x8x4xf32, #tpu.memory_space<vmem>>, vector<1x8x4xf32>
    %678 = vector.shape_cast %677 : vector<1x8x4xf32> to vector<8x4xf32>
    %679 = vector.shape_cast %673 : vector<8x4xf32> to vector<1x8x4xf32>
    tpu.vector_store %arg42[%c6_424, %c0_425, %c0_426], %679 {strides = array<i32>} : memref<8x8x4xf32, #tpu.memory_space<vmem>>, vector<1x8x4xf32>,
    %c0_427 = arith.constant 0 : index
    %c0_428 = arith.constant 0 : index
    %680 = vector.load %arg22[%c0_427, %c0_428] : memref<32x128xf32, #tpu.memory_space<vmem>>, vector<32x128xf32>
    %cst_429 = arith.constant dense<0.000000e+00> : vector<8x128xf32>
    %681 = tpu.matmul %672, %680, %cst_429 {dimension_numbers = #tpu.dot_dimension_numbers<[1], [0], [0], [1], [0, 0, 1, 1], [], []>} : vector<8x32xf32>, vector<32x128xf32>, vector<8x128xf32> -> vector<8x128xf32>
    %c0_430 = arith.constant 0 : index
    %c0_431 = arith.constant 0 : index
    %682 = vector.load %arg23[%c0_430, %c0_431] : memref<4x128xf32, #tpu.memory_space<vmem>>, vector<4x128xf32>
    %cst_432 = arith.constant dense<0.000000e+00> : vector<8x128xf32>
    %683 = tpu.matmul %673, %682, %cst_432 {dimension_numbers = #tpu.dot_dimension_numbers<[1], [0], [0], [1], [0, 0, 1, 1], [], []>} : vector<8x4xf32>, vector<4x128xf32>, vector<8x128xf32> -> vector<8x128xf32>
    %684 = arith.addf %681, %683 : vector<8x128xf32>
    %c0_433 = arith.constant 0 : index
    %c0_434 = arith.constant 0 : index
    %685 = vector.load %arg24[%c0_433, %c0_434] : memref<32x128xf32, #tpu.memory_space<vmem>>, vector<32x128xf32>
    %cst_435 = arith.constant dense<0.000000e+00> : vector<8x128xf32>
    %686 = tpu.matmul %643, %685, %cst_435 {dimension_numbers = #tpu.dot_dimension_numbers<[1], [0], [0], [1], [0, 0, 1, 1], [], []>} : vector<8x32xf32>, vector<32x128xf32>, vector<8x128xf32> -> vector<8x128xf32>
    %687 = arith.addf %684, %686 : vector<8x128xf32>
    %c0_436 = arith.constant 0 : index
    %c0_437 = arith.constant 0 : index
    %688 = vector.load %arg25[%c0_436, %c0_437] : memref<1x128xf32, #tpu.memory_space<vmem>>, vector<1x128xf32>
    %689 = vector.broadcast %688 : vector<1x128xf32> to vector<8x128xf32>
    %690 = arith.addf %687, %689 : vector<8x128xf32>
    %691 = vector.broadcast %84 : vector<1x128xf32> to vector<8x128xf32>
    %692 = arith.mulf %691, %690 : vector<8x128xf32>
    %693 = math.tanh %692 : vector<8x128xf32>
    %694 = vector.broadcast %84 : vector<1x128xf32> to vector<8x128xf32>
    %695 = arith.mulf %694, %693 : vector<8x128xf32>
    %696 = vector.broadcast %87 : vector<1x128xf32> to vector<8x128xf32>
    %697 = arith.addf %695, %696 : vector<8x128xf32>
    %698 = vector.extract_strided_slice %697 {offsets = [0, 0], sizes = [8, 32], strides = [1, 1]} : vector<8x128xf32> to vector<8x32xf32>
    %699 = vector.extract_strided_slice %697 {offsets = [0, 32], sizes = [8, 32], strides = [1, 1]} : vector<8x128xf32> to vector<8x32xf32>
    %700 = vector.extract_strided_slice %697 {offsets = [0, 64], sizes = [8, 32], strides = [1, 1]} : vector<8x128xf32> to vector<8x32xf32>
    %701 = vector.extract_strided_slice %697 {offsets = [0, 96], sizes = [8, 32], strides = [1, 1]} : vector<8x128xf32> to vector<8x32xf32>
    %702 = arith.mulf %699, %641 : vector<8x32xf32>
    %703 = arith.mulf %698, %700 : vector<8x32xf32>
    %704 = arith.addf %702, %703 : vector<8x32xf32>
    %705 = math.tanh %704 : vector<8x32xf32>
    %706 = arith.mulf %701, %705 : vector<8x32xf32>
    %c0_438 = arith.constant 0 : index
    %c0_439 = arith.constant 0 : index
    %c0_440 = arith.constant 0 : index
    %707 = vector.load %arg26[%c0_438, %c0_439, %c0_440] : memref<2x32x32xf32, #tpu.memory_space<vmem>>, vector<1x32x32xf32>
    %708 = vector.shape_cast %707 : vector<1x32x32xf32> to vector<32x32xf32>
    %cst_441 = arith.constant dense<0.000000e+00> : vector<8x32xf32>
    %709 = tpu.matmul %706, %708, %cst_441 {dimension_numbers = #tpu.dot_dimension_numbers<[1], [0], [0], [1], [0, 0, 1, 1], [], []>} : vector<8x32xf32>, vector<32x32xf32>, vector<8x32xf32> -> vector<8x32xf32>
    %c0_442 = arith.constant 0 : index
    %c0_443 = arith.constant 0 : index
    %c0_444 = arith.constant 0 : index
    %710 = vector.load %arg27[%c0_442, %c0_443, %c0_444] : memref<2x1x32xf32, #tpu.memory_space<vmem>>, vector<1x1x32xf32>
    %711 = vector.shape_cast %710 : vector<1x1x32xf32> to vector<1x32xf32>
    %712 = vector.broadcast %711 : vector<1x32xf32> to vector<8x32xf32>
    %713 = arith.addf %709, %712 : vector<8x32xf32>
    %cst_445 = arith.constant 0.000000e+00 : f32
    %714 = vector.broadcast %cst_445 : f32 to vector<8x32xf32>
    %715 = arith.maximumf %713, %714 : vector<8x32xf32>
    %c1_446 = arith.constant 1 : index
    %c0_447 = arith.constant 0 : index
    %c0_448 = arith.constant 0 : index
    %716 = vector.load %arg26[%c1_446, %c0_447, %c0_448] : memref<2x32x32xf32, #tpu.memory_space<vmem>>, vector<1x32x32xf32>
    %717 = vector.shape_cast %716 : vector<1x32x32xf32> to vector<32x32xf32>
    %cst_449 = arith.constant dense<0.000000e+00> : vector<8x32xf32>
    %718 = tpu.matmul %715, %717, %cst_449 {dimension_numbers = #tpu.dot_dimension_numbers<[1], [0], [0], [1], [0, 0, 1, 1], [], []>} : vector<8x32xf32>, vector<32x32xf32>, vector<8x32xf32> -> vector<8x32xf32>
    %c1_450 = arith.constant 1 : index
    %c0_451 = arith.constant 0 : index
    %c0_452 = arith.constant 0 : index
    %719 = vector.load %arg27[%c1_450, %c0_451, %c0_452] : memref<2x1x32xf32, #tpu.memory_space<vmem>>, vector<1x1x32xf32>
    %720 = vector.shape_cast %719 : vector<1x1x32xf32> to vector<1x32xf32>
    %721 = vector.broadcast %720 : vector<1x32xf32> to vector<8x32xf32>
    %722 = arith.addf %718, %721 : vector<8x32xf32>
    %cst_453 = arith.constant 0.000000e+00 : f32
    %723 = vector.broadcast %cst_453 : f32 to vector<8x32xf32>
    %724 = arith.maximumf %722, %723 : vector<8x32xf32>
    %c0_454 = arith.constant 0 : index
    %c0_455 = arith.constant 0 : index
    %725 = vector.load %arg28[%c0_454, %c0_455] : memref<32x32xf32, #tpu.memory_space<vmem>>, vector<32x32xf32>
    %cst_456 = arith.constant dense<0.000000e+00> : vector<8x32xf32>
    %726 = tpu.matmul %724, %725, %cst_456 {dimension_numbers = #tpu.dot_dimension_numbers<[1], [0], [0], [1], [0, 0, 1, 1], [], []>} : vector<8x32xf32>, vector<32x32xf32>, vector<8x32xf32> -> vector<8x32xf32>
    %c0_457 = arith.constant 0 : index
    %c0_458 = arith.constant 0 : index
    %727 = vector.load %arg30[%c0_457, %c0_458] : memref<1x32xf32, #tpu.memory_space<vmem>>, vector<1x32xf32>
    %728 = vector.broadcast %727 : vector<1x32xf32> to vector<8x32xf32>
    %729 = arith.addf %726, %728 : vector<8x32xf32>
    %c0_459 = arith.constant 0 : index
    %c0_460 = arith.constant 0 : index
    %730 = vector.load %arg29[%c0_459, %c0_460] : memref<32x4xf32, #tpu.memory_space<vmem>>, vector<32x4xf32>
    %cst_461 = arith.constant dense<0.000000e+00> : vector<8x4xf32>
    %731 = tpu.matmul %724, %730, %cst_461 {dimension_numbers = #tpu.dot_dimension_numbers<[1], [0], [0], [1], [0, 0, 1, 1], [], []>} : vector<8x32xf32>, vector<32x4xf32>, vector<8x4xf32> -> vector<8x4xf32>
    %c0_462 = arith.constant 0 : index
    %c0_463 = arith.constant 0 : index
    %732 = vector.load %arg31[%c0_462, %c0_463] : memref<1x4xf32, #tpu.memory_space<vmem>>, vector<1x4xf32>
    %733 = vector.broadcast %732 : vector<1x4xf32> to vector<8x4xf32>
    %734 = arith.addf %731, %733 : vector<8x4xf32>
    %735 = arith.addf %729, %672 : vector<8x32xf32>
    %736 = arith.addf %734, %673 : vector<8x4xf32>
    %c7 = arith.constant 7 : index
    %c0_464 = arith.constant 0 : index
    %c0_465 = arith.constant 0 : index
    %737 = vector.load %arg41[%c7, %c0_464, %c0_465] : memref<8x8x32xf32, #tpu.memory_space<vmem>>, vector<1x8x32xf32>
    %738 = vector.shape_cast %737 : vector<1x8x32xf32> to vector<8x32xf32>
    %739 = vector.shape_cast %735 : vector<8x32xf32> to vector<1x8x32xf32>
    tpu.vector_store %arg41[%c7, %c0_464, %c0_465], %739 {strides = array<i32>} : memref<8x8x32xf32, #tpu.memory_space<vmem>>, vector<1x8x32xf32>,
    %c7_466 = arith.constant 7 : index
    %c0_467 = arith.constant 0 : index
    %c0_468 = arith.constant 0 : index
    %740 = vector.load %arg42[%c7_466, %c0_467, %c0_468] : memref<8x8x4xf32, #tpu.memory_space<vmem>>, vector<1x8x4xf32>
    %741 = vector.shape_cast %740 : vector<1x8x4xf32> to vector<8x4xf32>
    %742 = vector.shape_cast %736 : vector<8x4xf32> to vector<1x8x4xf32>
    tpu.vector_store %arg42[%c7_466, %c0_467, %c0_468], %742 {strides = array<i32>} : memref<8x8x4xf32, #tpu.memory_space<vmem>>, vector<1x8x4xf32>,
    %c0_469 = arith.constant 0 : index
    %c0_470 = arith.constant 0 : index
    %743 = vector.load %arg32[%c0_469, %c0_470] : memref<32x32xf32, #tpu.memory_space<vmem>>, vector<32x32xf32>
    %cst_471 = arith.constant dense<0.000000e+00> : vector<8x32xf32>
    %744 = tpu.matmul %735, %743, %cst_471 {dimension_numbers = #tpu.dot_dimension_numbers<[1], [0], [0], [1], [0, 0, 1, 1], [], []>} : vector<8x32xf32>, vector<32x32xf32>, vector<8x32xf32> -> vector<8x32xf32>
    %c0_472 = arith.constant 0 : index
    %c0_473 = arith.constant 0 : index
    %745 = vector.load %arg33[%c0_472, %c0_473] : memref<1x32xf32, #tpu.memory_space<vmem>>, vector<1x32xf32>
    %746 = vector.broadcast %745 : vector<1x32xf32> to vector<8x32xf32>
    %747 = arith.addf %744, %746 : vector<8x32xf32>
    %748 = arith.negf %747 : vector<8x32xf32>
    %749 = math.exp %748 : vector<8x32xf32>
    %cst_474 = arith.constant 1.000000e+00 : f32
    %750 = vector.broadcast %cst_474 : f32 to vector<8x32xf32>
    %751 = arith.addf %750, %749 : vector<8x32xf32>
    %752 = arith.divf %750, %751 : vector<8x32xf32>
    %c0_475 = arith.constant 0 : index
    %c0_476 = arith.constant 0 : index
    %753 = vector.load %arg34[%c0_475, %c0_476] : memref<32x32xf32, #tpu.memory_space<vmem>>, vector<32x32xf32>
    %cst_477 = arith.constant dense<0.000000e+00> : vector<8x32xf32>
    %754 = tpu.matmul %752, %753, %cst_477 {dimension_numbers = #tpu.dot_dimension_numbers<[1], [0], [0], [1], [0, 0, 1, 1], [], []>} : vector<8x32xf32>, vector<32x32xf32>, vector<8x32xf32> -> vector<8x32xf32>
    %c0_478 = arith.constant 0 : index
    %c0_479 = arith.constant 0 : index
    %755 = vector.load %arg35[%c0_478, %c0_479] : memref<1x32xf32, #tpu.memory_space<vmem>>, vector<1x32xf32>
    %756 = vector.broadcast %755 : vector<1x32xf32> to vector<8x32xf32>
    %757 = arith.addf %754, %756 : vector<8x32xf32>
    %758 = arith.negf %757 : vector<8x32xf32>
    %759 = math.exp %758 : vector<8x32xf32>
    %cst_480 = arith.constant 1.000000e+00 : f32
    %760 = vector.broadcast %cst_480 : f32 to vector<8x32xf32>
    %761 = arith.addf %760, %759 : vector<8x32xf32>
    %762 = arith.divf %760, %761 : vector<8x32xf32>
    %c0_481 = arith.constant 0 : index
    %c0_482 = arith.constant 0 : index
    %763 = vector.load %arg36[%c0_481, %c0_482] : memref<32x2xf32, #tpu.memory_space<vmem>>, vector<32x2xf32>
    %cst_483 = arith.constant dense<0.000000e+00> : vector<8x2xf32>
    %764 = tpu.matmul %762, %763, %cst_483 {dimension_numbers = #tpu.dot_dimension_numbers<[1], [0], [0], [1], [0, 0, 1, 1], [], []>} : vector<8x32xf32>, vector<32x2xf32>, vector<8x2xf32> -> vector<8x2xf32>
    %c0_484 = arith.constant 0 : index
    %c0_485 = arith.constant 0 : index
    %765 = vector.load %arg37[%c0_484, %c0_485] : memref<1x2xf32, #tpu.memory_space<vmem>>, vector<1x2xf32>
    %766 = vector.broadcast %765 : vector<1x2xf32> to vector<8x2xf32>
    %767 = arith.addf %764, %766 : vector<8x2xf32>
    %c0_486 = arith.constant 0 : index
    %c0_487 = arith.constant 0 : index
    %768 = vector.load %arg43[%c0_486, %c0_487] : memref<8x2xf32, #tpu.memory_space<vmem>>, vector<8x2xf32>
    tpu.vector_store %arg43[%c0_486, %c0_487], %767 {strides = array<i32>} : memref<8x2xf32, #tpu.memory_space<vmem>>, vector<8x2xf32>,
    return
  }
}

</mosaic_0001>

<bundles_post_ra>
// kernel: _lambda_.1
= control target key start
LH: loop header
LB: loop body
LE: loop exit
PB: predicated region body
PF: predicated region fallthrough
CT: control target
= control target key end

     0   :  { %s9485_s6 = smov 1   ;;  %s9486_s10 = smov 2   ;;  %s10944_s0 = inlined_call_operand.smem [shape: u32[44], index: -1, kind: input, shape index: {}] }
   0x1   :  { %s9548_s5 = sld [smem:[%s10944_s0]]   ;;  %s9487_s14 = smov 3  }
   0x2   :  { %s9553_s9 = sld [smem:[%s10944_s0 + %s9485_s6]]   ;;  %s9488_s18 = smov 4  }
   0x3   :  { %s9558_s13 = sld [smem:[%s10944_s0 + %s9486_s10]]   ;;  %s9489_s22 = smov 5  }
   0x4   :  { %s9563_s17 = sld [smem:[%s10944_s0 + %s9487_s14]]   ;;  %s9490_s26 = smov 6  }
   0x5   :  { %s9568_s21 = sld [smem:[%s10944_s0 + %s9488_s18]]   ;;  %s9491_s30 = smov 7  }
   0x6   :  { %s9573_s25 = sld [smem:[%s10944_s0 + %s9489_s22]]   ;;  %s9492_s4 = smov 8  }
   0x7   :  { %s9578_s29 = sld [smem:[%s10944_s0 + %s9490_s26]]   ;;  %s9493_s10 = smov 9  }
   0x8   :  { %s9583_s3 = sld [smem:[%s10944_s0 + %s9491_s30]]   ;;  %s9494_s15 = smov 10  }
   0x9   :  { %10966 = sst [smem:[#allocation13_spill]] %s9558_s13  ;;  %s9495_s20 = smov 11  }
   0xa   :  { %10967 = sst [smem:[#allocation14_spill]] %s9563_s17  ;;  %s9496_s26 = smov 12  }
   0xb   :  { %s9588_s8 = sld [smem:[%s10944_s0 + %s9492_s4]]   ;;  %s9497_s1 = smov 13  }
   0xc   :  { %s9593_s14 = sld [smem:[%s10944_s0 + %s9493_s10]]   ;;  %s9498_s7 = smov 14  }
   0xd   :  { %s9598_s19 = sld [smem:[%s10944_s0 + %s9494_s15]]   ;;  %s9499_s15 = smov 15  }
   0xe   :  { %s9603_s24 = sld [smem:[%s10944_s0 + %s9495_s20]]   ;;  %s9500_s22 = smov 16  }
   0xf   :  { %s9608_s30 = sld [smem:[%s10944_s0 + %s9496_s26]]   ;;  %s9501_s28 = smov 17  }
  0x10   :  { %s9613_s6 = sld [smem:[%s10944_s0 + %s9497_s1]]  }
  0x11   :  { %s9618_s12 = sld [smem:[%s10944_s0 + %s9498_s7]]   ;;  %s9502_s7 = smov 18  }
  0x12   :  { %s9623_s20 = sld [smem:[%s10944_s0 + %s9499_s15]]   ;;  %s9503_s15 = smov 19  }
  0x13   :  { %10968 = sst [smem:[#allocation15_spill]] %s9598_s19 }
  0x14   :  { %10969 = sst [smem:[#allocation16_spill]] %s9603_s24 }
  0x15   :  { %10970 = sst [smem:[#allocation17_spill]] %s9608_s30 }
  0x16   :  { %s9628_s27 = sld [smem:[%s10944_s0 + %s9500_s22]]   ;;  %s9504_s22 = smov 20  }
  0x17   :  { %s9633_s4 = sld [smem:[%s10944_s0 + %s9501_s28]]   ;;  %s9505_s28 = smov 21  }
  0x18   :  { %10971 = sst [smem:[#allocation18_spill]] %s9623_s20 }
  0x19   :  { %s9638_s17 = sld [smem:[%s10944_s0 + %s9502_s7]]   ;;  %s9506_s7 = smov 22  }
  0x1a   :  { %s9643_s30 = sld [smem:[%s10944_s0 + %s9503_s15]]   ;;  %s9507_s15 = smov 23  }
  0x1b   :  { %s9648_s20 = sld [smem:[%s10944_s0 + %s9504_s22]]   ;;  %s9508_s22 = smov 24  }
  0x1c   :  { %10972 = sst [smem:[#allocation19_spill]] %s9628_s27 }
  0x1d   :  { %s9653_s19 = sld [smem:[%s10944_s0 + %s9505_s28]]   ;;  %s9509_s28 = smov 25  }
  0x1f   :  { %10973 = sst [smem:[#allocation20_spill]] %s9638_s17 }
  0x20   :  { %10974 = sst [smem:[#allocation21_spill]] %s9643_s30 }
  0x21   :  { %10975 = sst [smem:[#allocation22_spill]] %s9648_s20 }
  0x22   :  { %s9658_s17 = sld [smem:[%s10944_s0 + %s9506_s7]]   ;;  %s9510_s7 = smov 26  }
  0x23   :  { %10976 = sst [smem:[#allocation23_spill]] %s9653_s19 }
  0x24   :  { %s9663_s30 = sld [smem:[%s10944_s0 + %s9507_s15]]   ;;  %s9511_s15 = smov 27  }
  0x25   :  { %s9668_s20 = sld [smem:[%s10944_s0 + %s9508_s22]]   ;;  %s9512_s22 = smov 28  }
  0x26   :  { %s9673_s19 = sld [smem:[%s10944_s0 + %s9509_s28]]   ;;  %s9513_s28 = smov 29  }
  0x28   :  { %10977 = sst [smem:[#allocation24_spill]] %s9658_s17 }
  0x29   :  { %s9678_s17 = sld [smem:[%s10944_s0 + %s9510_s7]]   ;;  %s9514_s7 = smov 30  }
  0x2a   :  { %10978 = sst [smem:[#allocation25_spill]] %s9663_s30 }
  0x2b   :  { %10979 = sst [smem:[#allocation26_spill]] %s9668_s20 }
  0x2c   :  { %10980 = sst [smem:[#allocation27_spill]] %s9673_s19 }
  0x2d   :  { %s9683_s30 = sld [smem:[%s10944_s0 + %s9511_s15]]   ;;  %s9515_s15 = smov 31  }
  0x2e   :  { %s9688_s20 = sld [smem:[%s10944_s0 + %s9512_s22]]   ;;  %s9516_s22 = smov 32  }
  0x2f   :  { %10981 = sst [smem:[#allocation28_spill]] %s9678_s17 }
  0x30   :  { %s9693_s19 = sld [smem:[%s10944_s0 + %s9513_s28]]   ;;  %s9517_s28 = smov 33  }
  0x31   :  { %s9698_s17 = sld [smem:[%s10944_s0 + %s9514_s7]]   ;;  %s9518_s7 = smov 34  }
  0x33   :  { %10982 = sst [smem:[#allocation29_spill]] %s9683_s30 }
  0x34   :  { %10983 = sst [smem:[#allocation30_spill]] %s9688_s20 }
  0x35   :  { %s9703_s30 = sld [smem:[%s10944_s0 + %s9515_s15]]   ;;  %s9519_s15 = smov 35  }
  0x36   :  { %10984 = sst [smem:[#allocation31_spill]] %s9693_s19 }
  0x37   :  { %10985 = sst [smem:[#allocation32_spill]] %s9698_s17 }
  0x38   :  { %s9708_s20 = sld [smem:[%s10944_s0 + %s9516_s22]]   ;;  %s9520_s22 = smov 36  }
  0x39   :  { %s9713_s19 = sld [smem:[%s10944_s0 + %s9517_s28]]   ;;  %s9521_s28 = smov 37  }
  0x3a   :  { %s9718_s17 = sld [smem:[%s10944_s0 + %s9518_s7]]   ;;  %s9522_s7 = smov 38  }
  0x3b   :  { %10986 = sst [smem:[#allocation33_spill]] %s9703_s30 }
  0x3c   :  { %s9723_s30 = sld [smem:[%s10944_s0 + %s9519_s15]]   ;;  %s9523_s15 = smov 39  }
  0x3d   :  { %s9733_s27 = sld [smem:[%s10944_s0 + %s9521_s28]]   ;;  %s9525_s28 = smov 41  }
  0x3e   :  { %10987 = sst [smem:[#allocation34_spill]] %s9708_s20 }
  0x3f   :  { %s9728_s20 = sld [smem:[%s10944_s0 + %s9520_s22]]   ;;  %s9524_s22 = smov 40  }
  0x40   :  { %10988 = sst [smem:[#allocation35_spill]] %s9718_s17 }
  0x41   :  { %s9738_s17 = sld [smem:[%s10944_s0 + %s9522_s7]]   ;;  %s9526_s7 = smov 42  }
  0x42   :  { %s9743_s24 = sld [smem:[%s10944_s0 + %s9523_s15]]   ;;  %s9527_s15 = smov 43  }
  0x43   :  { %s9753_s13 = sld [smem:[%s10944_s0 + %s9525_s28]]  }
  0x45   :  { %10989 = sst [smem:[#allocation36_spill]] %s9728_s20 }
  0x46   :  { %s9748_s20 = sld [smem:[%s10944_s0 + %s9524_s22]]  }
  0x47   :  { %10990 = sst [smem:[#allocation37_spill]] %s9738_s17 }
  0x48   :  { %10991 = sst [smem:[#allocation38_spill]] %s9743_s24 }
  0x49   :  { %s9758_s17 = sld [smem:[%s10944_s0 + %s9526_s7]]  }
  0x4a   :  { %s9763_s24 = sld [smem:[%s10944_s0 + %s9527_s15]]  }
  0x4b   :  { %93 = vsyncpa [#allocation3], 0 }
  0x4c   :  { %94 = vsyncpa [#allocation5], 0 }
  0x4d   :  { %95 = vsyncpa [#allocation8], 0  ;;  %s9528_s22 = smov [#allocation4]   ;;  %s9529_s26 = smov [#allocation7]  }
  0x4e   :  { %s144_s23 = sshll.u32 %s9528_s22, 4  ;;  %s196_s28 = sshll.u32 %s9529_s26, 4  ;;  %s145_s23 = int_to_ptr.vmem [resolvable:$true] %s144_s23  ;;  %s197_s28 = int_to_ptr.vmem [resolvable:$true] %s196_s28 }
  0x4f   :  { %s9369_s1 = scalar_lea.hbm %s9633_s4, 16 }
  0x50   :  { %p9370_p0 = scmp.ne.s32.totalorder %s9633_s4, %s9369_s1  ;;  %p9373_p1 = scmp.lt.u32.totalorder %s9369_s1, %s9633_s4 }
  0x52   :  { %p9375_p2 = pnand %p9373_p1, %p9370_p0 }
  0x54   :  { %9378 = shalt.err (!%p9375_p2)
}
  0x55   :  { %s9379_s2 = scalar_lea.vmem %s145_s23, 16  ;;  %s9383_s0 = scalar_lea.vmem %s145_s23, 32 }
  0x56   :  { %p9380_p3 = scmp.ne.s32.totalorder %s145_s23, %s9379_s2  ;;  %p9384_p4 = scmp.lt.s32.totalorder %s145_s23, %s145_s23 }
  0x57   :  { %p9385_p5 = scmp.lt.s32.totalorder %s9383_s0, %s9379_s2 }
  0x59   :  { %p9386_p6 = por %p9385_p5, %p9384_p4 }
  0x5b   :  { %p9387_p7 = pnand %p9386_p6, %p9380_p3 }
  0x5d   :  { %9390 = shalt.err (!%p9387_p7)
}
  0x5e   :  { %147 = dma.hbm_to_vmem [thread:$0]  %s9633_s4, 16, %s145_s23, [#allocation5]  }
  0x5f   :  { %s9391_s7 = scalar_lea.hbm %s9723_s30, 16 }
  0x60   :  { %p9392_p8 = scmp.ne.s32.totalorder %s9723_s30, %s9391_s7  ;;  %p9395_p9 = scmp.lt.u32.totalorder %s9391_s7, %s9723_s30 }
  0x62   :  { %p9397_p10 = pnand %p9395_p9, %p9392_p8 }
  0x64   :  { %9400 = shalt.err (!%p9397_p10)
}
  0x65   :  { %s9401_s10 = scalar_lea.vmem %s197_s28, 16  ;;  %s9405_s11 = scalar_lea.vmem %s197_s28, 32 }
  0x66   :  { %p9402_p11 = scmp.ne.s32.totalorder %s197_s28, %s9401_s10  ;;  %p9406_p12 = scmp.lt.s32.totalorder %s197_s28, %s197_s28 }
  0x67   :  { %p9407_p13 = scmp.lt.s32.totalorder %s9405_s11, %s9401_s10 }
  0x69   :  { %p9408_p0 = por %p9407_p13, %p9406_p12 }
  0x6b   :  { %p9409_p1 = pnand %p9408_p0, %p9402_p11 }
  0x6d   :  { %9412 = shalt.err (!%p9409_p1)
}
  0x6e   :  { %199 = dma.hbm_to_vmem [thread:$0]  %s9723_s30, 16, %s197_s28, [#allocation8]  }
  0x6f   :  { %s9530_s15 = smov [#allocation2]   ;;  %s9531_s16 = smov [#allocation6]  }
  0x70   :  { %s130_s4 = sshll.u32 %s9530_s15, 4  ;;  %s184_s18 = sshll.u32 %s9531_s16, 4  ;;  %s131_s4 = int_to_ptr.vmem [resolvable:$true] %s130_s4  ;;  %s185_s18 = int_to_ptr.vmem [resolvable:$true] %s184_s18 }
  0x71   :  { %s9413_s22 = scalar_lea.hbm %s9618_s12, 16 }
  0x72   :  { %p9414_p2 = scmp.ne.s32.totalorder %s9618_s12, %s9413_s22  ;;  %p9417_p3 = scmp.lt.u32.totalorder %s9413_s22, %s9618_s12 }
  0x74   :  { %p9419_p4 = pnand %p9417_p3, %p9414_p2 }
  0x76   :  { %9422 = shalt.err (!%p9419_p4)
}
  0x77   :  { %s9423_s23 = scalar_lea.vmem %s131_s4, 16  ;;  %s9427_s26 = scalar_lea.vmem %s131_s4, 32 }
  0x78   :  { %p9424_p5 = scmp.ne.s32.totalorder %s131_s4, %s9423_s23  ;;  %p9428_p6 = scmp.lt.s32.totalorder %s131_s4, %s131_s4 }
  0x79   :  { %p9429_p7 = scmp.lt.s32.totalorder %s9427_s26, %s9423_s23 }
  0x7b   :  { %p9430_p8 = por %p9429_p7, %p9428_p6 }
  0x7d   :  { %p9431_p9 = pnand %p9430_p8, %p9424_p5 }
  0x7f   :  { %9434 = shalt.err (!%p9431_p9)
}
  0x80   :  { %133 = dma.hbm_to_vmem [thread:$0]  %s9618_s12, 16, %s131_s4, [#allocation3]  }
  0x81   :  { %s9435_s30 = scalar_lea.hbm %s9713_s19, 16 }
  0x82   :  { %p9436_p10 = scmp.ne.s32.totalorder %s9713_s19, %s9435_s30  ;;  %p9439_p11 = scmp.lt.u32.totalorder %s9435_s30, %s9713_s19 }
  0x84   :  { %p9441_p12 = pnand %p9439_p11, %p9436_p10 }
  0x86   :  { %9444 = shalt.err (!%p9441_p12)
}
  0x87   :  { %s9445_s28 = scalar_lea.vmem %s185_s18, 16  ;;  %s9449_s1 = scalar_lea.vmem %s185_s18, 32 }
  0x88   :  { %p9446_p13 = scmp.ne.s32.totalorder %s185_s18, %s9445_s28  ;;  %p9450_p0 = scmp.lt.s32.totalorder %s185_s18, %s185_s18 }
  0x89   :  { %p9451_p1 = scmp.lt.s32.totalorder %s9449_s1, %s9445_s28 }
  0x8b   :  { %p9452_p2 = por %p9451_p1, %p9450_p0 }
  0x8d   :  { %p9453_p3 = pnand %p9452_p2, %p9446_p13 }
  0x8f   :  { %9456 = shalt.err (!%p9453_p3)
}
  0x90   :  { %187 = dma.hbm_to_vmem [thread:$0]  %s9713_s19, 16, %s185_s18, [#allocation5]  }
  0x91   :  { %s9532_s2 = smov [#allocation9]   ;;  %s9457_s0 = scalar_lea.hbm %s9733_s27, 16 }
  0x92   :  { %s208_s12 = sshll.u32 %s9532_s2, 4  ;;  %p9458_p4 = scmp.ne.s32.totalorder %s9733_s27, %s9457_s0  ;;  %s209_s12 = int_to_ptr.vmem [resolvable:$true] %s208_s12 }
  0x93   :  { %p9461_p5 = scmp.lt.u32.totalorder %s9457_s0, %s9733_s27 }
  0x95   :  { %p9463_p6 = pnand %p9461_p5, %p9458_p4 }
  0x97   :  { %9466 = shalt.err (!%p9463_p6)
}
  0x98   :  { %s9467_s7 = scalar_lea.vmem %s209_s12, 16  ;;  %s9471_s10 = scalar_lea.vmem %s209_s12, 32 }
  0x99   :  { %p9468_p7 = scmp.ne.s32.totalorder %s209_s12, %s9467_s7  ;;  %p9472_p8 = scmp.lt.s32.totalorder %s209_s12, %s209_s12 }
  0x9a   :  { %p9473_p9 = scmp.lt.s32.totalorder %s9471_s10, %s9467_s7 }
  0x9c   :  { %p9474_p10 = por %p9473_p9, %p9472_p8 }
  0x9e   :  { %p9475_p11 = pnand %p9474_p10, %p9468_p7 }
  0xa0   :  { %9478 = shalt.err (!%p9475_p11)
}
  0xa1   :  { %211 = dma.hbm_to_vmem [thread:$0]  %s9733_s27, 16, %s209_s12, [#allocation8]  }
  0xa2   :  { %9479 = dma.done.wait [#allocation3], 16  }
  0xa3   :  { %9480 = vsyncadd [#allocation3], 4294967280 }
  0xa4   :  { %9481 = dma.done.wait [#allocation5], 32  }
  0xa5   :  { %9482 = vsyncadd [#allocation5], 4294967264 }
  0xa6   :  { %9483 = dma.done.wait [#allocation8], 32  }
  0xa7   :  { %9484 = vsyncadd [#allocation8], 4294967264  ;;  %vm249_vm0 = vcmask 130048   ;;  %v247_v0 = vld [vmem:[%s9573_s25] sm:$0xff]  ;;  %v248_v1 = vld [vmem:[%s9573_s25 + $0x8] sm:$0xff]  ;;  %vm506_vm1 = vcmask 261120  }
  0xa8   :  { %v9788_v2 = vld [vmem:[%s9553_s9] sm:$0xff]  ;;  %v8842_v3 = vpack.c.bf16 %v248_v1, %v247_v0  ;;  %v228_v4 = vld [vmem:[%s9548_s5 + $0x8] sm:$0xff]  ;;  %v9802_v9 = vld [vmem:[%s9553_s9 + $0x10] sm:$0xff]  ;;  %vm971_vm2 = vcmask 1043456   ;;  %vm952_vm3 = vcmask 31744   ;;  %s10995_s25 = sld [smem:[#allocation15_spill]] }
  0xa9   :  { %8032 = vmatprep.mubr.msk.f32.mxu0 %vm249_vm0, %v9788_v2  ;;  %v9794_v5 = vld [vmem:[%s9553_s9 + $0x8] sm:$0xff]  ;;  %v245_v6 = vld [vmem:[%s9568_s21] sm:$0xff]  ;;  %v9805_v10 = vld [vmem:[%s9553_s9 + $0x18] sm:$0xff]  ;;  %s11000_s19 = sld [smem:[#allocation17_spill]]  ;;  %s11002_s27 = sld [smem:[#allocation22_spill]]  ;;  %vm9534_vm4 = vmmov 0  }
  0xaa   :  { %v9798_v7 = vmul.f32 %v9794_v5, %v228_v4  ;;  %v246_v8 = vld [vmem:[%s9568_s21 + $0x8] sm:$0xff]  ;;  %8843 = vmatprep.subr.bf16.mxu0 %v8842_v3  ;;  %v9808_v12 = vld [vmem:[%s9553_s9 + $0x20] sm:$0xff]  ;;  %v229_v16 = vld [vmem:[%s9548_s5 + $0x10] sm:$0xff]  ;;  %s10994_s21 = sld [smem:[#allocation19_spill]]  ;;  %s11003_s11 = sld [smem:[#allocation26_spill]]  ;;  %vm7313_vm8 = vcmask 15360  }
  0xab   :  { %v8846_v11 = vpack.c.bf16 %v246_v8, %v245_v6  ;;  %v9811_v13 = vld [vmem:[%s9553_s9 + $0x28] sm:$0xff]  ;;  %v227_v14 = vld [vmem:[%s9548_s5] sm:$0xff]  ;;  %8845 = vmatpush3.bf16.msra.mxu0 %v8842_v3  ;;  %v230_v17 = vld [vmem:[%s9548_s5 + $0x18] sm:$0xff]  ;;  %v9821_v19 = vmul.f32 %v9802_v9, %v229_v16  ;;  %s10993_s9 = sld [smem:[#allocation16_spill]]  ;;  %s11004_s15 = sld [smem:[#allocation21_spill]] }
  0xac   :  { %v9815_v15 = vmul.f32 %v9788_v2, %v227_v14  ;;  %v231_v18 = vld [vmem:[%s9548_s5 + $0x20] sm:$0xff]  ;;  %v9824_v20 = vmul.f32 %v9805_v10, %v230_v17  ;;  %v232_v22 = vld [vmem:[%s9548_s5 + $0x28] sm:$0xff]  ;;  %v497_v27 = vld [vmem:[%s9583_s3 + $0x10] sm:$0xff]  ;;  %s10992_s5 = sld [smem:[#allocation13_spill]]  ;;  %s11005_s4 = sld [smem:[#allocation24_spill]] }
  0xad   :  { %8847 = vmatprep.subr.bf16.mxu0 %v8846_v11  ;;  %v9827_v21 = vmul.f32 %v9808_v12, %v231_v18  ;;  %v495_v23 = vld [vmem:[%s9583_s3] sm:$0xff]  ;;  %v496_v24 = vld [vmem:[%s9583_s3 + $0x8] sm:$0xff]  ;;  %v9833_v25 = vmul.f32 %v9811_v13, %v232_v22  ;;  %v498_v28 = vld [vmem:[%s9583_s3 + $0x18] sm:$0xff]  ;;  %s10997_s3 = sld [smem:[#allocation18_spill]]  ;;  %s11006_s16 = sld [smem:[#allocation23_spill]] }
  0xae   :  { %v8850_v26 = vpack.c.bf16 %v496_v24, %v495_v23  ;;  %8033 = vmatmul.mubr.msk.f32.vlgmr.msra.gmra.mrb[0].mxu0 %vm249_vm0, %v9794_v5  ;;  %v8854_v29 = vpack.c.bf16 %v498_v28, %v497_v27  ;;  %v626_v30 = vld [vmem:[%s9593_s14] sm:$0xff]  ;;  %v627_v31 = vld [vmem:[%s9593_s14 + $0x8] sm:$0xff]  ;;  %v628_v52 = vld [vmem:[%s9593_s14 + $0x10] sm:$0xff]  ;;  %s11007_s18 = sld [smem:[#allocation27_spill]]  ;;  %s11009_s22 = sld [smem:[#allocation28_spill]] }
  0xaf   :  { %8849 = vmatpush3.bf16.msra.mxu0 %v8846_v11  ;;  %8035 = vmatprep.mubr.msk.f32.mxu0 %vm249_vm0, %v9802_v9  ;;  %v8858_v32 = vpack.c.bf16 %v627_v31, %v626_v30  ;;  %v7397_v33 = vld [vmem:[%s9578_s29] ss:$0 sm:$0xff]  ;;  %v629_v53 = vld [vmem:[%s9593_s14 + $0x18] sm:$0xff]  ;;  %s10996_s29 = sld [smem:[#allocation37_spill]]  ;;  %s10999_s14 = sld [smem:[#allocation20_spill]] }
  0xb0   :  { %8851 = vmatprep.subr.bf16.mxu1 %v8850_v26  ;;  %v8862_v54 = vpack.c.bf16 %v629_v53, %v628_v52  ;;  %v7398_v55 = vld [vmem:[%s9588_s8] ss:$0 sm:$0xff]  ;;  %s10998_s8 = sld [smem:[#allocation38_spill]]  ;;  %s9538_s23 = smov 64  }
  0xb1   :  { %8853 = vmatpush3.bf16.msra.mxu1 %v8850_v26  ;;  %v810_v28 = vld [vmem:[%s10993_s9] sm:$0xff]  ;;  %s9539_s26 = smov 32   ;;  %s11010_s30 = sld [smem:[#allocation30_spill]] }
  0xb2   :  { %8036 = vmatmul.mubr.msk.f32.gmra.mrb[2].mxu0 %vm249_vm0, %v9805_v10  ;;  %8855 = vmatprep.subr.bf16.mxu1 %v8854_v29  ;;  %v9880_v23 = vld [vmem:[%s10992_s5 + $0x8] sm:$0xff]  ;;  %v9885_v24 = vld [vmem:[%s10992_s5 + $0x10] sm:$0xff]  ;;  %v9890_v26 = vld [vmem:[%s10992_s5 + $0x18] sm:$0xff]  ;;  %s11011_s28 = sld [smem:[#allocation29_spill]]  ;;  %s11012_s1 = sld [smem:[#allocation31_spill]] }
  0xb3   :  { %8038 = vmatprep.mubr.msk.f32.mxu0 %vm249_vm0, %v9808_v12  ;;  %v9895_v27 = vld [vmem:[%s10992_s5 + $0x20] sm:$0xff]  ;;  %v9902_v30 = vld [vmem:[%s10992_s5 + $0x28] sm:$0xff]  ;;  %s11013_s2 = sld [smem:[#allocation32_spill]]  ;;  %s11014_s12 = sld [smem:[#allocation33_spill]] }
  0xb4   :  { %s11015_s0 = sld [smem:[#allocation34_spill]]  ;;  %s11016_s7 = sld [smem:[#allocation35_spill]] }
  0xb5   :  { %8857 = vmatpush3.bf16.msra.mxu1 %v8854_v29  ;;  %v811_v29 = vld [vmem:[%s10993_s9 + $0x8] sm:$0xff]  ;;  %s11017_s10 = sld [smem:[#allocation36_spill]] }
  0xb6   :  { %8039 = vmatmul.mubr.msk.f32.gmra.mrb[4].mxu0 %vm249_vm0, %v9811_v13  ;;  %8859 = vmatprep.subr.bf16.mxu1 %v8858_v32  ;;  %v8866_v31 = vpack.c.bf16 %v811_v29, %v810_v28  ;;  %v797_v28 = vsub.f32 1.0, %v9811_v13 }
  0xb7   :  { %8045 = vmatprep.mubr.msk.f32.mxu0 %vm249_vm0, %v227_v14 }
  0xb8   :  { %8867 = vmatprep.subr.bf16.mxu0 %v8866_v31 }
  0xba   :  { %8046 = vmatmul.mubr.msk.f32.vlgmr.msra.gmra.mrb[0].mxu0 %vm249_vm0, %v228_v4 }
  0xbb   :  { %8048 = vmatprep.mubr.msk.f32.mxu0 %vm249_vm0, %v229_v16  ;;  %8869 = vmatpush3.bf16.msra.mxu0 %v8866_v31 }
  0xbe   :  { %8049 = vmatmul.mubr.msk.f32.gmra.mrb[2].mxu0 %vm249_vm0, %v230_v17 }
  0xbf   :  { %8051 = vmatprep.mubr.msk.f32.mxu0 %vm249_vm0, %v231_v18  ;;  %v944_v18 = vld [vmem:[%s9613_s6] sm:$0xf]  ;;  %s11001_s6 = sld [smem:[#allocation25_spill]] }
  0xc2   :  { %8052 = vmatmul.mubr.msk.f32.gmra.mrb[4].mxu0 %vm249_vm0, %v232_v22  ;;  %v9874_v22 = vld [vmem:[%s10992_s5] sm:$0xff] }
 0x18d   :  { %v8047_v34 = vpop.f32.mrb[0].mxu0 }
 0x18e   :  { %v484_v35 = vadd.f32 %v8047_v34, %v7397_v33  ;;  %v447_v36 = vpop.f32.mrb[1].mxu0 }
 0x18f   :  { %v483_v37 = vadd.f32 %v7397_v33, %v447_v36 }
 0x190   :  { %v490_v40 = vmax.f32 %v484_v35, 0.0 }
 0x191   :  { %v489_v38 = vmax.f32 %v483_v37, 0.0  ;;  %v8050_v39 = vpop.f32.mrb[2].mxu0 }
 0x192   :  { %v486_v41 = vadd.f32 %v8050_v39, %v7397_v33  ;;  %v457_v42 = vpop.f32.mrb[3].mxu0 }
 0x193   :  { %v485_v43 = vadd.f32 %v7397_v33, %v457_v42  ;;  %8062 = vmatprep.mubr.msk.f32.mxu1 %vm506_vm1, %v489_v38 }
 0x194   :  { %8063 = vmatmul.mubr.msk.f32.vlgmr.msra.gmra.mrb[0].mxu1 %vm506_vm1, %v490_v40  ;;  %v492_v46 = vmax.f32 %v486_v41, 0.0 }
 0x195   :  { %v491_v44 = vmax.f32 %v485_v43, 0.0  ;;  %v8053_v45 = vpop.f32.mrb[4].mxu0  ;;  %8861 = vmatpush3.bf16.msra.mxu1 %v8858_v32  ;;  %v9907_v32 = vld [vmem:[%s10994_s21] sm:$0xf] }
 0x196   :  { %v488_v47 = vadd.f32 %v8053_v45, %v7397_v33  ;;  %v467_v48 = vpop.f32.mrb[5].mxu0  ;;  %8863 = vmatprep.subr.bf16.mxu1 %v8862_v54  ;;  %8112 = vmatprep.subr.msk.mxu0 %vm971_vm2, %v9907_v32 }
 0x197   :  { %v487_v49 = vadd.f32 %v7397_v33, %v467_v48  ;;  %8065 = vmatprep.mubr.msk.f32.mxu1 %vm506_vm1, %v491_v44  ;;  %v7405_v33 = vld [vmem:[%s10995_s25] ss:$0 sm:$0xff] }
 0x198   :  { %8066 = vmatmul.mubr.msk.f32.gmra.mrb[2].mxu1 %vm506_vm1, %v492_v46  ;;  %v494_v51 = vmax.f32 %v488_v47, 0.0 }
 0x199   :  { %v493_v50 = vmax.f32 %v487_v49, 0.0  ;;  %8865 = vmatpush3.bf16.msra.mxu1 %v8862_v54 }
 0x19a   :  { %8101 = vmatprep.subr.msk.mxu1 %vm971_vm2, %v944_v18 }
 0x19b   :  { %8068 = vmatprep.mubr.msk.f32.mxu1 %vm506_vm1, %v493_v50 }
 0x19c   :  { %8069 = vmatmul.mubr.msk.f32.gmra.mrb[4].mxu1 %vm506_vm1, %v494_v51 }
 0x267   :  { %v8064_v56 = vpop.f32.mrb[0].mxu1 }
 0x268   :  { %v597_v57 = vadd.f32 %v8064_v56, %v7398_v55  ;;  %v591_v58 = vpop.f32.mrb[1].mxu1 }
 0x269   :  { %v592_v59 = vadd.f32 %v7398_v55, %v591_v58 }
 0x26a   :  { %v621_v62 = vmax.f32 %v597_v57, 0.0 }
 0x26b   :  { %v620_v60 = vmax.f32 %v592_v59, 0.0  ;;  %v8067_v61 = vpop.f32.mrb[2].mxu1 }
 0x26c   :  { %v607_v63 = vadd.f32 %v8067_v61, %v7398_v55  ;;  %v601_v0 = vpop.f32.mrb[3].mxu1 }
 0x26d   :  { %v602_v1 = vadd.f32 %v7398_v55, %v601_v0  ;;  %8079 = vmatprep.mubr.msk.f32.mxu1 %vm506_vm1, %v620_v60 }
 0x26e   :  { %8080 = vmatmul.mubr.msk.f32.vlgmr.msra.gmra.mrb[6].mxu1 %vm506_vm1, %v621_v62  ;;  %v623_v6 = vmax.f32 %v607_v63, 0.0  ;;  %v793_v63 = vsub.f32 1.0, %v9794_v5 }
 0x26f   :  { %v622_v3 = vmax.f32 %v602_v1, 0.0  ;;  %v8070_v4 = vpop.f32.mrb[4].mxu1  ;;  %8102 = vmatpush3.msk.msra.mxu1 %vm971_vm2, %v944_v18  ;;  %v792_v1 = vsub.f32 1.0, %v9788_v2  ;;  %v1083_v2 = vld [vmem:[%s10997_s3 + $0x8] sm:$0xff] }
 0x270   :  { %v617_v8 = vadd.f32 %v8070_v4, %v7398_v55  ;;  %v611_v11 = vpop.f32.mrb[5].mxu1 }
 0x271   :  { %v612_v14 = vadd.f32 %v7398_v55, %v611_v11  ;;  %8082 = vmatprep.mubr.msk.f32.mxu1 %vm506_vm1, %v622_v3  ;;  %v794_v11 = vsub.f32 1.0, %v9802_v9 }
 0x272   :  { %8083 = vmatmul.mubr.msk.f32.gmra.mrb[8].mxu1 %vm506_vm1, %v623_v6  ;;  %v625_v17 = vmax.f32 %v617_v8, 0.0  ;;  %v795_v6 = vsub.f32 1.0, %v9805_v10 }
 0x273   :  { %v624_v16 = vmax.f32 %v612_v14, 0.0  ;;  %v1082_v14 = vld [vmem:[%s10997_s3] sm:$0xff] }
 0x274   :  { %v8870_v29 = vpack.c.bf16 %v1083_v2, %v1082_v14 }
 0x275   :  { %8085 = vmatprep.mubr.msk.f32.mxu1 %vm506_vm1, %v624_v16 }
 0x276   :  { %8086 = vmatmul.mubr.msk.f32.gmra.mrb[10].mxu1 %vm506_vm1, %v625_v17 }
 0x277   :  { %8103 = vmatprep.mubr.msk.f32.mxu1 %vm952_vm3, %v9874_v22 }
 0x27a   :  { %8104 = vmatmul.mubr.msk.f32.vlgmr.msra.gmra.mrb[12].mxu1 %vm952_vm3, %v9880_v23 }
 0x27b   :  { %8106 = vmatprep.mubr.msk.f32.mxu1 %vm952_vm3, %v9885_v24 }
 0x27e   :  { %8107 = vmatmul.mubr.msk.f32.gmra.mrb[14].mxu1 %vm952_vm3, %v9890_v26 }
 0x27f   :  { %8109 = vmatprep.mubr.msk.f32.mxu1 %vm952_vm3, %v9895_v27 }
 0x282   :  { %8110 = vmatmul.mubr.msk.f32.gmra.mrb[16].mxu1 %vm952_vm3, %v9902_v30 }
 0x341   :  { %v8081_v34 = vpop.f32.mrb[6].mxu1 }
 0x342   :  { %v727_v35 = vadd.f32 %v8081_v34, %v7405_v33  ;;  %v721_v36 = vpop.f32.mrb[7].mxu1 }
 0x343   :  { %v722_v37 = vadd.f32 %v7405_v33, %v721_v36 }
 0x344   :  { %v7413_v38 = vmul.f32 -1.442695, %v727_v35  ;;  %v7425_v35 = vld [vmem:[#allocation2] ss:$0 sm:$0xff] }
 0x345   :  { %v7412_v39 = vmul.f32 -1.442695, %v722_v37  ;;  %v8084_v40 = vpop.f32.mrb[8].mxu1 }
 0x346   :  { %9301 = vpow2.f32 %v7413_v38  ;;  %v737_v41 = vadd.f32 %v8084_v40, %v7405_v33  ;;  %v731_v42 = vpop.f32.mrb[9].mxu1 }
 0x347   :  { %9303 = vpow2.f32 %v7412_v39  ;;  %v732_v43 = vadd.f32 %v7405_v33, %v731_v42 }
 0x348   :  { %v7415_v44 = vmul.f32 -1.442695, %v737_v41 }
 0x349   :  { %v7414_v45 = vmul.f32 -1.442695, %v732_v43  ;;  %v8087_v46 = vpop.f32.mrb[10].mxu1 }
 0x34a   :  { %9305 = vpow2.f32 %v7415_v44  ;;  %v747_v47 = vadd.f32 %v8087_v46, %v7405_v33  ;;  %v741_v48 = vpop.f32.mrb[11].mxu1 }
 0x34b   :  { %9307 = vpow2.f32 %v7414_v45  ;;  %v742_v49 = vadd.f32 %v7405_v33, %v741_v48 }
 0x34c   :  { %v7417_v50 = vmul.f32 -1.442695, %v747_v47 }
 0x34d   :  { %v7416_v51 = vmul.f32 -1.442695, %v742_v49  ;;  %v8105_v36 = vpop.f32.mrb[12].mxu1 }
 0x34e   :  { %9309 = vpow2.f32 %v7417_v50  ;;  %v1047_v37 = vadd.f32 %v8105_v36, %v7425_v35 }
 0x34f   :  { %9311 = vpow2.f32 %v7416_v51 }
 0x350   :  { %v9302_v52 = vpop.eup %9301  ;;  %v1071_v39 = vmax.f32 %v1047_v37, 0.0 }
 0x351   :  { %v9304_v53 = vpop.eup %9303  ;;  %v769_v54 = vadd.f32 1.0, %v9302_v52 }
 0x352   :  { %v768_v55 = vadd.f32 1.0, %v9304_v53  ;;  %v9983_v41 = vadd.f32 %v1071_v39, %v9880_v23 }
 0x353   :  { %9313 = vrcp.f32 %v769_v54 }
 0x354   :  { %v9306_v56 = vpop.eup %9305  ;;  %9315 = vrcp.f32 %v768_v55  ;;  %v1333_v55 = vld [vmem:[%s10999_s14] sm:$0xff] }
 0x355   :  { %v9308_v57 = vpop.eup %9307  ;;  %v771_v58 = vadd.f32 1.0, %v9306_v56  ;;  %v1334_v56 = vld [vmem:[%s10999_s14 + $0x8] sm:$0xff] }
 0x356   :  { %v770_v59 = vadd.f32 1.0, %v9308_v57  ;;  %v8874_v57 = vpack.c.bf16 %v1334_v56, %v1333_v55  ;;  %v1466_v55 = vld [vmem:[%s11002_s27 + $0x18] sm:$0xff] }
 0x357   :  { %9317 = vrcp.f32 %v771_v58 }
 0x358   :  { %v9310_v60 = vpop.eup %9309  ;;  %9319 = vrcp.f32 %v770_v59  ;;  %8875 = vmatprep.subr.bf16.mxu1 %v8874_v57 }
 0x359   :  { %v9312_v61 = vpop.eup %9311  ;;  %v773_v62 = vadd.f32 1.0, %v9310_v60  ;;  %8877 = vmatpush3.bf16.msra.mxu1 %v8874_v57  ;;  %v9535_v57 = vmov 0.0|0.0  }
 0x35a   :  { %v772_v0 = vadd.f32 1.0, %v9312_v61 }
 0x35b   :  { %9321 = vrcp.f32 %v773_v62 }
 0x35c   :  { %9323 = vrcp.f32 %v772_v0 }
 0x35d   :  { %v9314_v3 = vpop.eup %9313 }
 0x35e   :  { %v9316_v4 = vpop.eup %9315  ;;  %v799_v8 = vmul.f32 %v9314_v3, %v793_v63  ;;  %1588 = vst.msk [vmem:[%s10996_s29 + $0x8] sm:$0xff] %vm249_vm0, %v9314_v3 }
 0x35f   :  { %1587 = vst.msk [vmem:[%s10996_s29] sm:$0xff] %vm249_vm0, %v9316_v4  ;;  %v798_v5 = vmul.f32 %v9316_v4, %v792_v1 }
 0x360   :  { %v9923_v16 = vadd.f32 %v799_v8, %v9798_v7  ;;  %v796_v7 = vsub.f32 1.0, %v9808_v12 }
 0x361   :  { %v9318_v17 = vpop.eup %9317  ;;  %v9926_v18 = vadd.f32 %v798_v5, %v9815_v15 }
 0x362   :  { %v9320_v10 = vpop.eup %9319  ;;  %1590 = vst.msk [vmem:[%s10996_s29 + $0x18] sm:$0xff] %vm249_vm0, %v9318_v17  ;;  %1594 = vst.msk [vmem:[%s10998_s8 + $0x8] sm:$0xff] %vm249_vm0, %v9923_v16  ;;  %v801_v9 = vmul.f32 %v9318_v17, %v795_v6 }
 0x363   :  { %1589 = vst.msk [vmem:[%s10996_s29 + $0x10] sm:$0xff] %vm249_vm0, %v9320_v10  ;;  %8092 = vmatprep.mubr.msk.f32.mxu0 %vm249_vm0, %v9926_v18  ;;  %1593 = vst.msk [vmem:[%s10998_s8] sm:$0xff] %vm249_vm0, %v9926_v18  ;;  %v800_v13 = vmul.f32 %v9320_v10, %v794_v11  ;;  %v1616_v11 = vld [vmem:[%s11001_s6] sm:$0xf] }
 0x364   :  { %8093 = vmatmul.mubr.msk.f32.vlgmr.msra.gmra.mrb[6].mxu0 %vm249_vm0, %v9923_v16  ;;  %v9945_v15 = vadd.f32 %v801_v9, %v9824_v20 }
 0x365   :  { %v9322_v31 = vpop.eup %9321  ;;  %v9948_v12 = vadd.f32 %v800_v13, %v9821_v19  ;;  %8113 = vmatpush3.msk.msra.mxu0 %vm971_vm2, %v9907_v32  ;;  %v1335_v13 = vld [vmem:[%s10999_s14 + $0x10] sm:$0xff] }
 0x366   :  { %v9324_v33 = vpop.eup %9323  ;;  %1592 = vst.msk [vmem:[%s10996_s29 + $0x28] sm:$0xff] %vm249_vm0, %v9322_v31  ;;  %1596 = vst.msk [vmem:[%s10998_s8 + $0x18] sm:$0xff] %vm249_vm0, %v9945_v15  ;;  %v803_v34 = vmul.f32 %v9322_v31, %v797_v28  ;;  %8871 = vmatprep.subr.bf16.mxu0 %v8870_v29 }
 0x367   :  { %1591 = vst.msk [vmem:[%s10996_s29 + $0x20] sm:$0xff] %vm249_vm0, %v9324_v33  ;;  %8095 = vmatprep.mubr.msk.f32.mxu0 %vm249_vm0, %v9948_v12  ;;  %1595 = vst.msk [vmem:[%s10998_s8 + $0x10] sm:$0xff] %vm249_vm0, %v9948_v12  ;;  %v802_v19 = vmul.f32 %v9324_v33, %v796_v7  ;;  %v1464_v33 = vld [vmem:[%s11002_s27 + $0x8] sm:$0xff] }
 0x368   :  { %8096 = vmatmul.mubr.msk.f32.gmra.mrb[8].mxu0 %vm249_vm0, %v9945_v15  ;;  %v9967_v20 = vadd.f32 %v803_v34, %v9833_v25  ;;  %v1041_v25 = vpop.f32.mrb[13].mxu1 }
 0x369   :  { %v9970_v32 = vadd.f32 %v802_v19, %v9827_v21  ;;  %v1042_v38 = vadd.f32 %v7425_v35, %v1041_v25  ;;  %v8108_v40 = vpop.f32.mrb[14].mxu1  ;;  %v7446_v19 = vld [vmem:[#allocation4] ss:$0 sm:$0xff] }
 0x36a   :  { %1598 = vst.msk [vmem:[%s10998_s8 + $0x28] sm:$0xff] %vm249_vm0, %v9967_v20  ;;  %v1057_v42 = vadd.f32 %v8108_v40, %v7425_v35  ;;  %v1051_v43 = vpop.f32.mrb[15].mxu1 }
 0x36b   :  { %8098 = vmatprep.mubr.msk.f32.mxu0 %vm249_vm0, %v9970_v32  ;;  %1597 = vst.msk [vmem:[%s10998_s8 + $0x20] sm:$0xff] %vm249_vm0, %v9970_v32  ;;  %v1070_v21 = vmax.f32 %v1042_v38, 0.0  ;;  %v1052_v45 = vadd.f32 %v7425_v35, %v1051_v43  ;;  %v8111_v48 = vpop.f32.mrb[16].mxu1 }
 0x36c   :  { %8099 = vmatmul.mubr.msk.f32.gmra.mrb[10].mxu0 %vm249_vm0, %v9967_v20  ;;  %v1073_v46 = vmax.f32 %v1057_v42, 0.0  ;;  %v1067_v50 = vadd.f32 %v8111_v48, %v7425_v35  ;;  %v1061_v51 = vpop.f32.mrb[17].mxu1 }
 0x36d   :  { %v9986_v44 = vadd.f32 %v1070_v21, %v9874_v22  ;;  %v1072_v47 = vmax.f32 %v1052_v45, 0.0  ;;  %v1062_v23 = vadd.f32 %v7425_v35, %v1061_v51 }
 0x36e   :  { %v9991_v49 = vadd.f32 %v1073_v46, %v9890_v26  ;;  %v1075_v52 = vmax.f32 %v1067_v50, 0.0 }
 0x36f   :  { %8114 = vmatprep.mubr.msk.f32.mxu0 %vm952_vm3, %v9986_v44  ;;  %v9996_v22 = vadd.f32 %v1072_v47, %v9885_v24  ;;  %v1074_v53 = vmax.f32 %v1062_v23, 0.0  ;;  %v9533_v24 = vmov 0.0  }
 0x370   :  { %8115 = vmatmul.mubr.msk.f32.vlgmr.msra.gmra.mrb[12].mxu0 %vm952_vm3, %v9983_v41  ;;  %v10001_v26 = vadd.f32 %v1075_v52, %v9902_v30  ;;  %v7418_v30 = vld [vmem:[%s11000_s19] ss:$0 sm:$0xff] }
 0x371   :  { %8873 = vmatpush3.bf16.msra.mxu0 %v8870_v29  ;;  %8117 = vmatprep.mubr.msk.f32.mxu0 %vm952_vm3, %v9996_v22  ;;  %v10006_v54 = vadd.f32 %v1074_v53, %v9895_v27  ;;  %v1465_v53 = vld [vmem:[%s11002_s27 + $0x10] sm:$0xff] }
 0x372   :  { %8170 = vmatprep.subr.mxu0 %v9533_v24  ;;  %v8886_v56 = vpack.c.bf16 %v1466_v55, %v1465_v53  ;;  %v9536_v55 = vmov 0.5  }
 0x374   :  { %8118 = vmatmul.mubr.msk.f32.gmra.mrb[14].mxu0 %vm952_vm3, %v9991_v49 }
 0x375   :  { %8120 = vmatprep.mubr.msk.f32.mxu0 %vm952_vm3, %v10006_v54 }
 0x378   :  { %8121 = vmatmul.mubr.msk.f32.gmra.mrb[16].mxu0 %vm952_vm3, %v10001_v26 }
 0x437   :  { %v8094_v58 = vpop.f32.mrb[6].mxu0 }
 0x438   :  { %v909_v59 = vadd.f32 %v8094_v58, %v7418_v30  ;;  %v903_v27 = vpop.f32.mrb[7].mxu0  ;;  %v1764_v58 = vld [vmem:[%s11003_s11 + $0x8] sm:$0xff] }
 0x439   :  { %v904_v60 = vadd.f32 %v7418_v30, %v903_v27  ;;  %v7447_v27 = vld [vmem:[%s11004_s15] ss:$0 sm:$0xff] }
 0x43a   :  { %v933_v61 = vmax.f32 %v909_v59, 0.0 }
 0x43b   :  { %v932_v62 = vmax.f32 %v904_v60, 0.0  ;;  %v8097_v63 = vpop.f32.mrb[8].mxu0 }
 0x43c   :  { %v919_v0 = vadd.f32 %v8097_v63, %v7418_v30  ;;  %v913_v1 = vpop.f32.mrb[9].mxu0  ;;  %v939_v6 = vadd.f32 %v933_v61, %v9923_v16  ;;  %v1612_v63 = vld [vmem:[%s11005_s4] sm:$0xff] }
 0x43d   :  { %v938_v3 = vadd.f32 %v932_v62, %v9926_v18  ;;  %v914_v4 = vadd.f32 %v7418_v30, %v913_v1 }
 0x43e   :  { %v935_v8 = vmax.f32 %v919_v0, 0.0  ;;  %v1613_v0 = vld [vmem:[%s11005_s4 + $0x8] sm:$0xff] }
 0x43f   :  { %v934_v5 = vmax.f32 %v914_v4, 0.0  ;;  %v8100_v14 = vpop.f32.mrb[10].mxu0  ;;  %8127 = vmatprep.mubr.msk.f32.mxu0 %vm249_vm0, %v938_v3 }
 0x440   :  { %v929_v2 = vadd.f32 %v8100_v14, %v7418_v30  ;;  %v923_v17 = vpop.f32.mrb[11].mxu0  ;;  %8128 = vmatmul.mubr.msk.f32.vlgmr.msra.gmra.mrb[12].mxu0 %vm249_vm0, %v939_v6  ;;  %v941_v18 = vadd.f32 %v935_v8, %v9945_v15  ;;  %v1336_v15 = vld [vmem:[%s10999_s14 + $0x18] sm:$0xff]  ;;  %v10061_v6 = vpack.c.bf16 %v1613_v0, %v1612_v63  ;;  %v1614_v14 = vld [vmem:[%s11005_s4 + $0x10] sm:$0xff] }
 0x441   :  { %v940_v10 = vadd.f32 %v934_v5, %v9948_v12  ;;  %v924_v28 = vadd.f32 %v7418_v30, %v923_v17  ;;  %8171 = vmatpush3.msk.msra.mxu0 %vm971_vm2, %v1616_v11  ;;  %v8878_v31 = vpack.c.bf16 %v1336_v15, %v1335_v13  ;;  %v1463_v12 = vld [vmem:[%s11002_s27] sm:$0xff] }
 0x442   :  { %v937_v16 = vmax.f32 %v929_v2, 0.0  ;;  %v8882_v34 = vpack.c.bf16 %v1464_v33, %v1463_v12  ;;  %8896 = vmatprep.subr.bf16.mxu0 %v9535_v57  ;;  %v1763_v30 = vld [vmem:[%s11003_s11] sm:$0xff]  ;;  %v1615_v2 = vld [vmem:[%s11005_s4 + $0x18] sm:$0xff] }
 0x443   :  { %v936_v9 = vmax.f32 %v924_v28, 0.0  ;;  %8130 = vmatprep.mubr.msk.f32.mxu0 %vm249_vm0, %v940_v10  ;;  %8879 = vmatprep.subr.bf16.mxu1 %v8878_v31  ;;  %v10054_v59 = vpack.c.bf16 %v1764_v58, %v1763_v30  ;;  %v1766_v12 = vld [vmem:[%s11003_s11 + $0x18] sm:$0xff] }
 0x444   :  { %8131 = vmatmul.mubr.msk.f32.gmra.mrb[14].mxu0 %vm249_vm0, %v941_v18  ;;  %v943_v7 = vadd.f32 %v937_v16, %v9967_v20  ;;  %8881 = vmatpush3.bf16.msra.mxu1 %v8878_v31  ;;  %v10068_v18 = vpack.c.bf16 %v1615_v2, %v1614_v14  ;;  %v1765_v31 = vld [vmem:[%s11003_s11 + $0x10] sm:$0xff] }
 0x445   :  { %v942_v29 = vadd.f32 %v936_v9, %v9970_v32  ;;  %8883 = vmatprep.subr.bf16.mxu1 %v8882_v34  ;;  %v10081_v33 = vpack.c.bf16 %v1766_v12, %v1765_v31  ;;  %v1872_v14 = vld [vmem:[%s11009_s22 + $0x10] sm:$0xff] }
 0x446   :  { %v7469_v12 = vld [vmem:[%s11009_s22 + $0x30] sm:$0xff] }
 0x447   :  { %8133 = vmatprep.mubr.msk.f32.mxu0 %vm249_vm0, %v942_v29 }
 0x448   :  { %8134 = vmatmul.mubr.msk.f32.gmra.mrb[16].mxu0 %vm249_vm0, %v943_v7 }
 0x449   :  { %8172 = vmatprep.mubr.msk.f32.mxu0 %vm9534_vm4, %v9533_v24 }
 0x44c   :  { %8173 = vmatmul.mubr.msk.f32.vlgmr.msra.gmra.mrb[18].mxu0 %vm952_vm3, %v9986_v44 }
 0x44d   :  { %8194 = vmatprep.mubr.msk.f32.mxu0 %vm9534_vm4, %v9533_v24  ;;  %8898 = vmatpush3.bf16.msra.mxu0 %v10054_v59 }
 0x44e   :  { %8899 = vmatprep.subr.bf16.mxu0 %v9535_v57 }
 0x451   :  { %8901 = vmatpush3.bf16.msra.mxu0 %v10081_v33 }
 0x452   :  { %8908 = vmatprep.subr.bf16.mxu0 %v9535_v57 }
 0x454   :  { %8195 = vmatmul.mubr.f32.vlgmr.msra.gmra.mrb[20].mxu0 %v9533_v24 }
 0x455   :  { %8216 = vmatprep.mubr.msk.f32.mxu0 %vm9534_vm4, %v9533_v24 }
 0x513   :  { %v8129_v20 = vpop.f32.mrb[12].mxu0 }
 0x514   :  { %v1322_v32 = vadd.f32 %v8129_v20, %v7446_v19  ;;  %v1285_v35 = vpop.f32.mrb[13].mxu0 }
 0x515   :  { %v1321_v36 = vadd.f32 %v7446_v19, %v1285_v35 }
 0x516   :  { %v1328_v38 = vmax.f32 %v1322_v32, 0.0 }
 0x517   :  { %v1327_v37 = vmax.f32 %v1321_v36, 0.0  ;;  %v8132_v25 = vpop.f32.mrb[14].mxu0 }
 0x518   :  { %v1324_v39 = vadd.f32 %v8132_v25, %v7446_v19  ;;  %v1295_v21 = vpop.f32.mrb[15].mxu0 }
 0x519   :  { %v1323_v40 = vadd.f32 %v7446_v19, %v1295_v21  ;;  %8144 = vmatprep.mubr.msk.f32.mxu1 %vm506_vm1, %v1327_v37 }
 0x51a   :  { %8145 = vmatmul.mubr.msk.f32.vlgmr.msra.gmra.mrb[18].mxu1 %vm506_vm1, %v1328_v38  ;;  %v1330_v45 = vmax.f32 %v1324_v39, 0.0 }
 0x51b   :  { %v1329_v42 = vmax.f32 %v1323_v40, 0.0  ;;  %v8135_v43 = vpop.f32.mrb[16].mxu0  ;;  %8885 = vmatpush3.bf16.msra.mxu1 %v8882_v34  ;;  %v7454_v34 = vld [vmem:[%s11006_s16] ss:$0 sm:$0xff] }
 0x51c   :  { %v1326_v46 = vadd.f32 %v8135_v43, %v7446_v19  ;;  %v1305_v47 = vpop.f32.mrb[17].mxu0  ;;  %8887 = vmatprep.subr.bf16.mxu1 %v8886_v56 }
 0x51d   :  { %v1325_v48 = vadd.f32 %v7446_v19, %v1305_v47  ;;  %8147 = vmatprep.mubr.msk.f32.mxu1 %vm506_vm1, %v1329_v42 }
 0x51e   :  { %8148 = vmatmul.mubr.msk.f32.gmra.mrb[20].mxu1 %vm506_vm1, %v1330_v45  ;;  %v1332_v23 = vmax.f32 %v1326_v46, 0.0  ;;  %v1605_v46 = vlaneseq }
 0x51f   :  { %v1331_v50 = vmax.f32 %v1325_v48, 0.0  ;;  %v10044_v51 = vpop.f32.mrb[18].mxu0  ;;  %8889 = vmatpush3.bf16.msra.mxu1 %v8886_v56 }
 0x520   :  { %v8174_v52 = vpop.f32.mrb[19].mxu0  ;;  %8890 = vmatprep.subr.bf16.mxu1 %v9535_v57  ;;  %v1606_v47 = vand.u32 127, %v1605_v46 }
 0x521   :  { %8150 = vmatprep.mubr.msk.f32.mxu1 %vm506_vm1, %v1331_v50  ;;  %v10125_v52 = vld [vmem:[%s11007_s18] ss:$0 sm:$0xff] }
 0x522   :  { %8151 = vmatmul.mubr.msk.f32.gmra.mrb[22].mxu1 %vm506_vm1, %v1332_v23  ;;  %vm1607_vm5 = vcmp.ge.s32.totalorder %v1606_v47, 64  ;;  %vm1608_vm6 = vcmp.lt.s32.totalorder %v1606_v47, 96 }
 0x523   :  { %vm1609_vm7 = vmand %vm1607_vm5, %vm1608_vm6 }
 0x524   :  { %v10127_v56 = vsel %vm1609_vm7, 1.0, %v9536_v55 }
 0x527   :  { %v1836_v43 = vpop.f32.mrb[20].mxu0 }
 0x528   :  { %v8196_v45 = vpop.f32.mrb[21].mxu0 }
 0x5ed   :  { %v8146_v60 = vpop.f32.mrb[18].mxu1 }
 0x5ee   :  { %v1434_v61 = vadd.f32 %v8146_v60, %v7447_v27  ;;  %v1428_v62 = vpop.f32.mrb[19].mxu1 }
 0x5ef   :  { %v1429_v1 = vadd.f32 %v7447_v27, %v1428_v62 }
 0x5f0   :  { %v1458_v8 = vmax.f32 %v1434_v61, 0.0 }
 0x5f1   :  { %v1457_v3 = vmax.f32 %v1429_v1, 0.0  ;;  %v8149_v4 = vpop.f32.mrb[20].mxu1 }
 0x5f2   :  { %v1444_v11 = vadd.f32 %v8149_v4, %v7447_v27  ;;  %v1438_v5 = vpop.f32.mrb[21].mxu1 }
 0x5f3   :  { %v1439_v17 = vadd.f32 %v7447_v27, %v1438_v5  ;;  %8161 = vmatprep.mubr.msk.f32.mxu1 %vm506_vm1, %v1457_v3  ;;  %v1871_v5 = vld [vmem:[%s11009_s22 + $0x8] sm:$0xff] }
 0x5f4   :  { %8162 = vmatmul.mubr.msk.f32.vlgmr.msra.gmra.mrb[24].mxu1 %vm506_vm1, %v1458_v8  ;;  %v1460_v16 = vmax.f32 %v1444_v11, 0.0  ;;  %v1870_v11 = vld [vmem:[%s11009_s22] sm:$0xff] }
 0x5f5   :  { %v1459_v10 = vmax.f32 %v1439_v17, 0.0  ;;  %v8152_v28 = vpop.f32.mrb[22].mxu1  ;;  %8892 = vmatpush3.bf16.msra.mxu1 %v10061_v6  ;;  %v10144_v2 = vpack.c.bf16 %v1871_v5, %v1870_v11  ;;  %v1873_v17 = vld [vmem:[%s11009_s22 + $0x18] sm:$0xff] }
 0x5f6   :  { %v1454_v9 = vadd.f32 %v8152_v28, %v7447_v27  ;;  %v1448_v29 = vpop.f32.mrb[23].mxu1  ;;  %8893 = vmatprep.subr.bf16.mxu1 %v9535_v57 }
 0x5f7   :  { %v1449_v7 = vadd.f32 %v7447_v27, %v1448_v29  ;;  %8164 = vmatprep.mubr.msk.f32.mxu1 %vm506_vm1, %v1459_v10  ;;  %v9537_v27 = vmov 0   ;;  %v10148_v10 = vpack.c.bf16 %v1873_v17, %v1872_v14 }
 0x5f8   :  { %8165 = vmatmul.mubr.msk.f32.gmra.mrb[26].mxu1 %vm506_vm1, %v1460_v16  ;;  %v1462_v15 = vmax.f32 %v1454_v9, 0.0  ;;  %9299 = vset.pattern.permute.xlu0 %v9537_v27  ;;  %v7467_v16 = vld [vmem:[%s11009_s22 + $0x20] sm:$0xff]  ;;  %v7468_v9 = vld [vmem:[%s11009_s22 + $0x28] sm:$0xff] }
 0x5f9   :  { %v1461_v13 = vmax.f32 %v1449_v7, 0.0  ;;  %8895 = vmatpush3.bf16.msra.mxu1 %v10068_v18  ;;  %9300 = vset.pattern.permute.xlu1 %v9537_v27  ;;  %v10156_v29 = vpack.c.bf16 %v7468_v9, %v7467_v16 }
 0x5fa   :  { %8902 = vmatprep.subr.bf16.mxu1 %v9535_v57 }
 0x5fb   :  { %8167 = vmatprep.mubr.msk.f32.mxu1 %vm506_vm1, %v1461_v13  ;;  %8910 = vmatpush3.bf16.msra.mxu0 %v10156_v29 }
 0x5fc   :  { %8168 = vmatmul.mubr.msk.f32.gmra.mrb[28].mxu1 %vm506_vm1, %v1462_v15  ;;  %8911 = vmatprep.subr.bf16.mxu0 %v9535_v57 }
 0x5fd   :  { %8183 = vmatprep.mubr.msk.f32.mxu1 %vm9534_vm4, %v9533_v24 }
 0x6c7   :  { %v8163_v19 = vpop.f32.mrb[24].mxu1 }
 0x6c8   :  { %v10089_v20 = vadd.f32 %v8163_v19, %v7454_v34  ;;  %v1558_v32 = vpop.f32.mrb[25].mxu1 }
 0x6c9   :  { %v10091_v35 = vadd.f32 %v7454_v34, %v1558_v32  ;;  %v2044_v32 = vld [vmem:[%s11010_s30] sm:$0xff] }
 0x6ca   :  { %1600 = vst.msk [vmem:[%s9748_s20 + $0x8] sm:$0xff] %vm506_vm1, %v10089_v20 }
 0x6cb   :  { %1599 = vst.msk [vmem:[%s9748_s20] sm:$0xff] %vm506_vm1, %v10091_v35  ;;  %v8166_v36 = vpop.f32.mrb[26].mxu1  ;;  %8184 = vmatmul.mubr.msk.f32.vlgmr.msra.gmra.mrb[30].mxu1 %vm506_vm1, %v10091_v35 }
 0x6cc   :  { %v10101_v37 = vadd.f32 %v8166_v36, %v7454_v34  ;;  %v1568_v25 = vpop.f32.mrb[27].mxu1  ;;  %8205 = vmatprep.mubr.msk.f32.mxu1 %vm9534_vm4, %v9533_v24  ;;  %8904 = vmatpush3.bf16.msra.mxu1 %v10144_v2  ;;  %v2045_v36 = vld [vmem:[%s11010_s30 + $0x8] sm:$0xff] }
 0x6cd   :  { %v10105_v38 = vadd.f32 %v7454_v34, %v1568_v25  ;;  %8905 = vmatprep.subr.bf16.mxu1 %v9535_v57  ;;  %v10175_v25 = vpack.c.bf16 %v2045_v36, %v2044_v32 }
 0x6ce   :  { %1602 = vst.msk [vmem:[%s9748_s20 + $0x18] sm:$0xff] %vm506_vm1, %v10101_v37 }
 0x6cf   :  { %1601 = vst.msk [vmem:[%s9748_s20 + $0x10] sm:$0xff] %vm506_vm1, %v10105_v38  ;;  %v8169_v39 = vpop.f32.mrb[28].mxu1 }
 0x6d0   :  { %v10113_v21 = vadd.f32 %v8169_v39, %v7454_v34  ;;  %v1578_v40 = vpop.f32.mrb[29].mxu1  ;;  %8907 = vmatpush3.bf16.msra.mxu1 %v10148_v10  ;;  %v10180_v39 = vld [vmem:[%s11011_s28] ss:$0 sm:$0xff] }
 0x6d1   :  { %v10115_v42 = vadd.f32 %v7454_v34, %v1578_v40  ;;  %8914 = vmatprep.subr.bf16.mxu1 %v9535_v57  ;;  %v7470_v34 = vld [vmem:[%s11009_s22 + $0x38] sm:$0xff]  ;;  %v2128_v40 = vld [vmem:[%s11012_s1] sm:$0xff] }
 0x6d2   :  { %1604 = vst.msk [vmem:[%s9748_s20 + $0x28] sm:$0xff] %vm506_vm1, %v10113_v21  ;;  %v10169_v19 = vpack.c.bf16 %v7470_v34, %v7469_v12 }
 0x6d3   :  { %1603 = vst.msk [vmem:[%s9748_s20 + $0x20] sm:$0xff] %vm506_vm1, %v10115_v42  ;;  %s11008_s20 = sld [smem:[#allocation14_spill]] }
 0x6d4   :  { %8913 = vmatpush3.bf16.msra.mxu0 %v10169_v19 }
 0x6d5   :  { %8920 = vmatprep.subr.bf16.mxu0 %v9535_v57 }
 0x6d9   :  { %v7478_v1 = vld [vmem:[%s11008_s20 + $0x8] sm:$0xff] }
 0x6da   :  { %v2221_v15 = vsub.f32 1.0, %v7478_v1 }
 0x79e   :  { %v1759_v48 = vpop.f32.mrb[30].mxu1 }
 0x79f   :  { %v1760_v50 = vadd.f32 %v1759_v48, %v10044_v51  ;;  %v8185_v23 = vpop.f32.mrb[31].mxu1  ;;  %v10131_v51 = vsel %vm1609_vm7, 0.0, %v9536_v55  ;;  %v2130_v55 = vld [vmem:[%s11012_s1 + $0x10] sm:$0xff] }
 0x7a0   :  { %v2046_v23 = vld [vmem:[%s11010_s30 + $0x10] sm:$0xff] }
 0x7a1   :  { %v1840_v53 = vadd.f32 %v1836_v43, %v1760_v50  ;;  %v2129_v43 = vld [vmem:[%s11012_s1 + $0x8] sm:$0xff] }
 0x7a2   :  { %v10185_v48 = vpack.c.bf16 %v2129_v43, %v2128_v40 }
 0x7a3   :  { %v1848_v30 = vadd.f32 %v10125_v52, %v1840_v53  ;;  %v2047_v53 = vld [vmem:[%s11010_s30 + $0x18] sm:$0xff] }
 0x7a5   :  { %v1849_v58 = vmul.f32 %v1848_v30, %v10127_v56  ;;  %v10195_v30 = vpack.c.bf16 %v2047_v53, %v2046_v23 }
 0x7a7   :  { %9325 = vtanh.f32 %v1849_v58  ;;  %v2131_v58 = vld [vmem:[%s11012_s1 + $0x18] sm:$0xff] }
 0x7a8   :  { %v10198_v27 = vpack.c.bf16 %v2131_v58, %v2130_v55 }
 0x7b1   :  { %v9326_v60 = vpop.eup %9325 }
 0x7b2   :  { %v1851_v61 = vmul.f32 %v9326_v60, %v10127_v56  ;;  %v10205_v60 = vld [vmem:[%s11011_s28 + $0x1] ss:$0 sm:$0xff] }
 0x7b4   :  { %v1852_v62 = vadd.f32 %v1851_v61, %v10131_v51 }
 0x7b6   :  { %1855 = vrot.lane.b32.xlu0 %v1852_v62, %s9538_s23  ;;  %v1853_v3 = vmul.f32 0.0, %v1852_v62 }
 0x828   :  { %v1856_v63 = vpop.permute.xlu0 %1855 }
 0x829   :  { %v1858_v0 = vmul.f32 %v1856_v63, %v1852_v62 }
 0x82b   :  { %1860 = vrot.lane.b32.xlu0 %v1858_v0, %s9539_s26 }
 0x82f   :  { %2217 = vperm.xlu0 %9299, %v7478_v1   ;;  %v2236_v1 = vld [vmem:[%s11001_s6] sm:$0xf] }
 0x89d   :  { %v1861_v4 = vpop.permute.xlu0 %1860 }
 0x89e   :  { %v10138_v8 = vadd.f32 %v1861_v4, %v1853_v3  ;;  %v10222_v3 = vld [vmem:[%s11013_s2] ss:$0 sm:$0xff] }
 0x89f   :  { %v10225_v4 = vld [vmem:[%s11014_s12] ss:$0 sm:$0xff] }
 0x8a0   :  { %9327 = vtanh.f32 %v10138_v8 }
 0x8aa   :  { %v9328_v28 = vpop.eup %9327 }
 0x8ab   :  { %1866 = vrot.lane.b32.xlu1 %v9328_v28, %s9538_s23 }
 0x8ae   :  { %v2218_v9 = vpop.permute.xlu0 %2217 }
 0x8af   :  { %v2220_v12 = vmul.f32 %v2218_v9, %v10089_v20  ;;  %v2229_v34 = vmul.f32 %v2218_v9, %v9983_v41 }
 0x91d   :  { %v1867_v7 = vpop.permute.xlu1 %1866 }
 0x91e   :  { %v1869_v13 = vmul.f32 %v1867_v7, %v1852_v62 }
 0x920   :  { %1882 = vrot.lane.b32.xlu1 %v1869_v13, %s9539_s26 }
 0x924   :  { %2224 = vperm.xlu1 %9300, %v2221_v15  }
 0x992   :  { %v10161_v31 = vpop.permute.xlu1 %1882 }
 0x993   :  { %8206 = vmatmul.mubr.msk.f32.vlgmr.msra.gmra.mrb[32].mxu1 %vm506_vm1, %v10161_v31 }
 0x994   :  { %8227 = vmatprep.mubr.msk.f32.mxu1 %vm9534_vm4, %v9533_v24  ;;  %8916 = vmatpush3.bf16.msra.mxu1 %v10175_v25 }
 0x995   :  { %8917 = vmatprep.subr.bf16.mxu1 %v9535_v57 }
 0x998   :  { %8919 = vmatpush3.bf16.msra.mxu1 %v10195_v30 }
 0x999   :  { %8241 = vmatprep.subr.mxu1 %v9533_v24 }
 0x9a3   :  { %v2225_v7 = vpop.permute.xlu1 %2224 }
 0xa66   :  { %v1952_v45 = vpop.f32.mrb[32].mxu1 }
 0xa67   :  { %v1953_v46 = vadd.f32 %v10180_v39, %v1952_v45  ;;  %v8207_v47 = vpop.f32.mrb[33].mxu1 }
 0xa69   :  { %v1956_v50 = vmax.f32 %v1953_v46, 0.0 }
 0xa6b   :  { %8217 = vmatmul.mubr.msk.f32.vlgmr.msra.gmra.mrb[22].mxu0 %vm506_vm1, %v1956_v50 }
 0xa6c   :  { %8922 = vmatpush3.bf16.msra.mxu0 %v10185_v48  ;;  %8238 = vmatprep.mubr.msk.f32.mxu0 %vm9534_vm4, %v9533_v24 }
 0xa6d   :  { %8923 = vmatprep.subr.bf16.mxu0 %v9535_v57 }
 0xa70   :  { %8925 = vmatpush3.bf16.msra.mxu0 %v10198_v27 }
 0xa71   :  { %8926 = vmatprep.subr.bf16.mxu0 %v9535_v57 }
 0xb3e   :  { %v2039_v61 = vpop.f32.mrb[22].mxu0 }
 0xb3f   :  { %v2040_v62 = vadd.f32 %v10205_v60, %v2039_v61  ;;  %v8218_v63 = vpop.f32.mrb[23].mxu0 }
 0xb41   :  { %v2043_v0 = vmax.f32 %v2040_v62, 0.0 }
 0xb43   :  { %8228 = vmatmul.mubr.msk.f32.vlgmr.msra.gmra.mrb[34].mxu1 %vm506_vm1, %v2043_v0  ;;  %8239 = vmatmul.mubr.msk.f32.vlgmr.msra.gmra.mrb[24].mxu0 %vm506_vm1, %v2043_v0 }
 0xb44   :  { %8928 = vmatpush3.bf16.msra.mxu0 %v10061_v6  ;;  %8243 = vmatprep.mubr.msk.f32.mxu1 %vm9534_vm4, %v9533_v24 }
 0xb45   :  { %8929 = vmatprep.subr.bf16.mxu0 %v9535_v57  ;;  %8254 = vmatprep.mubr.msk.f32.mxu0 %vm9534_vm4, %v9533_v24 }
 0xb46   :  { %8242 = vmatpush3.msk.msra.mxu1 %vm971_vm2, %v2236_v1 }
 0xb47   :  { %8932 = vmatprep.subr.bf16.mxu1 %v9535_v57 }
 0xb48   :  { %8931 = vmatpush3.bf16.msra.mxu0 %v10068_v18 }
 0xb49   :  { %8938 = vmatprep.subr.bf16.mxu0 %v9535_v57 }
 0xc16   :  { %v2124_v11 = vpop.f32.mrb[34].mxu1  ;;  %v2205_v5 = vpop.f32.mrb[24].mxu0 }
 0xc17   :  { %v2125_v14 = vadd.f32 %v10222_v3, %v2124_v11  ;;  %v2206_v17 = vadd.f32 %v10225_v4, %v2205_v5  ;;  %v8229_v28 = vpop.f32.mrb[35].mxu1  ;;  %v8240_v16 = vpop.f32.mrb[25].mxu0  ;;  %v7499_v5 = vld [vmem:[%s11008_s20 + $0x10] sm:$0xff] }
 0xc18   :  { %v2841_v28 = vsub.f32 1.0, %v7499_v5 }
 0xc19   :  { %v2209_v13 = vadd.f32 %v2125_v14, %v10091_v35  ;;  %v2210_v15 = vadd.f32 %v2206_v17, %v9986_v44 }
 0xc1b   :  { %2211 = vst.msk [vmem:[%s9753_s13] sm:$0xff] %vm506_vm1, %v2209_v13  ;;  %v2227_v32 = vmul.f32 %v2225_v7, %v2209_v13  ;;  %v2230_v36 = vmul.f32 %v2225_v7, %v2210_v15 }
 0xc1c   :  { %2212 = vst.msk [vmem:[%s9758_s17] sm:$0xff] %vm952_vm3, %v2210_v15 }
 0xc1d   :  { %v10237_v40 = vadd.f32 %v2227_v32, %v2220_v12  ;;  %v10239_v43 = vadd.f32 %v2230_v36, %v2229_v34  ;;  %v2856_v36 = vld [vmem:[%s11001_s6] sm:$0xf] }
 0xc1f   :  { %8244 = vmatmul.mubr.msk.f32.vlgmr.msra.gmra.mrb[36].mxu1 %vm952_vm3, %v10239_v43  ;;  %8255 = vmatmul.mubr.msk.f32.vlgmr.msra.gmra.mrb[26].mxu0 %vm506_vm1, %v10237_v40 }
 0xc20   :  { %8934 = vmatpush3.bf16.msra.mxu1 %v10054_v59  ;;  %8265 = vmatprep.mubr.msk.f32.mxu1 %vm9534_vm4, %v9533_v24 }
 0xc21   :  { %8935 = vmatprep.subr.bf16.mxu1 %v9535_v57  ;;  %8940 = vmatpush3.bf16.msra.mxu0 %v10144_v2 }
 0xc22   :  { %8941 = vmatprep.subr.bf16.mxu0 %v9535_v57  ;;  %8276 = vmatprep.mubr.msk.f32.mxu0 %vm9534_vm4, %v9533_v24 }
 0xc24   :  { %8937 = vmatpush3.bf16.msra.mxu1 %v10081_v33 }
 0xc25   :  { %8943 = vmatpush3.bf16.msra.mxu0 %v10148_v10  ;;  %8944 = vmatprep.subr.bf16.mxu1 %v9535_v57 }
 0xc26   :  { %8950 = vmatprep.subr.bf16.mxu0 %v9535_v57 }
 0xc27   :  { %8266 = vmatmul.mubr.msk.f32.vlgmr.msra.gmra.mrb[38].mxu1 %vm506_vm1, %v10161_v31 }
 0xc28   :  { %8946 = vmatpush3.bf16.msra.mxu1 %v10156_v29  ;;  %8287 = vmatprep.mubr.msk.f32.mxu1 %vm9534_vm4, %v9533_v24 }
 0xc29   :  { %8947 = vmatprep.subr.bf16.mxu1 %v9535_v57 }
 0xc2c   :  { %8949 = vmatpush3.bf16.msra.mxu1 %v10169_v19 }
 0xc2d   :  { %8956 = vmatprep.subr.bf16.mxu1 %v9535_v57 }
 0xcf2   :  { %v2309_v41 = vpop.f32.mrb[36].mxu1  ;;  %v2382_v44 = vpop.f32.mrb[26].mxu0 }
 0xcf3   :  { %v2383_v20 = vadd.f32 %v2382_v44, %v2309_v41  ;;  %v8245_v35 = vpop.f32.mrb[37].mxu1  ;;  %v8256_v45 = vpop.f32.mrb[27].mxu0 }
 0xcfa   :  { %v2456_v46 = vpop.f32.mrb[38].mxu1 }
 0xcfb   :  { %v2460_v47 = vadd.f32 %v2456_v46, %v2383_v20  ;;  %v8267_v50 = vpop.f32.mrb[39].mxu1 }
 0xcfd   :  { %v2468_v31 = vadd.f32 %v10125_v52, %v2460_v47 }
 0xcff   :  { %v2469_v23 = vmul.f32 %v2468_v31, %v10127_v56 }
 0xd01   :  { %9329 = vtanh.f32 %v2469_v23 }
 0xd0b   :  { %v9330_v53 = vpop.eup %9329 }
 0xd0c   :  { %v2471_v55 = vmul.f32 %v9330_v53, %v10127_v56 }
 0xd0e   :  { %v2472_v58 = vadd.f32 %v2471_v55, %v10131_v51 }
 0xd10   :  { %2475 = vrot.lane.b32.xlu1 %v2472_v58, %s9538_s23  ;;  %v2473_v63 = vmul.f32 %v2472_v58, %v10138_v8 }
 0xd82   :  { %v2476_v61 = vpop.permute.xlu1 %2475 }
 0xd83   :  { %v2478_v62 = vmul.f32 %v2476_v61, %v2472_v58 }
 0xd85   :  { %2480 = vrot.lane.b32.xlu0 %v2478_v62, %s9539_s26 }
 0xdf7   :  { %v2481_v0 = vpop.permute.xlu0 %2480 }
 0xdf8   :  { %v10272_v1 = vadd.f32 %v2481_v0, %v2473_v63 }
 0xdfa   :  { %9331 = vtanh.f32 %v10272_v1 }
 0xe04   :  { %v9332_v11 = vpop.eup %9331 }
 0xe05   :  { %2486 = vrot.lane.b32.xlu1 %v9332_v11, %s9538_s23 }
 0xe09   :  { %2837 = vperm.xlu1 %9300, %v7499_v5  }
 0xe77   :  { %v2487_v14 = vpop.permute.xlu1 %2486 }
 0xe78   :  { %v2489_v17 = vmul.f32 %v2487_v14, %v2472_v58 }
 0xe7a   :  { %2502 = vrot.lane.b32.xlu0 %v2489_v17, %s9539_s26 }
 0xe7e   :  { %2844 = vperm.xlu0 %9299, %v2841_v28  }
 0xe88   :  { %v2838_v47 = vpop.permute.xlu1 %2837 }
 0xe89   :  { %v2840_v53 = vmul.f32 %v2838_v47, %v10105_v38  ;;  %v2849_v55 = vmul.f32 %v2838_v47, %v9996_v22 }
 0xeec   :  { %v2503_v16 = vpop.permute.xlu0 %2502 }
 0xeed   :  { %8277 = vmatmul.mubr.msk.f32.vlgmr.msra.gmra.mrb[28].mxu0 %vm506_vm1, %v2503_v16 }
 0xeee   :  { %8952 = vmatpush3.bf16.msra.mxu0 %v10175_v25  ;;  %8298 = vmatprep.mubr.msk.f32.mxu0 %vm9534_vm4, %v9533_v24 }
 0xeef   :  { %8953 = vmatprep.subr.bf16.mxu0 %v9535_v57 }
 0xef2   :  { %8955 = vmatpush3.bf16.msra.mxu0 %v10195_v30 }
 0xef3   :  { %8312 = vmatprep.subr.mxu0 %v9533_v24 }
 0xefd   :  { %v2845_v23 = vpop.permute.xlu0 %2844 }
 0xfc0   :  { %v2572_v8 = vpop.f32.mrb[28].mxu0 }
 0xfc1   :  { %v2573_v9 = vadd.f32 %v10180_v39, %v2572_v8  ;;  %v8278_v7 = vpop.f32.mrb[29].mxu0 }
 0xfc3   :  { %v2576_v13 = vmax.f32 %v2573_v9, 0.0 }
 0xfc5   :  { %8288 = vmatmul.mubr.msk.f32.vlgmr.msra.gmra.mrb[40].mxu1 %vm506_vm1, %v2576_v13 }
 0xfc6   :  { %8958 = vmatpush3.bf16.msra.mxu1 %v10185_v48  ;;  %8309 = vmatprep.mubr.msk.f32.mxu1 %vm9534_vm4, %v9533_v24 }
 0xfc7   :  { %8959 = vmatprep.subr.bf16.mxu1 %v9535_v57 }
 0xfca   :  { %8961 = vmatpush3.bf16.msra.mxu1 %v10198_v27 }
 0xfcb   :  { %8962 = vmatprep.subr.bf16.mxu1 %v9535_v57 }
0x1098   :  { %v2657_v15 = vpop.f32.mrb[40].mxu1 }
0x1099   :  { %v2658_v12 = vadd.f32 %v10205_v60, %v2657_v15  ;;  %v8289_v34 = vpop.f32.mrb[41].mxu1 }
0x109b   :  { %v2661_v32 = vmax.f32 %v2658_v12, 0.0 }
0x109d   :  { %8299 = vmatmul.mubr.msk.f32.vlgmr.msra.gmra.mrb[30].mxu0 %vm506_vm1, %v2661_v32  ;;  %8310 = vmatmul.mubr.msk.f32.vlgmr.msra.gmra.mrb[42].mxu1 %vm506_vm1, %v2661_v32 }
0x109e   :  { %8964 = vmatpush3.bf16.msra.mxu1 %v10061_v6  ;;  %8314 = vmatprep.mubr.msk.f32.mxu0 %vm9534_vm4, %v9533_v24 }
0x109f   :  { %8965 = vmatprep.subr.bf16.mxu1 %v9535_v57  ;;  %8325 = vmatprep.mubr.msk.f32.mxu1 %vm9534_vm4, %v9533_v24 }
0x10a0   :  { %8313 = vmatpush3.msk.msra.mxu0 %vm971_vm2, %v2856_v36  ;;  %v7520_v36 = vld [vmem:[%s11008_s20 + $0x18] sm:$0xff] }
0x10a1   :  { %8968 = vmatprep.subr.bf16.mxu0 %v9535_v57 }
0x10a2   :  { %8967 = vmatpush3.bf16.msra.mxu1 %v10068_v18 }
0x10a3   :  { %8974 = vmatprep.subr.bf16.mxu1 %v9535_v57 }
0x1170   :  { %v2742_v41 = vpop.f32.mrb[30].mxu0  ;;  %v2823_v44 = vpop.f32.mrb[42].mxu1 }
0x1171   :  { %v2743_v20 = vadd.f32 %v10222_v3, %v2742_v41  ;;  %v2824_v35 = vadd.f32 %v10225_v4, %v2823_v44  ;;  %v8300_v45 = vpop.f32.mrb[31].mxu0  ;;  %v8311_v46 = vpop.f32.mrb[43].mxu1 }
0x1173   :  { %v2827_v50 = vadd.f32 %v2743_v20, %v10237_v40  ;;  %v2828_v31 = vadd.f32 %v2824_v35, %v10239_v43  ;;  %v3461_v20 = vsub.f32 1.0, %v7520_v36 }
0x1175   :  { %7497 = vst.msk [vmem:[%s9753_s13 + $0x8] sm:$0xff] %vm506_vm1, %v2827_v50  ;;  %v2847_v58 = vmul.f32 %v2845_v23, %v2827_v50  ;;  %v2850_v61 = vmul.f32 %v2845_v23, %v2828_v31 }
0x1176   :  { %7498 = vst.msk [vmem:[%s9758_s17 + $0x8] sm:$0xff] %vm952_vm3, %v2828_v31 }
0x1177   :  { %v10317_v62 = vadd.f32 %v2847_v58, %v2840_v53  ;;  %v10319_v63 = vadd.f32 %v2850_v61, %v2849_v55  ;;  %v3476_v55 = vld [vmem:[%s11001_s6] sm:$0xf] }
0x1179   :  { %8315 = vmatmul.mubr.msk.f32.vlgmr.msra.gmra.mrb[32].mxu0 %vm952_vm3, %v10319_v63  ;;  %8326 = vmatmul.mubr.msk.f32.vlgmr.msra.gmra.mrb[44].mxu1 %vm506_vm1, %v10317_v62 }
0x117a   :  { %8970 = vmatpush3.bf16.msra.mxu0 %v10054_v59  ;;  %8336 = vmatprep.mubr.msk.f32.mxu0 %vm9534_vm4, %v9533_v24 }
0x117b   :  { %8971 = vmatprep.subr.bf16.mxu0 %v9535_v57  ;;  %8976 = vmatpush3.bf16.msra.mxu1 %v10144_v2 }
0x117c   :  { %8977 = vmatprep.subr.bf16.mxu1 %v9535_v57  ;;  %8347 = vmatprep.mubr.msk.f32.mxu1 %vm9534_vm4, %v9533_v24 }
0x117e   :  { %8973 = vmatpush3.bf16.msra.mxu0 %v10081_v33 }
0x117f   :  { %8979 = vmatpush3.bf16.msra.mxu1 %v10148_v10  ;;  %8980 = vmatprep.subr.bf16.mxu0 %v9535_v57 }
0x1180   :  { %8986 = vmatprep.subr.bf16.mxu1 %v9535_v57 }
0x1181   :  { %8337 = vmatmul.mubr.msk.f32.vlgmr.msra.gmra.mrb[34].mxu0 %vm506_vm1, %v2503_v16 }
0x1182   :  { %8982 = vmatpush3.bf16.msra.mxu0 %v10156_v29  ;;  %8358 = vmatprep.mubr.msk.f32.mxu0 %vm9534_vm4, %v9533_v24 }
0x1183   :  { %8983 = vmatprep.subr.bf16.mxu0 %v9535_v57 }
0x1186   :  { %8985 = vmatpush3.bf16.msra.mxu0 %v10169_v19 }
0x1187   :  { %8992 = vmatprep.subr.bf16.mxu0 %v9535_v57 }
0x124c   :  { %v2929_v22 = vpop.f32.mrb[32].mxu0  ;;  %v3002_v38 = vpop.f32.mrb[44].mxu1 }
0x124d   :  { %v3003_v40 = vadd.f32 %v3002_v38, %v2929_v22  ;;  %v8316_v43 = vpop.f32.mrb[33].mxu0  ;;  %v8327_v0 = vpop.f32.mrb[45].mxu1 }
0x1254   :  { %v3076_v11 = vpop.f32.mrb[34].mxu0 }
0x1255   :  { %v3080_v5 = vadd.f32 %v3076_v11, %v3003_v40  ;;  %v8338_v14 = vpop.f32.mrb[35].mxu0 }
0x1257   :  { %v3088_v17 = vadd.f32 %v10125_v52, %v3080_v5 }
0x1259   :  { %v3089_v28 = vmul.f32 %v3088_v17, %v10127_v56 }
0x125b   :  { %9333 = vtanh.f32 %v3089_v28 }
0x1265   :  { %v9334_v16 = vpop.eup %9333 }
0x1266   :  { %v3091_v8 = vmul.f32 %v9334_v16, %v10127_v56 }
0x1268   :  { %v3092_v9 = vadd.f32 %v3091_v8, %v10131_v51 }
0x126a   :  { %3095 = vrot.lane.b32.xlu1 %v3092_v9, %s9538_s23  ;;  %v3093_v15 = vmul.f32 %v3092_v9, %v10272_v1 }
0x12dc   :  { %v3096_v7 = vpop.permute.xlu1 %3095 }
0x12dd   :  { %v3098_v13 = vmul.f32 %v3096_v7, %v3092_v9 }
0x12df   :  { %3100 = vrot.lane.b32.xlu0 %v3098_v13, %s9539_s26 }
0x1351   :  { %v3101_v12 = vpop.permute.xlu0 %3100 }
0x1352   :  { %v10351_v34 = vadd.f32 %v3101_v12, %v3093_v15 }
0x1354   :  { %9335 = vtanh.f32 %v10351_v34 }
0x135e   :  { %v9336_v32 = vpop.eup %9335 }
0x135f   :  { %3106 = vrot.lane.b32.xlu1 %v9336_v32, %s9538_s23 }
0x1363   :  { %3457 = vperm.xlu1 %9300, %v7520_v36  }
0x13d1   :  { %v3107_v41 = vpop.permute.xlu1 %3106 }
0x13d2   :  { %v3109_v44 = vmul.f32 %v3107_v41, %v3092_v9 }
0x13d4   :  { %3122 = vrot.lane.b32.xlu0 %v3109_v44, %s9539_s26  ;;  %v7541_v44 = vld [vmem:[%s11008_s20 + $0x20] sm:$0xff] }
0x13d8   :  { %3464 = vperm.xlu0 %9299, %v3461_v20  }
0x13e2   :  { %v3458_v43 = vpop.permute.xlu1 %3457 }
0x13e3   :  { %v3460_v5 = vmul.f32 %v3458_v43, %v10101_v37  ;;  %v3469_v14 = vmul.f32 %v3458_v43, %v9991_v49 }
0x1446   :  { %v3123_v35 = vpop.permute.xlu0 %3122 }
0x1447   :  { %8348 = vmatmul.mubr.msk.f32.vlgmr.msra.gmra.mrb[46].mxu1 %vm506_vm1, %v3123_v35 }
0x1448   :  { %8988 = vmatpush3.bf16.msra.mxu1 %v10175_v25  ;;  %8369 = vmatprep.mubr.msk.f32.mxu1 %vm9534_vm4, %v9533_v24 }
0x1449   :  { %8989 = vmatprep.subr.bf16.mxu1 %v9535_v57 }
0x144c   :  { %8991 = vmatpush3.bf16.msra.mxu1 %v10195_v30 }
0x144d   :  { %8383 = vmatprep.subr.mxu1 %v9533_v24 }
0x1457   :  { %v3465_v11 = vpop.permute.xlu0 %3464 }
0x151a   :  { %v3192_v1 = vpop.f32.mrb[46].mxu1 }
0x151b   :  { %v3193_v45 = vadd.f32 %v10180_v39, %v3192_v1  ;;  %v8349_v46 = vpop.f32.mrb[47].mxu1  ;;  %v4081_v1 = vsub.f32 1.0, %v7541_v44 }
0x151d   :  { %v3196_v47 = vmax.f32 %v3193_v45, 0.0 }
0x151f   :  { %8359 = vmatmul.mubr.msk.f32.vlgmr.msra.gmra.mrb[36].mxu0 %vm506_vm1, %v3196_v47 }
0x1520   :  { %8994 = vmatpush3.bf16.msra.mxu0 %v10185_v48  ;;  %8380 = vmatprep.mubr.msk.f32.mxu0 %vm9534_vm4, %v9533_v24 }
0x1521   :  { %8995 = vmatprep.subr.bf16.mxu0 %v9535_v57 }
0x1524   :  { %8997 = vmatpush3.bf16.msra.mxu0 %v10198_v27 }
0x1525   :  { %8998 = vmatprep.subr.bf16.mxu0 %v9535_v57 }
0x15f2   :  { %v3277_v50 = vpop.f32.mrb[36].mxu0 }
0x15f3   :  { %v3278_v31 = vadd.f32 %v10205_v60, %v3277_v50  ;;  %v8360_v23 = vpop.f32.mrb[37].mxu0 }
0x15f5   :  { %v3281_v53 = vmax.f32 %v3278_v31, 0.0 }
0x15f7   :  { %8370 = vmatmul.mubr.msk.f32.vlgmr.msra.gmra.mrb[48].mxu1 %vm506_vm1, %v3281_v53  ;;  %8381 = vmatmul.mubr.msk.f32.vlgmr.msra.gmra.mrb[38].mxu0 %vm506_vm1, %v3281_v53  ;;  %v4095_v53 = vld [vmem:[%s11005_s4 + $0x18] sm:$0xff] }
0x15f8   :  { %9000 = vmatpush3.bf16.msra.mxu0 %v10061_v6  ;;  %8385 = vmatprep.mubr.msk.f32.mxu1 %vm9534_vm4, %v9533_v24 }
0x15f9   :  { %9001 = vmatprep.subr.bf16.mxu0 %v9535_v57  ;;  %8396 = vmatprep.mubr.msk.f32.mxu0 %vm9534_vm4, %v9533_v24 }
0x15fa   :  { %8384 = vmatpush3.msk.msra.mxu1 %vm971_vm2, %v3476_v55 }
0x15fb   :  { %9004 = vmatprep.subr.bf16.mxu1 %v9535_v57 }
0x15fc   :  { %9003 = vmatpush3.bf16.msra.mxu0 %v10068_v18 }
0x15fd   :  { %9010 = vmatprep.subr.bf16.mxu0 %v9535_v57 }
0x16ca   :  { %v3362_v6 = vpop.f32.mrb[48].mxu1  ;;  %v3443_v58 = vpop.f32.mrb[38].mxu0 }
0x16cb   :  { %v3363_v61 = vadd.f32 %v10222_v3, %v3362_v6  ;;  %v3444_v22 = vadd.f32 %v10225_v4, %v3443_v58  ;;  %v8371_v38 = vpop.f32.mrb[49].mxu1  ;;  %v8382_v40 = vpop.f32.mrb[39].mxu0  ;;  %v4096_v6 = vld [vmem:[%s11001_s6] sm:$0xf] }
0x16cd   :  { %v3447_v18 = vadd.f32 %v3363_v61, %v10317_v62  ;;  %v3448_v0 = vadd.f32 %v3444_v22, %v10319_v63 }
0x16cf   :  { %7518 = vst.msk [vmem:[%s9753_s13 + $0x10] sm:$0xff] %vm506_vm1, %v3447_v18  ;;  %v3467_v17 = vmul.f32 %v3465_v11, %v3447_v18  ;;  %v3470_v28 = vmul.f32 %v3465_v11, %v3448_v0 }
0x16d0   :  { %7519 = vst.msk [vmem:[%s9758_s17 + $0x10] sm:$0xff] %vm952_vm3, %v3448_v0 }
0x16d1   :  { %v10396_v16 = vadd.f32 %v3467_v17, %v3460_v5  ;;  %v10398_v8 = vadd.f32 %v3470_v28, %v3469_v14  ;;  %v4246_v5 = vld [vmem:[%s11003_s11] sm:$0xff]  ;;  %v4247_v14 = vld [vmem:[%s11003_s11 + $0x8] sm:$0xff] }
0x16d3   :  { %8386 = vmatmul.mubr.msk.f32.vlgmr.msra.gmra.mrb[50].mxu1 %vm952_vm3, %v10398_v8  ;;  %8397 = vmatmul.mubr.msk.f32.vlgmr.msra.gmra.mrb[40].mxu0 %vm506_vm1, %v10396_v16 }
0x16d4   :  { %9006 = vmatpush3.bf16.msra.mxu1 %v10054_v59  ;;  %8407 = vmatprep.mubr.msk.f32.mxu1 %vm9534_vm4, %v9533_v24 }
0x16d5   :  { %9007 = vmatprep.subr.bf16.mxu1 %v9535_v57  ;;  %9012 = vmatpush3.bf16.msra.mxu0 %v10144_v2 }
0x16d6   :  { %9013 = vmatprep.subr.bf16.mxu0 %v9535_v57  ;;  %8418 = vmatprep.mubr.msk.f32.mxu0 %vm9534_vm4, %v9533_v24 }
0x16d8   :  { %9009 = vmatpush3.bf16.msra.mxu1 %v10081_v33 }
0x16d9   :  { %9015 = vmatpush3.bf16.msra.mxu0 %v10148_v10  ;;  %9016 = vmatprep.subr.bf16.mxu1 %v9535_v57 }
0x16da   :  { %9022 = vmatprep.subr.bf16.mxu0 %v9535_v57 }
0x16db   :  { %8408 = vmatmul.mubr.msk.f32.vlgmr.msra.gmra.mrb[52].mxu1 %vm506_vm1, %v3123_v35 }
0x16dc   :  { %9018 = vmatpush3.bf16.msra.mxu1 %v10156_v29  ;;  %8429 = vmatprep.mubr.msk.f32.mxu1 %vm9534_vm4, %v9533_v24 }
0x16dd   :  { %9019 = vmatprep.subr.bf16.mxu1 %v9535_v57 }
0x16e0   :  { %9021 = vmatpush3.bf16.msra.mxu1 %v10169_v19 }
0x16e1   :  { %9028 = vmatprep.subr.bf16.mxu1 %v9535_v57 }
0x17a6   :  { %v3549_v49 = vpop.f32.mrb[50].mxu1  ;;  %v3622_v59 = vpop.f32.mrb[40].mxu0 }
0x17a7   :  { %v3623_v33 = vadd.f32 %v3622_v59, %v3549_v49  ;;  %v8387_v37 = vpop.f32.mrb[51].mxu1  ;;  %v8398_v2 = vpop.f32.mrb[41].mxu0  ;;  %v10488_v59 = vpack.c.bf16 %v4247_v14, %v4246_v5 }
0x17a8   :  { %v4249_v37 = vld [vmem:[%s11003_s11 + $0x18] sm:$0xff] }
0x17ae   :  { %v3696_v10 = vpop.f32.mrb[52].mxu1 }
0x17af   :  { %v3700_v62 = vadd.f32 %v3696_v10, %v3623_v33  ;;  %v8409_v63 = vpop.f32.mrb[53].mxu1 }
0x17b1   :  { %v3708_v9 = vadd.f32 %v10125_v52, %v3700_v62 }
0x17b3   :  { %v3709_v29 = vmul.f32 %v3708_v9, %v10127_v56 }
0x17b5   :  { %9337 = vtanh.f32 %v3709_v29  ;;  %v10515_v29 = vld [vmem:[%s11007_s18] ss:$0 sm:$0xff] }
0x17bf   :  { %v9338_v7 = vpop.eup %9337 }
0x17c0   :  { %v3711_v13 = vmul.f32 %v9338_v7, %v10127_v56 }
0x17c2   :  { %v3712_v19 = vadd.f32 %v3711_v13, %v10131_v51 }
0x17c4   :  { %3715 = vrot.lane.b32.xlu1 %v3712_v19, %s9538_s23  ;;  %v3713_v32 = vmul.f32 %v3712_v19, %v10351_v34 }
0x1836   :  { %v3716_v15 = vpop.permute.xlu1 %3715 }
0x1837   :  { %v3718_v12 = vmul.f32 %v3716_v15, %v3712_v19 }
0x1839   :  { %3720 = vrot.lane.b32.xlu0 %v3718_v12, %s9539_s26 }
0x18ab   :  { %v3721_v36 = vpop.permute.xlu0 %3720 }
0x18ac   :  { %v10430_v41 = vadd.f32 %v3721_v36, %v3713_v32 }
0x18ae   :  { %9339 = vtanh.f32 %v10430_v41 }
0x18b8   :  { %v9340_v52 = vpop.eup %9339 }
0x18b9   :  { %3726 = vrot.lane.b32.xlu1 %v9340_v52, %s9538_s23 }
0x18bd   :  { %4077 = vperm.xlu1 %9300, %v7541_v44  }
0x192b   :  { %v3727_v20 = vpop.permute.xlu1 %3726 }
0x192c   :  { %v3729_v35 = vmul.f32 %v3727_v20, %v3712_v19 }
0x192e   :  { %3742 = vrot.lane.b32.xlu0 %v3729_v35, %s9539_s26 }
0x1932   :  { %4084 = vperm.xlu0 %9299, %v4081_v1  }
0x193c   :  { %v4078_v18 = vpop.permute.xlu1 %4077 }
0x193d   :  { %v4080_v28 = vmul.f32 %v4078_v18, %v10115_v42  ;;  %v4089_v49 = vmul.f32 %v4078_v18, %v10006_v54  ;;  %v10567_v18 = vld [vmem:[%s11011_s28] ss:$0 sm:$0xff] }
0x19a0   :  { %v10436_v45 = vpop.permute.xlu0 %3742 }
0x19a1   :  { %8419 = vmatmul.mubr.msk.f32.vlgmr.msra.gmra.mrb[42].mxu0 %vm506_vm1, %v10436_v45 }
0x19a2   :  { %9024 = vmatpush3.bf16.msra.mxu0 %v10175_v25  ;;  %8440 = vmatprep.mubr.msk.f32.mxu0 %vm9534_vm4, %v9533_v24 }
0x19a3   :  { %9025 = vmatprep.subr.bf16.mxu0 %v9535_v57 }
0x19a6   :  { %9027 = vmatpush3.bf16.msra.mxu0 %v10195_v30 }
0x19a7   :  { %8454 = vmatprep.subr.mxu0 %v9533_v24 }
0x19b1   :  { %v4085_v17 = vpop.permute.xlu0 %4084 }
0x1a74   :  { %v3812_v34 = vpop.f32.mrb[42].mxu0 }
0x1a75   :  { %v3813_v46 = vadd.f32 %v10180_v39, %v3812_v34  ;;  %v8420_v47 = vpop.f32.mrb[43].mxu0  ;;  %v7562_v34 = vld [vmem:[%s11008_s20 + $0x28] sm:$0xff] }
0x1a76   :  { %v4351_v47 = vld [vmem:[%s11009_s22 + $0x8] sm:$0xff] }
0x1a77   :  { %v3816_v50 = vmax.f32 %v3813_v46, 0.0  ;;  %v4350_v46 = vld [vmem:[%s11009_s22] sm:$0xff] }
0x1a79   :  { %8430 = vmatmul.mubr.msk.f32.vlgmr.msra.gmra.mrb[54].mxu1 %vm506_vm1, %v3816_v50  ;;  %v4352_v50 = vld [vmem:[%s11009_s22 + $0x10] sm:$0xff] }
0x1a7a   :  { %9030 = vmatpush3.bf16.msra.mxu1 %v10185_v48  ;;  %8451 = vmatprep.mubr.msk.f32.mxu1 %vm9534_vm4, %v9533_v24  ;;  %v4092_v48 = vld [vmem:[%s11005_s4] sm:$0xff] }
0x1a7b   :  { %9031 = vmatprep.subr.bf16.mxu1 %v9535_v57 }
0x1a7e   :  { %9033 = vmatpush3.bf16.msra.mxu1 %v10198_v27  ;;  %v4093_v27 = vld [vmem:[%s11005_s4 + $0x8] sm:$0xff] }
0x1a7f   :  { %9034 = vmatprep.subr.bf16.mxu1 %v9535_v57  ;;  %v10463_v23 = vpack.c.bf16 %v4093_v27, %v4092_v48  ;;  %v4701_v48 = vsub.f32 1.0, %v7562_v34  ;;  %v7549_v27 = vld [vmem:[%s11009_s22 + $0x20] sm:$0xff] }
0x1b4c   :  { %v3897_v25 = vpop.f32.mrb[54].mxu1 }
0x1b4d   :  { %v3898_v39 = vadd.f32 %v10205_v60, %v3897_v25  ;;  %v8431_v30 = vpop.f32.mrb[55].mxu1  ;;  %v4094_v60 = vld [vmem:[%s11005_s4 + $0x10] sm:$0xff]  ;;  %v10532_v25 = vpack.c.bf16 %v4351_v47, %v4350_v46 }
0x1b4e   :  { %v10469_v55 = vpack.c.bf16 %v4095_v53, %v4094_v60  ;;  %v7550_v60 = vld [vmem:[%s11009_s22 + $0x28] sm:$0xff] }
0x1b4f   :  { %v3901_v31 = vmax.f32 %v3898_v39, 0.0  ;;  %v4353_v39 = vld [vmem:[%s11009_s22 + $0x18] sm:$0xff]  ;;  %v10544_v53 = vpack.c.bf16 %v7550_v60, %v7549_v27 }
0x1b51   :  { %8441 = vmatmul.mubr.msk.f32.vlgmr.msra.gmra.mrb[44].mxu0 %vm506_vm1, %v3901_v31  ;;  %8452 = vmatmul.mubr.msk.f32.vlgmr.msra.gmra.mrb[56].mxu1 %vm506_vm1, %v3901_v31 }
0x1b52   :  { %8456 = vmatprep.mubr.msk.f32.mxu0 %vm9534_vm4, %v9533_v24  ;;  %8467 = vmatprep.mubr.msk.f32.mxu1 %vm9534_vm4, %v9533_v24 }
0x1b53   :  { %9036 = vmatpush3.bf16.msra.mxu1 %v10463_v23  ;;  %8455 = vmatpush3.msk.msra.mxu0 %vm971_vm2, %v4096_v6 }
0x1b54   :  { %9037 = vmatprep.subr.bf16.mxu1 %v9535_v57  ;;  %9040 = vmatprep.subr.bf16.mxu0 %v9535_v57 }
0x1b57   :  { %9039 = vmatpush3.bf16.msra.mxu1 %v10469_v55 }
0x1b58   :  { %9046 = vmatprep.subr.bf16.mxu1 %v9535_v57 }
0x1c24   :  { %v3982_v58 = vpop.f32.mrb[44].mxu0  ;;  %v4063_v61 = vpop.f32.mrb[56].mxu1 }
0x1c25   :  { %v3983_v22 = vadd.f32 %v10222_v3, %v3982_v58  ;;  %v4064_v38 = vadd.f32 %v10225_v4, %v4063_v61  ;;  %v8442_v40 = vpop.f32.mrb[45].mxu0  ;;  %v8453_v43 = vpop.f32.mrb[57].mxu1  ;;  %v7551_v58 = vld [vmem:[%s11009_s22 + $0x30] sm:$0xff]  ;;  %v7552_v61 = vld [vmem:[%s11009_s22 + $0x38] sm:$0xff] }
0x1c26   :  { %v4523_v40 = vld [vmem:[%s11010_s30 + $0x8] sm:$0xff] }
0x1c27   :  { %v4067_v0 = vadd.f32 %v3983_v22, %v10396_v16  ;;  %v4068_v11 = vadd.f32 %v4064_v38, %v10398_v8  ;;  %v4248_v8 = vld [vmem:[%s11003_s11 + $0x10] sm:$0xff]  ;;  %v10556_v22 = vpack.c.bf16 %v7552_v61, %v7551_v58  ;;  %v4522_v38 = vld [vmem:[%s11010_s30] sm:$0xff] }
0x1c28   :  { %v10501_v54 = vpack.c.bf16 %v4249_v37, %v4248_v8  ;;  %v10562_v43 = vpack.c.bf16 %v4523_v40, %v4522_v38  ;;  %v4608_v8 = vld [vmem:[%s11012_s1 + $0x10] sm:$0xff] }
0x1c29   :  { %7539 = vst.msk [vmem:[%s9753_s13 + $0x18] sm:$0xff] %vm506_vm1, %v4067_v0  ;;  %v4087_v3 = vmul.f32 %v4085_v17, %v4067_v0  ;;  %v4090_v4 = vmul.f32 %v4085_v17, %v4068_v11  ;;  %v4606_v0 = vld [vmem:[%s11012_s1] sm:$0xff] }
0x1c2a   :  { %7540 = vst.msk [vmem:[%s9758_s17 + $0x18] sm:$0xff] %vm952_vm3, %v4068_v11  ;;  %v4607_v11 = vld [vmem:[%s11012_s1 + $0x8] sm:$0xff] }
0x1c2b   :  { %v10490_v33 = vadd.f32 %v4087_v3, %v4080_v28  ;;  %v10492_v16 = vadd.f32 %v4090_v4, %v4089_v49  ;;  %v10572_v28 = vpack.c.bf16 %v4607_v11, %v4606_v0  ;;  %v4524_v3 = vld [vmem:[%s11010_s30 + $0x10] sm:$0xff]  ;;  %v4525_v4 = vld [vmem:[%s11010_s30 + $0x18] sm:$0xff] }
0x1c2c   :  { %v10582_v37 = vpack.c.bf16 %v4525_v4, %v4524_v3 }
0x1c2d   :  { %8457 = vmatmul.mubr.msk.f32.vlgmr.msra.gmra.mrb[46].mxu0 %vm952_vm3, %v10492_v16  ;;  %8468 = vmatmul.mubr.msk.f32.vlgmr.msra.gmra.mrb[58].mxu1 %vm506_vm1, %v10490_v33 }
0x1c2e   :  { %9042 = vmatpush3.bf16.msra.mxu0 %v10488_v59  ;;  %8478 = vmatprep.mubr.msk.f32.mxu0 %vm9534_vm4, %v9533_v24 }
0x1c2f   :  { %9043 = vmatprep.subr.bf16.mxu0 %v9535_v57  ;;  %8489 = vmatprep.mubr.msk.f32.mxu1 %vm9534_vm4, %v9533_v24 }
0x1c30   :  { %9048 = vmatpush3.bf16.msra.mxu1 %v10532_v25 }
0x1c31   :  { %9049 = vmatprep.subr.bf16.mxu1 %v9535_v57 }
0x1c32   :  { %9045 = vmatpush3.bf16.msra.mxu0 %v10501_v54 }
0x1c33   :  { %9052 = vmatprep.subr.bf16.mxu0 %v9535_v57 }
0x1c35   :  { %8479 = vmatmul.mubr.msk.f32.vlgmr.msra.gmra.mrb[48].mxu0 %vm506_vm1, %v10436_v45 }
0x1c36   :  { %8500 = vmatprep.mubr.msk.f32.mxu0 %vm9534_vm4, %v9533_v24  ;;  %9054 = vmatpush3.bf16.msra.mxu0 %v10544_v53 }
0x1c37   :  { %9055 = vmatprep.subr.bf16.mxu0 %v9535_v57 }
0x1c3a   :  { %9057 = vmatpush3.bf16.msra.mxu0 %v10556_v22 }
0x1c3b   :  { %9064 = vmatprep.subr.bf16.mxu0 %v9535_v57 }
0x1d00   :  { %v4169_v42 = vpop.f32.mrb[46].mxu0  ;;  %v4242_v2 = vpop.f32.mrb[58].mxu1 }
0x1d01   :  { %v4243_v10 = vadd.f32 %v4242_v2, %v4169_v42  ;;  %v8458_v62 = vpop.f32.mrb[47].mxu0  ;;  %v8469_v63 = vpop.f32.mrb[59].mxu1  ;;  %v4609_v42 = vld [vmem:[%s11012_s1 + $0x18] sm:$0xff] }
0x1d02   :  { %v10585_v2 = vpack.c.bf16 %v4609_v42, %v4608_v8 }
0x1d08   :  { %v4316_v9 = vpop.f32.mrb[48].mxu0 }
0x1d09   :  { %v4320_v7 = vadd.f32 %v4316_v9, %v4243_v10  ;;  %v8480_v13 = vpop.f32.mrb[49].mxu0  ;;  %v10592_v10 = vld [vmem:[%s11011_s28 + $0x1] ss:$0 sm:$0xff] }
0x1d0a   :  { %v10606_v13 = vld [vmem:[%s11001_s6] sm:$0xf] }
0x1d0b   :  { %v4328_v19 = vadd.f32 %v10515_v29, %v4320_v7 }
0x1d0d   :  { %v4329_v15 = vmul.f32 %v4328_v19, %v10127_v56  ;;  %v10612_v19 = vld [vmem:[%s11013_s2] ss:$0 sm:$0xff] }
0x1d0f   :  { %9341 = vtanh.f32 %v4329_v15  ;;  %v10615_v15 = vld [vmem:[%s11014_s12] ss:$0 sm:$0xff] }
0x1d19   :  { %v9342_v12 = vpop.eup %9341 }
0x1d1a   :  { %v4331_v32 = vmul.f32 %v9342_v12, %v10127_v56 }
0x1d1c   :  { %v4332_v36 = vadd.f32 %v4331_v32, %v10131_v51 }
0x1d1e   :  { %4335 = vrot.lane.b32.xlu1 %v4332_v36, %s9538_s23  ;;  %v4333_v20 = vmul.f32 %v4332_v36, %v10430_v41  ;;  %v10536_v41 = vpack.c.bf16 %v4353_v39, %v4352_v50 }
0x1d20   :  { %9051 = vmatpush3.bf16.msra.mxu1 %v10536_v41 }
0x1d21   :  { %9058 = vmatprep.subr.bf16.mxu1 %v9535_v57 }
0x1d90   :  { %v4336_v52 = vpop.permute.xlu1 %4335 }
0x1d91   :  { %v4338_v44 = vmul.f32 %v4336_v52, %v4332_v36 }
0x1d93   :  { %4340 = vrot.lane.b32.xlu0 %v4338_v44, %s9539_s26 }
0x1e05   :  { %v4341_v35 = vpop.permute.xlu0 %4340 }
0x1e06   :  { %v10524_v1 = vadd.f32 %v4341_v35, %v4333_v20 }
0x1e08   :  { %9343 = vtanh.f32 %v10524_v1 }
0x1e12   :  { %v9344_v45 = vpop.eup %9343 }
0x1e13   :  { %4346 = vrot.lane.b32.xlu1 %v9344_v45, %s9538_s23 }
0x1e17   :  { %4697 = vperm.xlu1 %9300, %v7562_v34  }
0x1e85   :  { %v4347_v30 = vpop.permute.xlu1 %4346 }
0x1e86   :  { %v4349_v31 = vmul.f32 %v4347_v30, %v4332_v36 }
0x1e88   :  { %4362 = vrot.lane.b32.xlu0 %v4349_v31, %s9539_s26 }
0x1e8c   :  { %4704 = vperm.xlu0 %9299, %v4701_v48  }
0x1e96   :  { %v4698_v35 = vpop.permute.xlu1 %4697 }
0x1e97   :  { %v4700_v47 = vmul.f32 %v4698_v35, %v10113_v21  ;;  %v4709_v50 = vmul.f32 %v4698_v35, %v10001_v26 }
0x1efa   :  { %v10548_v6 = vpop.permute.xlu0 %4362 }
0x1efb   :  { %8490 = vmatmul.mubr.msk.f32.vlgmr.msra.gmra.mrb[60].mxu1 %vm506_vm1, %v10548_v6 }
0x1efc   :  { %8511 = vmatprep.mubr.msk.f32.mxu1 %vm9534_vm4, %v9533_v24  ;;  %9060 = vmatpush3.bf16.msra.mxu1 %v10562_v43 }
0x1efd   :  { %9061 = vmatprep.subr.bf16.mxu1 %v9535_v57 }
0x1f00   :  { %9063 = vmatpush3.bf16.msra.mxu1 %v10582_v37 }
0x1f01   :  { %8525 = vmatprep.subr.mxu1 %v9533_v24 }
0x1f0b   :  { %v4705_v46 = vpop.permute.xlu0 %4704 }
0x1fce   :  { %v4432_v5 = vpop.f32.mrb[60].mxu1 }
0x1fcf   :  { %v4433_v14 = vadd.f32 %v10567_v18, %v4432_v5  ;;  %v8491_v17 = vpop.f32.mrb[61].mxu1 }
0x1fd1   :  { %v4436_v49 = vmax.f32 %v4433_v14, 0.0 }
0x1fd3   :  { %8501 = vmatmul.mubr.msk.f32.vlgmr.msra.gmra.mrb[50].mxu0 %vm506_vm1, %v4436_v49 }
0x1fd4   :  { %9066 = vmatpush3.bf16.msra.mxu0 %v10572_v28  ;;  %8522 = vmatprep.mubr.msk.f32.mxu0 %vm9534_vm4, %v9533_v24 }
0x1fd5   :  { %9067 = vmatprep.subr.bf16.mxu0 %v9535_v57 }
0x1fd8   :  { %9069 = vmatpush3.bf16.msra.mxu0 %v10585_v2 }
0x1fd9   :  { %9070 = vmatprep.subr.bf16.mxu0 %v9535_v57 }
0x20a6   :  { %v4517_v62 = vpop.f32.mrb[50].mxu0 }
0x20a7   :  { %v4518_v63 = vadd.f32 %v10592_v10, %v4517_v62  ;;  %v8502_v9 = vpop.f32.mrb[51].mxu0 }
0x20a9   :  { %v4521_v7 = vmax.f32 %v4518_v63, 0.0 }
0x20ab   :  { %8512 = vmatmul.mubr.msk.f32.vlgmr.msra.gmra.mrb[62].mxu1 %vm506_vm1, %v4521_v7  ;;  %8523 = vmatmul.mubr.msk.f32.vlgmr.msra.gmra.mrb[52].mxu0 %vm506_vm1, %v4521_v7 }
0x20ac   :  { %9072 = vmatpush3.bf16.msra.mxu0 %v10463_v23  ;;  %8527 = vmatprep.mubr.msk.f32.mxu1 %vm9534_vm4, %v9533_v24 }
0x20ad   :  { %9073 = vmatprep.subr.bf16.mxu0 %v9535_v57  ;;  %8538 = vmatprep.mubr.msk.f32.mxu0 %vm9534_vm4, %v9533_v24 }
0x20ae   :  { %8526 = vmatpush3.msk.msra.mxu1 %vm971_vm2, %v10606_v13 }
0x20af   :  { %9076 = vmatprep.subr.bf16.mxu1 %v9535_v57 }
0x20b0   :  { %9075 = vmatpush3.bf16.msra.mxu0 %v10469_v55 }
0x20b1   :  { %9082 = vmatprep.subr.bf16.mxu0 %v9535_v57 }
0x217e   :  { %v4602_v12 = vpop.f32.mrb[62].mxu1  ;;  %v4683_v32 = vpop.f32.mrb[52].mxu0 }
0x217f   :  { %v4603_v36 = vadd.f32 %v10612_v19, %v4602_v12  ;;  %v4684_v52 = vadd.f32 %v10615_v15, %v4683_v32  ;;  %v8513_v44 = vpop.f32.mrb[63].mxu1  ;;  %v8524_v20 = vpop.f32.mrb[53].mxu0 }
0x2181   :  { %v4687_v45 = vadd.f32 %v4603_v36, %v10490_v33  ;;  %v4688_v34 = vadd.f32 %v4684_v52, %v10492_v16 }
0x2183   :  { %7560 = vst.msk [vmem:[%s9753_s13 + $0x20] sm:$0xff] %vm506_vm1, %v4687_v45  ;;  %v4707_v39 = vmul.f32 %v4705_v46, %v4687_v45  ;;  %v4710_v30 = vmul.f32 %v4705_v46, %v4688_v34 }
0x2184   :  { %7561 = vst.msk [vmem:[%s9758_s17 + $0x20] sm:$0xff] %vm952_vm3, %v4688_v34 }
0x2185   :  { %v10627_v31 = vadd.f32 %v4707_v39, %v4700_v47  ;;  %v10629_v48 = vadd.f32 %v4710_v30, %v4709_v50 }
0x2187   :  { %8528 = vmatmul.mubr.msk.f32.vlgmr.msra.gmra.mrb[64].mxu1 %vm952_vm3, %v10629_v48  ;;  %8539 = vmatmul.mubr.msk.f32.vlgmr.msra.gmra.mrb[54].mxu0 %vm506_vm1, %v10627_v31 }
0x2188   :  { %9078 = vmatpush3.bf16.msra.mxu1 %v10488_v59  ;;  %8549 = vmatprep.mubr.msk.f32.mxu1 %vm9534_vm4, %v9533_v24 }
0x2189   :  { %9079 = vmatprep.subr.bf16.mxu1 %v9535_v57  ;;  %9084 = vmatpush3.bf16.msra.mxu0 %v10532_v25 }
0x218a   :  { %9085 = vmatprep.subr.bf16.mxu0 %v9535_v57  ;;  %8560 = vmatprep.mubr.msk.f32.mxu0 %vm9534_vm4, %v9533_v24 }
0x218c   :  { %9081 = vmatpush3.bf16.msra.mxu1 %v10501_v54 }
0x218d   :  { %9087 = vmatpush3.bf16.msra.mxu0 %v10536_v41  ;;  %9088 = vmatprep.subr.bf16.mxu1 %v9535_v57 }
0x218e   :  { %9094 = vmatprep.subr.bf16.mxu0 %v9535_v57 }
0x218f   :  { %8550 = vmatmul.mubr.msk.f32.vlgmr.msra.gmra.mrb[66].mxu1 %vm506_vm1, %v10548_v6 }
0x2190   :  { %9090 = vmatpush3.bf16.msra.mxu1 %v10544_v53  ;;  %8571 = vmatprep.mubr.msk.f32.mxu1 %vm9534_vm4, %v9533_v24 }
0x2191   :  { %9091 = vmatprep.subr.bf16.mxu1 %v9535_v57 }
0x2194   :  { %9093 = vmatpush3.bf16.msra.mxu1 %v10556_v22 }
0x2195   :  { %9100 = vmatprep.subr.bf16.mxu1 %v9535_v57 }
0x225a   :  { %v4789_v26 = vpop.f32.mrb[64].mxu1  ;;  %v4862_v21 = vpop.f32.mrb[54].mxu0 }
0x225b   :  { %v4863_v33 = vadd.f32 %v4862_v21, %v4789_v26  ;;  %v8529_v16 = vpop.f32.mrb[65].mxu1  ;;  %v8540_v27 = vpop.f32.mrb[55].mxu0 }
0x2262   :  { %v4936_v60 = vpop.f32.mrb[66].mxu1 }
0x2263   :  { %v4940_v58 = vadd.f32 %v4936_v60, %v4863_v33  ;;  %v8551_v61 = vpop.f32.mrb[67].mxu1 }
0x2265   :  { %v4948_v6 = vadd.f32 %v10515_v29, %v4940_v58 }
0x2267   :  { %v4949_v38 = vmul.f32 %v4948_v6, %v10127_v56 }
0x2269   :  { %9345 = vtanh.f32 %v4949_v38 }
0x2273   :  { %v9346_v40 = vpop.eup %9345 }
0x2274   :  { %v4951_v0 = vmul.f32 %v9346_v40, %v10127_v56 }
0x2276   :  { %v4952_v11 = vadd.f32 %v4951_v0, %v10131_v51 }
0x2278   :  { %4955 = vrot.lane.b32.xlu1 %v4952_v11, %s9538_s23  ;;  %v4953_v17 = vmul.f32 %v4952_v11, %v10524_v1 }
0x22ea   :  { %v4956_v5 = vpop.permute.xlu1 %4955 }
0x22eb   :  { %v4958_v14 = vmul.f32 %v4956_v5, %v4952_v11 }
0x22ed   :  { %4960 = vrot.lane.b32.xlu0 %v4958_v14, %s9539_s26 }
0x235f   :  { %v4961_v49 = vpop.permute.xlu0 %4960 }
0x2360   :  { %v10662_v3 = vadd.f32 %v4961_v49, %v4953_v17 }
0x2362   :  { %9347 = vtanh.f32 %v10662_v3 }
0x236c   :  { %v9348_v4 = vpop.eup %9347 }
0x236d   :  { %4966 = vrot.lane.b32.xlu1 %v9348_v4, %s9538_s23 }
0x23df   :  { %v4967_v8 = vpop.permute.xlu1 %4966 }
0x23e0   :  { %v4969_v42 = vmul.f32 %v4967_v8, %v4952_v11 }
0x23e2   :  { %4982 = vrot.lane.b32.xlu0 %v4969_v42, %s9539_s26 }
0x2454   :  { %v4983_v62 = vpop.permute.xlu0 %4982 }
0x2455   :  { %8561 = vmatmul.mubr.msk.f32.vlgmr.msra.gmra.mrb[56].mxu0 %vm506_vm1, %v4983_v62 }
0x2456   :  { %9096 = vmatpush3.bf16.msra.mxu0 %v10562_v43  ;;  %8582 = vmatprep.mubr.msk.f32.mxu0 %vm9534_vm4, %v9533_v24 }
0x2457   :  { %9097 = vmatprep.subr.bf16.mxu0 %v9535_v57 }
0x245a   :  { %9099 = vmatpush3.bf16.msra.mxu0 %v10582_v37 }
0x245b   :  { %8596 = vmatprep.subr.mxu0 %v9533_v24 }
0x2528   :  { %v5052_v1 = vpop.f32.mrb[56].mxu0 }
0x2529   :  { %v5053_v63 = vadd.f32 %v10567_v18, %v5052_v1  ;;  %v8562_v9 = vpop.f32.mrb[57].mxu0 }
0x252b   :  { %v5056_v7 = vmax.f32 %v5053_v63, 0.0 }
0x252d   :  { %8572 = vmatmul.mubr.msk.f32.vlgmr.msra.gmra.mrb[68].mxu1 %vm506_vm1, %v5056_v7  ;;  %v5851_v7 = vld [vmem:[%s11001_s6] sm:$0xf] }
0x252e   :  { %9102 = vmatpush3.bf16.msra.mxu1 %v10572_v28  ;;  %8593 = vmatprep.mubr.msk.f32.mxu1 %vm9534_vm4, %v9533_v24 }
0x252f   :  { %9103 = vmatprep.subr.bf16.mxu1 %v9535_v57 }
0x2532   :  { %9105 = vmatpush3.bf16.msra.mxu1 %v10585_v2 }
0x2533   :  { %9106 = vmatprep.subr.bf16.mxu1 %v9535_v57 }
0x2600   :  { %v5137_v12 = vpop.f32.mrb[68].mxu1 }
0x2601   :  { %v5138_v32 = vadd.f32 %v10592_v10, %v5137_v12  ;;  %v8573_v36 = vpop.f32.mrb[69].mxu1 }
0x2603   :  { %v5141_v52 = vmax.f32 %v5138_v32, 0.0 }
0x2605   :  { %8583 = vmatmul.mubr.msk.f32.vlgmr.msra.gmra.mrb[58].mxu0 %vm506_vm1, %v5141_v52  ;;  %8594 = vmatmul.mubr.msk.f32.vlgmr.msra.gmra.mrb[70].mxu1 %vm506_vm1, %v5141_v52 }
0x2606   :  { %9108 = vmatpush3.bf16.msra.mxu1 %v10463_v23  ;;  %8597 = vmatpush3.msk.msra.mxu0 %vm971_vm2, %v10606_v13 }
0x2607   :  { %9109 = vmatprep.subr.bf16.mxu1 %v9535_v57  ;;  %8598 = vmatprep.mubr.msk.f32.mxu0 %vm9534_vm4, %v9533_v24 }
0x2608   :  { %8609 = vmatprep.mubr.msk.f32.mxu1 %vm9534_vm4, %v9533_v24  ;;  %9112 = vmatprep.subr.bf16.mxu0 %v9535_v57 }
0x260a   :  { %9111 = vmatpush3.bf16.msra.mxu1 %v10469_v55 }
0x260b   :  { %9118 = vmatprep.subr.bf16.mxu1 %v9535_v57 }
0x26d8   :  { %v5222_v44 = vpop.f32.mrb[58].mxu0  ;;  %v5303_v20 = vpop.f32.mrb[70].mxu1 }
0x26d9   :  { %v5223_v35 = vadd.f32 %v10612_v19, %v5222_v44  ;;  %v5304_v13 = vadd.f32 %v10615_v15, %v5303_v20  ;;  %v8584_v45 = vpop.f32.mrb[59].mxu0  ;;  %v8595_v34 = vpop.f32.mrb[71].mxu1 }
0x26db   :  { %v10699_v46 = vadd.f32 %v5223_v35, %v10627_v31  ;;  %v10702_v47 = vadd.f32 %v5304_v13, %v10629_v48 }
0x26dd   :  { %8599 = vmatmul.mubr.msk.f32.vlgmr.msra.gmra.mrb[60].mxu0 %vm952_vm3, %v10702_v47  ;;  %8610 = vmatmul.mubr.msk.f32.vlgmr.msra.gmra.mrb[72].mxu1 %vm506_vm1, %v10699_v46 }
0x26de   :  { %9114 = vmatpush3.bf16.msra.mxu0 %v10488_v59  ;;  %8620 = vmatprep.mubr.msk.f32.mxu0 %vm9534_vm4, %v9533_v24 }
0x26df   :  { %9115 = vmatprep.subr.bf16.mxu0 %v9535_v57  ;;  %9120 = vmatpush3.bf16.msra.mxu1 %v10532_v25 }
0x26e0   :  { %9121 = vmatprep.subr.bf16.mxu1 %v9535_v57  ;;  %8631 = vmatprep.mubr.msk.f32.mxu1 %vm9534_vm4, %v9533_v24 }
0x26e2   :  { %9117 = vmatpush3.bf16.msra.mxu0 %v10501_v54 }
0x26e3   :  { %9123 = vmatpush3.bf16.msra.mxu1 %v10536_v41  ;;  %9124 = vmatprep.subr.bf16.mxu0 %v9535_v57 }
0x26e4   :  { %9130 = vmatprep.subr.bf16.mxu1 %v9535_v57 }
0x26e5   :  { %8621 = vmatmul.mubr.msk.f32.vlgmr.msra.gmra.mrb[62].mxu0 %vm506_vm1, %v4983_v62 }
0x26e6   :  { %9126 = vmatpush3.bf16.msra.mxu0 %v10544_v53  ;;  %8642 = vmatprep.mubr.msk.f32.mxu0 %vm9534_vm4, %v9533_v24 }
0x26e7   :  { %9127 = vmatprep.subr.bf16.mxu0 %v9535_v57 }
0x26ea   :  { %9129 = vmatpush3.bf16.msra.mxu0 %v10556_v22 }
0x26eb   :  { %9136 = vmatprep.subr.bf16.mxu0 %v9535_v57 }
0x27b0   :  { %v5378_v50 = vpop.f32.mrb[60].mxu0  ;;  %v5451_v39 = vpop.f32.mrb[72].mxu1 }
0x27b1   :  { %v5452_v30 = vadd.f32 %v5451_v39, %v5378_v50  ;;  %v8600_v31 = vpop.f32.mrb[61].mxu0  ;;  %v8611_v48 = vpop.f32.mrb[73].mxu1 }
0x27b8   :  { %v5521_v26 = vpop.f32.mrb[62].mxu0 }
0x27b9   :  { %v5525_v21 = vadd.f32 %v5521_v26, %v5452_v30  ;;  %v8622_v33 = vpop.f32.mrb[63].mxu0 }
0x27bb   :  { %v5526_v16 = vadd.f32 %v10515_v29, %v5525_v21 }
0x27bd   :  { %v5527_v27 = vmul.f32 %v5526_v16, %v10127_v56 }
0x27bf   :  { %9349 = vtanh.f32 %v5527_v27 }
0x27c9   :  { %v9350_v60 = vpop.eup %9349 }
0x27ca   :  { %v5529_v58 = vmul.f32 %v9350_v60, %v10127_v56 }
0x27cc   :  { %v5530_v61 = vadd.f32 %v5529_v58, %v10131_v51 }
0x27ce   :  { %5533 = vrot.lane.b32.xlu1 %v5530_v61, %s9538_s23  ;;  %v5531_v40 = vmul.f32 %v5530_v61, %v10662_v3 }
0x2840   :  { %v5534_v6 = vpop.permute.xlu1 %5533 }
0x2841   :  { %v5536_v38 = vmul.f32 %v5534_v6, %v5530_v61 }
0x2843   :  { %5538 = vrot.lane.b32.xlu0 %v5536_v38, %s9539_s26 }
0x28b5   :  { %v5539_v0 = vpop.permute.xlu0 %5538 }
0x28b6   :  { %v10734_v11 = vadd.f32 %v5539_v0, %v5531_v40 }
0x28b8   :  { %9351 = vtanh.f32 %v10734_v11 }
0x28c2   :  { %v9352_v5 = vpop.eup %9351 }
0x28c3   :  { %5544 = vrot.lane.b32.xlu1 %v9352_v5, %s9538_s23 }
0x2935   :  { %v5545_v14 = vpop.permute.xlu1 %5544 }
0x2936   :  { %v5547_v17 = vmul.f32 %v5545_v14, %v5530_v61 }
0x2938   :  { %5549 = vrot.lane.b32.xlu0 %v5547_v17, %s9539_s26 }
0x29aa   :  { %v5550_v49 = vpop.permute.xlu0 %5549 }
0x29ab   :  { %8632 = vmatmul.mubr.msk.f32.vlgmr.msra.gmra.mrb[74].mxu1 %vm506_vm1, %v5550_v49 }
0x29ac   :  { %9132 = vmatpush3.bf16.msra.mxu1 %v10562_v43  ;;  %8653 = vmatprep.mubr.msk.f32.mxu1 %vm9534_vm4, %v9533_v24 }
0x29ad   :  { %9133 = vmatprep.subr.bf16.mxu1 %v9535_v57 }
0x29b0   :  { %9135 = vmatpush3.bf16.msra.mxu1 %v10582_v37 }
0x29b1   :  { %8667 = vmatprep.subr.mxu1 %v9533_v24 }
0x2a7e   :  { %v5619_v3 = vpop.f32.mrb[74].mxu1 }
0x2a7f   :  { %v5620_v4 = vadd.f32 %v10567_v18, %v5619_v3  ;;  %v8633_v8 = vpop.f32.mrb[75].mxu1 }
0x2a81   :  { %v5623_v42 = vmax.f32 %v5620_v4, 0.0 }
0x2a83   :  { %8643 = vmatmul.mubr.msk.f32.vlgmr.msra.gmra.mrb[64].mxu0 %vm506_vm1, %v5623_v42 }
0x2a84   :  { %9138 = vmatpush3.bf16.msra.mxu0 %v10572_v28  ;;  %8664 = vmatprep.mubr.msk.f32.mxu0 %vm9534_vm4, %v9533_v24 }
0x2a85   :  { %9139 = vmatprep.subr.bf16.mxu0 %v9535_v57 }
0x2a88   :  { %9141 = vmatpush3.bf16.msra.mxu0 %v10585_v2 }
0x2a89   :  { %9142 = vmatprep.subr.bf16.mxu0 %v9535_v57 }
0x2b56   :  { %v5693_v62 = vpop.f32.mrb[64].mxu0 }
0x2b57   :  { %v5694_v1 = vadd.f32 %v10592_v10, %v5693_v62  ;;  %v8644_v63 = vpop.f32.mrb[65].mxu0  ;;  %v6452_v62 = vld [vmem:[%s11001_s6] sm:$0xf] }
0x2b59   :  { %v5697_v9 = vmax.f32 %v5694_v1, 0.0 }
0x2b5b   :  { %8654 = vmatmul.mubr.msk.f32.vlgmr.msra.gmra.mrb[76].mxu1 %vm506_vm1, %v5697_v9  ;;  %8665 = vmatmul.mubr.msk.f32.vlgmr.msra.gmra.mrb[66].mxu0 %vm506_vm1, %v5697_v9 }
0x2b5c   :  { %9144 = vmatpush3.bf16.msra.mxu0 %v10463_v23  ;;  %8669 = vmatprep.mubr.msk.f32.mxu1 %vm9534_vm4, %v9533_v24 }
0x2b5d   :  { %9145 = vmatprep.subr.bf16.mxu0 %v9535_v57  ;;  %8680 = vmatprep.mubr.msk.f32.mxu0 %vm9534_vm4, %v9533_v24 }
0x2b5e   :  { %8668 = vmatpush3.msk.msra.mxu1 %vm971_vm2, %v5851_v7 }
0x2b5f   :  { %9148 = vmatprep.subr.bf16.mxu1 %v9535_v57 }
0x2b60   :  { %9147 = vmatpush3.bf16.msra.mxu0 %v10469_v55 }
0x2b61   :  { %9154 = vmatprep.subr.bf16.mxu0 %v9535_v57 }
0x2c2e   :  { %v5767_v12 = vpop.f32.mrb[76].mxu1  ;;  %v5837_v32 = vpop.f32.mrb[66].mxu0 }
0x2c2f   :  { %v5768_v36 = vadd.f32 %v10612_v19, %v5767_v12  ;;  %v5838_v52 = vadd.f32 %v10615_v15, %v5837_v32  ;;  %v8655_v44 = vpop.f32.mrb[77].mxu1  ;;  %v8666_v20 = vpop.f32.mrb[67].mxu0 }
0x2c31   :  { %v10771_v35 = vadd.f32 %v5768_v36, %v10699_v46  ;;  %v10774_v13 = vadd.f32 %v5838_v52, %v10702_v47 }
0x2c33   :  { %7589 = vst.msk [vmem:[%s9753_s13 + $0x28] sm:$0xff] %vm506_vm1, %v10771_v35  ;;  %8670 = vmatmul.mubr.msk.f32.vlgmr.msra.gmra.mrb[78].mxu1 %vm952_vm3, %v10774_v13  ;;  %8681 = vmatmul.mubr.msk.f32.vlgmr.msra.gmra.mrb[68].mxu0 %vm506_vm1, %v10771_v35 }
0x2c34   :  { %7590 = vst.msk [vmem:[%s9758_s17 + $0x28] sm:$0xff] %vm952_vm3, %v10774_v13  ;;  %9150 = vmatpush3.bf16.msra.mxu1 %v10488_v59  ;;  %8691 = vmatprep.mubr.msk.f32.mxu1 %vm9534_vm4, %v9533_v24 }
0x2c35   :  { %9151 = vmatprep.subr.bf16.mxu1 %v9535_v57  ;;  %9156 = vmatpush3.bf16.msra.mxu0 %v10532_v25 }
0x2c36   :  { %9157 = vmatprep.subr.bf16.mxu0 %v9535_v57  ;;  %8702 = vmatprep.mubr.msk.f32.mxu0 %vm9534_vm4, %v9533_v24 }
0x2c38   :  { %9153 = vmatpush3.bf16.msra.mxu1 %v10501_v54 }
0x2c39   :  { %9159 = vmatpush3.bf16.msra.mxu0 %v10536_v41  ;;  %9160 = vmatprep.subr.bf16.mxu1 %v9535_v57 }
0x2c3a   :  { %9166 = vmatprep.subr.bf16.mxu0 %v9535_v57 }
0x2c3b   :  { %8692 = vmatmul.mubr.msk.f32.vlgmr.msra.gmra.mrb[80].mxu1 %vm506_vm1, %v5550_v49 }
0x2c3c   :  { %9162 = vmatpush3.bf16.msra.mxu1 %v10544_v53  ;;  %8713 = vmatprep.mubr.msk.f32.mxu1 %vm9534_vm4, %v9533_v24 }
0x2c3d   :  { %9163 = vmatprep.subr.bf16.mxu1 %v9535_v57 }
0x2c40   :  { %9165 = vmatpush3.bf16.msra.mxu1 %v10556_v22 }
0x2c41   :  { %9172 = vmatprep.subr.bf16.mxu1 %v9535_v57 }
0x2d06   :  { %v5924_v45 = vpop.f32.mrb[78].mxu1  ;;  %v5997_v34 = vpop.f32.mrb[68].mxu0 }
0x2d07   :  { %v5998_v46 = vadd.f32 %v5997_v34, %v5924_v45  ;;  %v8671_v47 = vpop.f32.mrb[79].mxu1  ;;  %v8682_v50 = vpop.f32.mrb[69].mxu0 }
0x2d0e   :  { %v6071_v39 = vpop.f32.mrb[80].mxu1 }
0x2d0f   :  { %v6075_v30 = vadd.f32 %v6071_v39, %v5998_v46  ;;  %v8693_v31 = vpop.f32.mrb[81].mxu1 }
0x2d11   :  { %v6083_v48 = vadd.f32 %v10515_v29, %v6075_v30 }
0x2d13   :  { %v6084_v26 = vmul.f32 %v6083_v48, %v10127_v56 }
0x2d15   :  { %9353 = vtanh.f32 %v6084_v26 }
0x2d1f   :  { %v9354_v21 = vpop.eup %9353 }
0x2d20   :  { %v6086_v33 = vmul.f32 %v9354_v21, %v10127_v56 }
0x2d22   :  { %v6087_v16 = vadd.f32 %v6086_v33, %v10131_v51 }
0x2d24   :  { %6090 = vrot.lane.b32.xlu1 %v6087_v16, %s9538_s23  ;;  %v6088_v58 = vmul.f32 %v6087_v16, %v10734_v11 }
0x2d96   :  { %v6091_v27 = vpop.permute.xlu1 %6090 }
0x2d97   :  { %v6093_v60 = vmul.f32 %v6091_v27, %v6087_v16 }
0x2d99   :  { %6095 = vrot.lane.b32.xlu0 %v6093_v60, %s9539_s26 }
0x2e0b   :  { %v6096_v61 = vpop.permute.xlu0 %6095 }
0x2e0c   :  { %v10812_v6 = vadd.f32 %v6096_v61, %v6088_v58 }
0x2e0e   :  { %9355 = vtanh.f32 %v10812_v6 }
0x2e18   :  { %v9356_v38 = vpop.eup %9355 }
0x2e19   :  { %6101 = vrot.lane.b32.xlu1 %v9356_v38, %s9538_s23 }
0x2e8b   :  { %v6102_v40 = vpop.permute.xlu1 %6101 }
0x2e8c   :  { %v6104_v0 = vmul.f32 %v6102_v40, %v6087_v16 }
0x2e8e   :  { %6117 = vrot.lane.b32.xlu0 %v6104_v0, %s9539_s26 }
0x2f00   :  { %v6118_v5 = vpop.permute.xlu0 %6117 }
0x2f01   :  { %8703 = vmatmul.mubr.msk.f32.vlgmr.msra.gmra.mrb[70].mxu0 %vm506_vm1, %v6118_v5 }
0x2f02   :  { %9168 = vmatpush3.bf16.msra.mxu0 %v10562_v43  ;;  %8724 = vmatprep.mubr.msk.f32.mxu0 %vm9534_vm4, %v9533_v24 }
0x2f03   :  { %9169 = vmatprep.subr.bf16.mxu0 %v9535_v57 }
0x2f06   :  { %9171 = vmatpush3.bf16.msra.mxu0 %v10582_v37 }
0x2f07   :  { %8738 = vmatprep.subr.mxu0 %v9533_v24 }
0x2fd4   :  { %v6187_v11 = vpop.f32.mrb[70].mxu0 }
0x2fd5   :  { %v6188_v14 = vadd.f32 %v10567_v18, %v6187_v11  ;;  %v8704_v17 = vpop.f32.mrb[71].mxu0 }
0x2fd6   :  { %v7140_v17 = vld [vmem:[%s11016_s7 + $0x8] sm:$0xff] }
0x2fd7   :  { %v6191_v49 = vmax.f32 %v6188_v14, 0.0  ;;  %v7139_v14 = vld [vmem:[%s11016_s7] sm:$0xff] }
0x2fd9   :  { %8714 = vmatmul.mubr.msk.f32.vlgmr.msra.gmra.mrb[82].mxu1 %vm506_vm1, %v6191_v49  ;;  %v9221_v49 = vpack.c.bf16 %v7140_v17, %v7139_v14 }
0x2fda   :  { %9174 = vmatpush3.bf16.msra.mxu1 %v10572_v28  ;;  %8735 = vmatprep.mubr.msk.f32.mxu1 %vm9534_vm4, %v9533_v24 }
0x2fdb   :  { %9175 = vmatprep.subr.bf16.mxu1 %v9535_v57 }
0x2fde   :  { %9177 = vmatpush3.bf16.msra.mxu1 %v10585_v2 }
0x2fdf   :  { %9178 = vmatprep.subr.bf16.mxu1 %v9535_v57 }
0x30ac   :  { %v6272_v3 = vpop.f32.mrb[82].mxu1 }
0x30ad   :  { %v6273_v4 = vadd.f32 %v10592_v10, %v6272_v3  ;;  %v8715_v8 = vpop.f32.mrb[83].mxu1 }
0x30af   :  { %v6276_v42 = vmax.f32 %v6273_v4, 0.0  ;;  %v7631_v4 = vld [vmem:[#allocation6] ss:$0 sm:$0xff] }
0x30b1   :  { %8725 = vmatmul.mubr.msk.f32.vlgmr.msra.gmra.mrb[72].mxu0 %vm506_vm1, %v6276_v42  ;;  %8736 = vmatmul.mubr.msk.f32.vlgmr.msra.gmra.mrb[84].mxu1 %vm506_vm1, %v6276_v42 }
0x30b2   :  { %9180 = vmatpush3.bf16.msra.mxu1 %v10463_v23  ;;  %8740 = vmatprep.mubr.msk.f32.mxu0 %vm9534_vm4, %v9533_v24 }
0x30b3   :  { %9181 = vmatprep.subr.bf16.mxu1 %v9535_v57  ;;  %8751 = vmatprep.mubr.msk.f32.mxu1 %vm9534_vm4, %v9533_v24 }
0x30b4   :  { %8739 = vmatpush3.msk.msra.mxu0 %vm971_vm2, %v6452_v62 }
0x30b5   :  { %9184 = vmatprep.subr.bf16.mxu0 %v9535_v57 }
0x30b6   :  { %9183 = vmatpush3.bf16.msra.mxu1 %v10469_v55 }
0x30b7   :  { %9190 = vmatprep.subr.bf16.mxu1 %v9535_v57 }
0x3184   :  { %v6357_v23 = vpop.f32.mrb[72].mxu0  ;;  %v6438_v1 = vpop.f32.mrb[84].mxu1 }
0x3185   :  { %v6358_v63 = vadd.f32 %v10612_v19, %v6357_v23  ;;  %v6439_v9 = vadd.f32 %v10615_v15, %v6438_v1  ;;  %v8726_v7 = vpop.f32.mrb[73].mxu0  ;;  %v8737_v12 = vpop.f32.mrb[85].mxu1 }
0x3186   :  { %v7230_v7 = vld [vmem:[%s11017_s10 + $0x8] sm:$0xff]  ;;  %v7231_v12 = vld [vmem:[%s11017_s10 + $0x10] sm:$0xff] }
0x3187   :  { %v10849_v32 = vadd.f32 %v6358_v63, %v10771_v35  ;;  %v10852_v55 = vadd.f32 %v6439_v9, %v10774_v13  ;;  %v7229_v9 = vld [vmem:[%s11017_s10] sm:$0xff] }
0x3189   :  { %7609 = vst.msk [vmem:[%s9753_s13 + $0x30] sm:$0xff] %vm506_vm1, %v10849_v32  ;;  %8741 = vmatmul.mubr.msk.f32.vlgmr.msra.gmra.mrb[74].mxu0 %vm952_vm3, %v10852_v55  ;;  %8752 = vmatmul.mubr.msk.f32.vlgmr.msra.gmra.mrb[86].mxu1 %vm506_vm1, %v10849_v32 }
0x318a   :  { %7610 = vst.msk [vmem:[%s9758_s17 + $0x30] sm:$0xff] %vm952_vm3, %v10852_v55  ;;  %9186 = vmatpush3.bf16.msra.mxu0 %v10488_v59  ;;  %8762 = vmatprep.mubr.msk.f32.mxu0 %vm9534_vm4, %v9533_v24 }
0x318b   :  { %9187 = vmatprep.subr.bf16.mxu0 %v9535_v57  ;;  %9192 = vmatpush3.bf16.msra.mxu1 %v10532_v25 }
0x318c   :  { %9193 = vmatprep.subr.bf16.mxu1 %v9535_v57  ;;  %8773 = vmatprep.mubr.msk.f32.mxu1 %vm9534_vm4, %v9533_v24 }
0x318e   :  { %9189 = vmatpush3.bf16.msra.mxu0 %v10501_v54 }
0x318f   :  { %9195 = vmatpush3.bf16.msra.mxu1 %v10536_v41  ;;  %9196 = vmatprep.subr.bf16.mxu0 %v9535_v57 }
0x3190   :  { %9202 = vmatprep.subr.bf16.mxu1 %v9535_v57 }
0x3191   :  { %8763 = vmatmul.mubr.msk.f32.vlgmr.msra.gmra.mrb[76].mxu0 %vm506_vm1, %v6118_v5 }
0x3192   :  { %9198 = vmatpush3.bf16.msra.mxu0 %v10544_v53  ;;  %8784 = vmatprep.mubr.msk.f32.mxu0 %vm9534_vm4, %v9533_v24 }
0x3193   :  { %9199 = vmatprep.subr.bf16.mxu0 %v9535_v57 }
0x3196   :  { %9201 = vmatpush3.bf16.msra.mxu0 %v10556_v22 }
0x3197   :  { %9208 = vmatprep.subr.bf16.mxu0 %v9535_v57 }
0x325c   :  { %v6525_v59 = vpop.f32.mrb[74].mxu0  ;;  %v6598_v54 = vpop.f32.mrb[86].mxu1 }
0x325d   :  { %v6599_v25 = vadd.f32 %v6598_v54, %v6525_v59  ;;  %v8742_v41 = vpop.f32.mrb[75].mxu0  ;;  %v8753_v36 = vpop.f32.mrb[87].mxu1  ;;  %v7634_v54 = vld [vmem:[#allocation7] ss:$0 sm:$0xff] }
0x3264   :  { %v6672_v52 = vpop.f32.mrb[76].mxu0 }
0x3265   :  { %v6676_v44 = vadd.f32 %v6672_v52, %v6599_v25  ;;  %v8764_v20 = vpop.f32.mrb[77].mxu0 }
0x3267   :  { %v6684_v35 = vadd.f32 %v10515_v29, %v6676_v44 }
0x3269   :  { %v6685_v53 = vmul.f32 %v6684_v35, %v10127_v56 }
0x326b   :  { %9357 = vtanh.f32 %v6685_v53  ;;  %v7637_v53 = vld [vmem:[#allocation9] ss:$0 sm:$0xff] }
0x3275   :  { %v9358_v13 = vpop.eup %9357 }
0x3276   :  { %v6687_v45 = vmul.f32 %v9358_v13, %v10127_v56 }
0x3278   :  { %v6688_v22 = vadd.f32 %v6687_v45, %v10131_v51 }
0x327a   :  { %6691 = vrot.lane.b32.xlu1 %v6688_v22, %s9538_s23  ;;  %v6689_v47 = vmul.f32 %v6688_v22, %v10812_v6 }
0x32ec   :  { %v6692_v34 = vpop.permute.xlu1 %6691 }
0x32ed   :  { %v6694_v46 = vmul.f32 %v6692_v34, %v6688_v22 }
0x32ef   :  { %6696 = vrot.lane.b32.xlu0 %v6694_v46, %s9539_s26 }
0x3361   :  { %v6697_v50 = vpop.permute.xlu0 %6696 }
0x3362   :  { %v6699_v39 = vadd.f32 %v6697_v50, %v6689_v47 }
0x3364   :  { %9359 = vtanh.f32 %v6699_v39 }
0x336e   :  { %v9360_v29 = vpop.eup %9359 }
0x336f   :  { %6702 = vrot.lane.b32.xlu1 %v9360_v29, %s9538_s23 }
0x33e1   :  { %v6703_v30 = vpop.permute.xlu1 %6702 }
0x33e2   :  { %v6705_v31 = vmul.f32 %v6703_v30, %v6688_v22 }
0x33e4   :  { %6718 = vrot.lane.b32.xlu0 %v6705_v31, %s9539_s26 }
0x3456   :  { %v6719_v56 = vpop.permute.xlu0 %6718 }
0x3457   :  { %8774 = vmatmul.mubr.msk.f32.vlgmr.msra.gmra.mrb[88].mxu1 %vm506_vm1, %v6719_v56 }
0x3458   :  { %9204 = vmatpush3.bf16.msra.mxu1 %v10562_v43  ;;  %8795 = vmatprep.mubr.msk.f32.mxu1 %vm9534_vm4, %v9533_v24  ;;  %v7049_v43 = vld [vmem:[%s11015_s0] sm:$0xff] }
0x3459   :  { %9205 = vmatprep.subr.bf16.mxu1 %v9535_v57 }
0x345c   :  { %9207 = vmatpush3.bf16.msra.mxu1 %v10582_v37  ;;  %v7050_v37 = vld [vmem:[%s11015_s0 + $0x8] sm:$0xff] }
0x345d   :  { %9214 = vmatprep.subr.bf16.mxu1 %v9535_v57  ;;  %v9215_v27 = vpack.c.bf16 %v7050_v37, %v7049_v43 }
0x352a   :  { %v6788_v51 = vpop.f32.mrb[88].mxu1 }
0x352b   :  { %v6789_v48 = vadd.f32 %v10567_v18, %v6788_v51  ;;  %v8775_v26 = vpop.f32.mrb[89].mxu1 }
0x352d   :  { %v6792_v21 = vmax.f32 %v6789_v48, 0.0 }
0x352f   :  { %8785 = vmatmul.mubr.msk.f32.vlgmr.msra.gmra.mrb[78].mxu0 %vm506_vm1, %v6792_v21 }
0x3530   :  { %9210 = vmatpush3.bf16.msra.mxu0 %v10572_v28  ;;  %8806 = vmatprep.mubr.msk.f32.mxu0 %vm9534_vm4, %v9533_v24  ;;  %v7051_v28 = vld [vmem:[%s11015_s0 + $0x10] sm:$0xff] }
0x3531   :  { %9211 = vmatprep.subr.bf16.mxu0 %v9535_v57 }
0x3534   :  { %9213 = vmatpush3.bf16.msra.mxu0 %v10585_v2  ;;  %v7052_v2 = vld [vmem:[%s11015_s0 + $0x18] sm:$0xff] }
0x3535   :  { %9220 = vmatprep.subr.bf16.mxu0 %v9535_v57 }
0x3602   :  { %v6873_v18 = vpop.f32.mrb[78].mxu0 }
0x3603   :  { %v6874_v33 = vadd.f32 %v10592_v10, %v6873_v18  ;;  %v8786_v16 = vpop.f32.mrb[79].mxu0  ;;  %v9218_v10 = vpack.c.bf16 %v7052_v2, %v7051_v28 }
0x3605   :  { %v6877_v60 = vmax.f32 %v6874_v33, 0.0 }
0x3607   :  { %8796 = vmatmul.mubr.msk.f32.vlgmr.msra.gmra.mrb[90].mxu1 %vm506_vm1, %v6877_v60  ;;  %8807 = vmatmul.mubr.msk.f32.vlgmr.msra.gmra.mrb[80].mxu0 %vm506_vm1, %v6877_v60 }
0x3608   :  { %9216 = vmatpush3.bf16.msra.mxu1 %v9215_v27  ;;  %8817 = vmatprep.mubr.msk.f32.mxu1 %vm9534_vm4, %v9533_v24 }
0x3609   :  { %9217 = vmatprep.subr.bf16.mxu1 %v9535_v57  ;;  %8828 = vmatprep.mubr.msk.f32.mxu0 %vm9534_vm4, %v9533_v24 }
0x360a   :  { %9222 = vmatpush3.bf16.msra.mxu0 %v9221_v49 }
0x360b   :  { %9223 = vmatprep.subr.bf16.mxu0 %v9535_v57 }
0x360c   :  { %9219 = vmatpush3.bf16.msra.mxu1 %v9218_v10 }
0x360d   :  { %9226 = vmatprep.subr.bf16.mxu1 %v9535_v57 }
0x36da   :  { %v6958_v58 = vpop.f32.mrb[90].mxu1  ;;  %v7039_v61 = vpop.f32.mrb[80].mxu0 }
0x36db   :  { %v6959_v6 = vadd.f32 %v10612_v19, %v6958_v58  ;;  %v7040_v38 = vadd.f32 %v10615_v15, %v7039_v61  ;;  %v8797_v40 = vpop.f32.mrb[91].mxu1  ;;  %v8808_v0 = vpop.f32.mrb[81].mxu0  ;;  %v7141_v19 = vld [vmem:[%s11016_s7 + $0x10] sm:$0xff]  ;;  %v7142_v15 = vld [vmem:[%s11016_s7 + $0x18] sm:$0xff] }
0x36dc   :  { %v9224_v3 = vpack.c.bf16 %v7142_v15, %v7141_v19 }
0x36dd   :  { %v7043_v5 = vadd.f32 %v6959_v6, %v10849_v32  ;;  %v7044_v11 = vadd.f32 %v7040_v38, %v10852_v55  ;;  %v9227_v32 = vpack.c.bf16 %v7230_v7, %v7229_v9  ;;  %v7232_v55 = vld [vmem:[%s11017_s10 + $0x18] sm:$0xff] }
0x36de   :  { %9225 = vmatpush3.bf16.msra.mxu0 %v9224_v3  ;;  %v9230_v59 = vpack.c.bf16 %v7232_v55, %v7231_v12 }
0x36df   :  { %7629 = vst.msk [vmem:[%s9753_s13 + $0x38] sm:$0xff] %vm506_vm1, %v7043_v5  ;;  %8818 = vmatmul.mubr.msk.f32.vlgmr.msra.gmra.mrb[92].mxu1 %vm506_vm1, %v7043_v5 }
0x36e0   :  { %7630 = vst.msk [vmem:[%s9758_s17 + $0x38] sm:$0xff] %vm952_vm3, %v7044_v11  ;;  %8839 = vmatprep.mubr.msk.f32.mxu1 %vm9534_vm4, %v9533_v24  ;;  %9228 = vmatpush3.bf16.msra.mxu1 %v9227_v32 }
0x36e1   :  { %9229 = vmatprep.subr.bf16.mxu1 %v9535_v57 }
0x36e4   :  { %9231 = vmatpush3.bf16.msra.mxu1 %v9230_v59 }
0x37b2   :  { %v7129_v8 = vpop.f32.mrb[92].mxu1 }
0x37b3   :  { %v7130_v42 = vadd.f32 %v7631_v4, %v7129_v8  ;;  %v8819_v62 = vpop.f32.mrb[93].mxu1 }
0x37b5   :  { %v7633_v23 = vmul.f32 -1.442695, %v7130_v42 }
0x37b7   :  { %9361 = vpow2.f32 %v7633_v23 }
0x37c1   :  { %v9362_v24 = vpop.eup %9361 }
0x37c2   :  { %v7136_v1 = vadd.f32 1.0, %v9362_v24 }
0x37c4   :  { %9363 = vrcp.f32 %v7136_v1 }
0x37ce   :  { %v9364_v63 = vpop.eup %9363 }
0x37cf   :  { %8829 = vmatmul.mubr.msk.f32.vlgmr.msra.gmra.mrb[82].mxu0 %vm506_vm1, %v9364_v63 }
0x38a2   :  { %v7219_v25 = vpop.f32.mrb[82].mxu0 }
0x38a3   :  { %v7220_v41 = vadd.f32 %v7634_v54, %v7219_v25  ;;  %v8830_v36 = vpop.f32.mrb[83].mxu0 }
0x38a5   :  { %v7636_v52 = vmul.f32 -1.442695, %v7220_v41 }
0x38a7   :  { %9365 = vpow2.f32 %v7636_v52 }
0x38b1   :  { %v9366_v44 = vpop.eup %9365 }
0x38b2   :  { %v7226_v20 = vadd.f32 1.0, %v9366_v44 }
0x38b4   :  { %9367 = vrcp.f32 %v7226_v20 }
0x38be   :  { %v9368_v35 = vpop.eup %9367 }
0x38bf   :  { %8840 = vmatmul.mubr.msk.f32.vlgmr.msra.gmra.mrb[94].mxu1 %vm506_vm1, %v9368_v35 }
0x3992   :  { %v7309_v13 = vpop.f32.mrb[94].mxu1 }
0x3993   :  { %v7310_v45 = vadd.f32 %v7637_v53, %v7309_v13  ;;  %v8841_v22 = vpop.f32.mrb[95].mxu1 }
0x3995   :  { %7314 = vst.msk [vmem:[%s9763_s24] sm:$0xff] %vm7313_vm8, %v7310_v45 }
0x3996   :  { %7339 = vsyncpa [#allocation3], 1 }
0x3997   :  { %7340 = vsyncpa [#allocation5], 1 }
0x3998   :  { %7341 = vsyncpa [#allocation8], 1 }

</bundles_post_ra>
